<compile_context>
chip_gen: v6e
topology: v6e:2x2x1
jax: 0.10.0
libtpu: 0.0.40
codegen_flags: <defaults>
</compile_context>

<pallas_src>
import functools
import math

import jax
import jax.numpy as jnp
from jax import lax
from jax.experimental import pallas as pl
from jax.experimental.pallas import tpu as pltpu

ACT_DTYPE = jnp.bfloat16      # inter-stage activations in HBM
COMPUTE_DTYPE = jnp.bfloat16  # matmul operand dtype (MXU native); accum is f32
EPS = 1e-5
VMEM_LIMIT = 32 * 1024 * 1024  # safe on v5e/v6e/v7x; actual use here is tiny


# --------------------------------------------------------------------------
# In-kernel helpers
# --------------------------------------------------------------------------
def _conv3_matmul(x_ref, w_ref, cin, lout, stride, fuse_k):
    """k=3 Conv1d as MXU matmul(s) over taps sliced from `x_ref`.

    stride==1: x_ref is (Lin+2, cin); tap k = rows [k, k+lout).
    stride==2: x_ref is the row-pair view (Lpad//2, 2*cin) where row j holds
               [x_pad[2j] | x_pad[2j+1]] on the lane axis.
    Returns an f32 (lout, cout) accumulator (bias not yet added).
    """
    if stride == 1:
        if fuse_k:
            # Single K = 3*cin contraction (lane-aligned concat: cin % 128 == 0).
            xcat = jnp.concatenate([x_ref[k:k + lout, :] for k in range(3)],
                                   axis=-1)
            return jnp.dot(xcat, w_ref[...], preferred_element_type=jnp.float32)
        acc = jnp.dot(x_ref[0:lout, :], w_ref[0:cin, :],
                      preferred_element_type=jnp.float32)
        for k in (1, 2):
            acc = acc + jnp.dot(x_ref[k:k + lout, :],
                                w_ref[k * cin:(k + 1) * cin, :],
                                preferred_element_type=jnp.float32)
        return acc

    # stride == 2 (row-pair view): taps 0 and 1 are already side by side.
    t01 = x_ref[0:lout, :]                 # (lout, 2*cin) = [tap0 | tap1]
    t2 = x_ref[1:1 + lout, 0:cin]          # (lout, cin)   = tap2
    if fuse_k:
        xcat = jnp.concatenate([t01, t2], axis=-1)   # (lout, 3*cin), aligned
        return jnp.dot(xcat, w_ref[...], preferred_element_type=jnp.float32)
    acc = jnp.dot(t01[:, 0:cin], w_ref[0:cin, :],
                  preferred_element_type=jnp.float32)
    acc = acc + jnp.dot(t01[:, cin:2 * cin], w_ref[cin:2 * cin, :],
                        preferred_element_type=jnp.float32)
    acc = acc + jnp.dot(t2, w_ref[2 * cin:3 * cin, :],
                        preferred_element_type=jnp.float32)
    return acc


def _group_norm(acc, gamma, beta, mask_cg, mask_gc, n_per_group):
    """GroupNorm over (channels-in-group, L), two-pass (mean-centered) variance.

    acc: (L, C) f32; gamma/beta: (1, C) f32; masks: (C, G) / (G, C) f32 constants.
    """
    inv_n = 1.0 / n_per_group
    s_c = jnp.sum(acc, axis=0, keepdims=True)                       # (1, C)
    mean_c = jnp.dot(
        jnp.dot(s_c, mask_cg, preferred_element_type=jnp.float32) * inv_n,
        mask_gc, preferred_element_type=jnp.float32)                # (1, C)
    centered = acc - mean_c
    ss_c = jnp.sum(centered * centered, axis=0, keepdims=True)      # (1, C)
    var_c = jnp.dot(
        jnp.dot(ss_c, mask_cg, preferred_element_type=jnp.float32) * inv_n,
        mask_gc, preferred_element_type=jnp.float32)                # (1, C)
    return centered * lax.rsqrt(var_c + EPS) * gamma + beta


def _store_padded(o_ref, y):
    """Write y into rows [1, L+1) of o_ref and zero the 1-row halo on each side."""
    lout = y.shape[0]
    zero_row = jnp.zeros((1, o_ref.shape[1]), o_ref.dtype)
    o_ref[0:1, :] = zero_row
    o_ref[lout + 1:lout + 2, :] = zero_row
    o_ref[1:lout + 1, :] = y.astype(o_ref.dtype)


# --------------------------------------------------------------------------
# Kernels
# --------------------------------------------------------------------------
def _conv_kernel(x_ref, w_ref, b_ref, o_ref, *, cin, stride, fuse_k, relu):
    lout = o_ref.shape[0] - 2
    acc = _conv3_matmul(x_ref, w_ref, cin, lout, stride, fuse_k) + b_ref[...]
    if relu:
        acc = jnp.maximum(acc, 0.0)
    _store_padded(o_ref, acc)


def _conv_gn_relu_kernel(x_ref, w_ref, b_ref, g_ref, be_ref, mcg_ref, mgc_ref,
                         o_ref, *, cin, stride, fuse_k, group_size):
    lout = o_ref.shape[0] - 2
    acc = _conv3_matmul(x_ref, w_ref, cin, lout, stride, fuse_k) + b_ref[...]
    acc = _group_norm(acc, g_ref[...], be_ref[...], mcg_ref[...], mgc_ref[...],
                      float(lout * group_size))
    _store_padded(o_ref, jnp.maximum(acc, 0.0))


def _resblock_kernel(x_ref, w1_ref, b1_ref, g1_ref, be1_ref,
                     w2_ref, b2_ref, g2_ref, be2_ref, mcg_ref, mgc_ref,
                     o_ref, h_ref, *, chan, fuse_k, group_size):
    """relu( GN(conv(relu(GN(conv(x))))) + x ), fully fused; `h` stays in VMEM."""
    l = o_ref.shape[0] - 2
    n = float(l * group_size)

    # conv1 + GN + ReLU
    a1 = _conv3_matmul(x_ref, w1_ref, chan, l, 1, fuse_k) + b1_ref[...]
    h = jnp.maximum(
        _group_norm(a1, g1_ref[...], be1_ref[...], mcg_ref[...], mgc_ref[...], n),
        0.0)

    # stage h (with zero halo rows) in VMEM scratch so conv2 can take its taps
    zero_row = jnp.zeros((1, chan), h_ref.dtype)
    h_ref[0:1, :] = zero_row
    h_ref[l + 1:l + 2, :] = zero_row
    h_ref[1:l + 1, :] = h.astype(h_ref.dtype)

    # conv2 + GN, residual, ReLU
    a2 = _conv3_matmul(h_ref, w2_ref, chan, l, 1, fuse_k) + b2_ref[...]
    y = _group_norm(a2, g2_ref[...], be2_ref[...], mcg_ref[...], mgc_ref[...], n)
    y = y + x_ref[1:l + 1, :].astype(jnp.float32)
    _store_padded(o_ref, jnp.maximum(y, 0.0))


# --------------------------------------------------------------------------
# Wrappers
# --------------------------------------------------------------------------
def _group_masks(c, g):
    gs = c // g
    cid = jnp.arange(c, dtype=jnp.int32)
    m = (cid[:, None] // gs == jnp.arange(g, dtype=jnp.int32)[None, :])
    m = m.astype(jnp.float32)
    return m, m.T                       # (C, G), (G, C)


def conv_stage(x_pad, w, b, *, stride, gn=None,
               act_dtype=ACT_DTYPE, compute_dtype=COMPUTE_DTYPE):
    """Conv1d(k=3, pad=1, stride) [+ GroupNorm + ReLU].

    x_pad: [B, Lin+2, Cin] activation with zero halo rows (act_dtype).
    w: [3, Cin, Cout] f32; b: [Cout] f32; gn: None or (gamma, beta, num_groups).
    Returns [B, Lout+2, Cout] with zero halo rows (act_dtype).
    """
    assert stride in (1, 2)
    B, Lpad, Cin = x_pad.shape
    Lin = Lpad - 2
    K, _, Cout = w.shape
    assert K == 3
    Lout = (Lin - 1) // stride + 1
    fuse_k = (Cin % 128 == 0)

    if stride == 2:
        if Lpad % 2:
            x_pad = jnp.pad(x_pad, ((0, 0), (0, 1), (0, 0)))
            Lpad += 1
        # free, layout-preserving view: consecutive row pairs side-by-side on lanes
        x_in = x_pad.reshape(B, Lpad // 2, 2 * Cin)
    else:
        x_in = x_pad
    in_rows, in_cols = x_in.shape[1], x_in.shape[2]

    w2 = w.reshape(K * Cin, Cout).astype(compute_dtype)
    b2 = b.reshape(1, Cout).astype(jnp.float32)

    x_spec = pl.BlockSpec((None, in_rows, in_cols), lambda i: (i, 0, 0))
    o_spec = pl.BlockSpec((None, Lout + 2, Cout), lambda i: (i, 0, 0))
    w_spec = pl.BlockSpec((K * Cin, Cout), lambda i: (0, 0))
    v_spec = pl.BlockSpec((1, Cout), lambda i: (0, 0))
    cp = pltpu.CompilerParams(dimension_semantics=("parallel",),
                              vmem_limit_bytes=VMEM_LIMIT)
    out_shape = jax.ShapeDtypeStruct((B, Lout + 2, Cout), act_dtype)

    if gn is None:
        kernel = functools.partial(_conv_kernel, cin=Cin, stride=stride,
                                   fuse_k=fuse_k, relu=False)
        return pl.pallas_call(
            kernel, out_shape=out_shape, grid=(B,),
            in_specs=[x_spec, w_spec, v_spec],
            out_specs=o_spec, compiler_params=cp,
        )(x_in, w2, b2)

    gamma, beta, num_groups = gn
    assert Cout % num_groups == 0, (Cout, num_groups)
    mcg, mgc = _group_masks(Cout, num_groups)
    kernel = functools.partial(_conv_gn_relu_kernel, cin=Cin, stride=stride,
                               fuse_k=fuse_k, group_size=Cout // num_groups)
    m1_spec = pl.BlockSpec((Cout, num_groups), lambda i: (0, 0))
    m2_spec = pl.BlockSpec((num_groups, Cout), lambda i: (0, 0))
    return pl.pallas_call(
        kernel, out_shape=out_shape, grid=(B,),
        in_specs=[x_spec, w_spec, v_spec, v_spec, v_spec, m1_spec, m2_spec],
        out_specs=o_spec, compiler_params=cp,
    )(x_in, w2, b2,
      gamma.reshape(1, Cout).astype(jnp.float32),
      beta.reshape(1, Cout).astype(jnp.float32), mcg, mgc)


def resblock(x_pad, p, *, act_dtype=ACT_DTYPE, compute_dtype=COMPUTE_DTYPE):
    """Fused ResBlock on a halo-padded activation [B, L+2, C] -> [B, L+2, C]."""
    B, Lpad, C = x_pad.shape
    assert C % 8 == 0
    num_groups = C // 8
    fuse_k = (C % 128 == 0)
    mcg, mgc = _group_masks(C, num_groups)

    w1 = p['w1'].reshape(3 * C, C).astype(compute_dtype)
    w2 = p['w2'].reshape(3 * C, C).astype(compute_dtype)
    b1 = p['b1'].reshape(1, C).astype(jnp.float32)
    b2 = p['b2'].reshape(1, C).astype(jnp.float32)
    g1 = p['g1'].reshape(1, C).astype(jnp.float32)
    g2 = p['g2'].reshape(1, C).astype(jnp.float32)
    be1 = p['be1'].reshape(1, C).astype(jnp.float32)
    be2 = p['be2'].reshape(1, C).astype(jnp.float32)

    x_spec = pl.BlockSpec((None, Lpad, C), lambda i: (i, 0, 0))
    o_spec = pl.BlockSpec((None, Lpad, C), lambda i: (i, 0, 0))
    w_spec = pl.BlockSpec((3 * C, C), lambda i: (0, 0))
    v_spec = pl.BlockSpec((1, C), lambda i: (0, 0))
    m1_spec = pl.BlockSpec((C, num_groups), lambda i: (0, 0))
    m2_spec = pl.BlockSpec((num_groups, C), lambda i: (0, 0))

    kernel = functools.partial(_resblock_kernel, chan=C, fuse_k=fuse_k,
                               group_size=C // num_groups)
    return pl.pallas_call(
        kernel,
        out_shape=jax.ShapeDtypeStruct((B, Lpad, C), act_dtype),
        grid=(B,),
        in_specs=[x_spec, w_spec, v_spec, v_spec, v_spec,
                  w_spec, v_spec, v_spec, v_spec, m1_spec, m2_spec],
        out_specs=o_spec,
        scratch_shapes=[pltpu.VMEM((Lpad, C), compute_dtype)],
        compiler_params=pltpu.CompilerParams(
            dimension_semantics=("parallel",),
            vmem_limit_bytes=VMEM_LIMIT),
    )(x_pad, w1, b1, g1, be1, w2, b2, g2, be2, mcg, mgc)


# --------------------------------------------------------------------------
# Parameter init (deterministic; weights stored as [K, Cin, Cout], f32 master)
# --------------------------------------------------------------------------
def init_conv(key, cin, cout, k=3):
    kw, kb = jax.random.split(key)
    scale = 1.0 / math.sqrt(cin * k)
    w = jax.random.uniform(kw, (k, cin, cout), jnp.float32, -scale, scale)
    b = jax.random.uniform(kb, (cout,), jnp.float32, -scale, scale)
    return w, b


def init_gn(c):
    return jnp.ones((c,), jnp.float32), jnp.zeros((c,), jnp.float32)


def init_mel_encoder(key, channels, mel_channels=80, resblocks_per_reduction=2):
    c4, c2 = channels // 4, channels // 2
    keys = iter(jax.random.split(key, 32))

    def init_res(chan):
        w1, b1 = init_conv(next(keys), chan, chan)
        g1, be1 = init_gn(chan)
        w2, b2 = init_conv(next(keys), chan, chan)
        g2, be2 = init_gn(chan)
        return dict(w1=w1, b1=b1, g1=g1, be1=be1, w2=w2, b2=b2, g2=g2, be2=be2)

    p = {}
    p['conv0'] = init_conv(next(keys), mel_channels, c4)
    p['res1'] = [init_res(c4) for _ in range(resblocks_per_reduction)]
    p['conv1'] = init_conv(next(keys), c4, c2)
    p['gn1'] = init_gn(c2)
    p['res2'] = [init_res(c2) for _ in range(resblocks_per_reduction)]
    p['conv2'] = init_conv(next(keys), c2, channels)
    p['gn2'] = init_gn(channels)
    p['res3'] = [init_res(channels) for _ in range(resblocks_per_reduction)]
    return p


# --------------------------------------------------------------------------
# Forward pass
# --------------------------------------------------------------------------
def mel_encoder_forward(params, x_ncl, channels):
    """x_ncl: [B, mel_channels, L] (PyTorch NCL). Returns [B, L//4, channels]."""
    c2 = channels // 2
    x = jnp.transpose(x_ncl, (0, 2, 1)).astype(ACT_DTYPE)   # -> [B, L, mel]
    x = jnp.pad(x, ((0, 0), (1, 1), (0, 0)))                # enter halo convention

    w, b = params['conv0']                                   # conv: no GN/ReLU
    x = conv_stage(x, w, b, stride=1, gn=None)

    for rp in params['res1']:
        x = resblock(x, rp)

    w, b = params['conv1']
    g, be = params['gn1']
    x = conv_stage(x, w, b, stride=2, gn=(g, be, channels // 16))

    for rp in params['res2']:
        x = resblock(x, rp)

    w, b = params['conv2']
    g, be = params['gn2']
    x = conv_stage(x, w, b, stride=2, gn=(g, be, channels // 8))

    for rp in params['res3']:
        x = resblock(x, rp)

    # drop the halo rows; PyTorch's final .permute(0,2,1) is already our layout.
    return x[:, 1:-1, :].astype(jnp.float32)


# --------------------------------------------------------------------------
if __name__ == "__main__":
    # channels=256 exercises both conv paths: c4=64 uses the 3-matmul fallback,
    # c2=128 and channels=256 use the lane-aligned fused K=3*Cin matmul path.
    channels = 256
    mel_channels = 80
    B, L = 2, 16

    key = jax.random.PRNGKey(0)
    k_params, k_x = jax.random.split(key)
    params = init_mel_encoder(k_params, channels, mel_channels=mel_channels,
                              resblocks_per_reduction=2)
    x = jax.random.normal(k_x, (B, mel_channels, L), jnp.float32)

    fwd = jax.jit(functools.partial(mel_encoder_forward, channels=channels))
    out = jax.block_until_ready(fwd(params, x))

    assert out.shape == (B, L // 4, channels), out.shape
    assert bool(jnp.all(jnp.isfinite(out)))
    print("KERNEL_OK")
</pallas_src>

<mosaic_0001>
module attributes {stable_mosaic.version = 11 : i64} {
  func.func @_conv_kernel(%arg0: i32, %arg1: memref<1x18x80xbf16, #tpu.memory_space<vmem>>, %arg2: memref<240x64xbf16, #tpu.memory_space<vmem>>, %arg3: memref<1x64xf32, #tpu.memory_space<vmem>>, %arg4: memref<1x18x64xbf16, #tpu.memory_space<vmem>>) attributes {dimension_semantics = [#tpu.dimension_semantics<parallel>], iteration_bounds = array<i64: 2>, scalar_prefetch = 0 : i64, scratch_operands = 0 : i64, tpu.core_type = #tpu.core_type<tc>, window_params = [{transform_indices = @transform_0, window_bounds = array<i64: 1, 18, 80>}, {pipeline_mode = #tpu.pipeline_mode<synchronous>, transform_indices = @transform_1, window_bounds = array<i64: 240, 64>}, {pipeline_mode = #tpu.pipeline_mode<synchronous>, transform_indices = @transform_2, window_bounds = array<i64: 1, 64>}, {transform_indices = @transform_3, window_bounds = array<i64: 1, 18, 64>}]} {
    %c0 = arith.constant 0 : index
    %c0_0 = arith.constant 0 : index
    %c0_1 = arith.constant 0 : index
    %0 = vector.load %arg1[%c0, %c0_0, %c0_1] : memref<1x18x80xbf16, #tpu.memory_space<vmem>>, vector<1x16x80xbf16>
    %1 = vector.shape_cast %0 : vector<1x16x80xbf16> to vector<16x80xbf16>
    %c0_2 = arith.constant 0 : index
    %c0_3 = arith.constant 0 : index
    %2 = vector.load %arg2[%c0_2, %c0_3] : memref<240x64xbf16, #tpu.memory_space<vmem>>, vector<80x64xbf16>
    %cst = arith.constant dense<0.000000e+00> : vector<16x64xf32>
    %3 = tpu.matmul %1, %2, %cst {dimension_numbers = #tpu.dot_dimension_numbers<[1], [0], [0], [1], [0, 0, 1, 1], [], []>} : vector<16x80xbf16>, vector<80x64xbf16>, vector<16x64xf32> -> vector<16x64xf32>
    %c0_4 = arith.constant 0 : index
    %c1 = arith.constant 1 : index
    %c0_5 = arith.constant 0 : index
    %4 = vector.load %arg1[%c0_4, %c1, %c0_5] : memref<1x18x80xbf16, #tpu.memory_space<vmem>>, vector<1x16x80xbf16>
    %5 = vector.shape_cast %4 : vector<1x16x80xbf16> to vector<16x80xbf16>
    %c80 = arith.constant 80 : index
    %c0_6 = arith.constant 0 : index
    %6 = vector.load %arg2[%c80, %c0_6] : memref<240x64xbf16, #tpu.memory_space<vmem>>, vector<80x64xbf16>
    %cst_7 = arith.constant dense<0.000000e+00> : vector<16x64xf32>
    %7 = tpu.matmul %5, %6, %cst_7 {dimension_numbers = #tpu.dot_dimension_numbers<[1], [0], [0], [1], [0, 0, 1, 1], [], []>} : vector<16x80xbf16>, vector<80x64xbf16>, vector<16x64xf32> -> vector<16x64xf32>
    %8 = arith.addf %3, %7 : vector<16x64xf32>
    %c0_8 = arith.constant 0 : index
    %c2 = arith.constant 2 : index
    %c0_9 = arith.constant 0 : index
    %9 = vector.load %arg1[%c0_8, %c2, %c0_9] : memref<1x18x80xbf16, #tpu.memory_space<vmem>>, vector<1x16x80xbf16>
    %10 = vector.shape_cast %9 : vector<1x16x80xbf16> to vector<16x80xbf16>
    %c160 = arith.constant 160 : index
    %c0_10 = arith.constant 0 : index
    %11 = vector.load %arg2[%c160, %c0_10] : memref<240x64xbf16, #tpu.memory_space<vmem>>, vector<80x64xbf16>
    %cst_11 = arith.constant dense<0.000000e+00> : vector<16x64xf32>
    %12 = tpu.matmul %10, %11, %cst_11 {dimension_numbers = #tpu.dot_dimension_numbers<[1], [0], [0], [1], [0, 0, 1, 1], [], []>} : vector<16x80xbf16>, vector<80x64xbf16>, vector<16x64xf32> -> vector<16x64xf32>
    %13 = arith.addf %8, %12 : vector<16x64xf32>
    %c0_12 = arith.constant 0 : index
    %c0_13 = arith.constant 0 : index
    %14 = vector.load %arg3[%c0_12, %c0_13] : memref<1x64xf32, #tpu.memory_space<vmem>>, vector<1x64xf32>
    %15 = vector.broadcast %14 : vector<1x64xf32> to vector<16x64xf32>
    %16 = arith.addf %13, %15 : vector<16x64xf32>
    %cst_14 = arith.constant 0.000000e+00 : bf16
    %17 = vector.broadcast %cst_14 : bf16 to vector<1x64xbf16>
    %c0_15 = arith.constant 0 : index
    %c0_16 = arith.constant 0 : index
    %c0_17 = arith.constant 0 : index
    %18 = vector.load %arg4[%c0_15, %c0_16, %c0_17] : memref<1x18x64xbf16, #tpu.memory_space<vmem>>, vector<1x1x64xbf16>
    %19 = vector.shape_cast %18 : vector<1x1x64xbf16> to vector<1x64xbf16>
    %20 = vector.shape_cast %17 : vector<1x64xbf16> to vector<1x1x64xbf16>
    tpu.vector_store %arg4[%c0_15, %c0_16, %c0_17], %20 {strides = array<i32>} : memref<1x18x64xbf16, #tpu.memory_space<vmem>>, vector<1x1x64xbf16>,
    %c0_18 = arith.constant 0 : index
    %c17 = arith.constant 17 : index
    %c0_19 = arith.constant 0 : index
    %21 = vector.load %arg4[%c0_18, %c17, %c0_19] : memref<1x18x64xbf16, #tpu.memory_space<vmem>>, vector<1x1x64xbf16>
    %22 = vector.shape_cast %21 : vector<1x1x64xbf16> to vector<1x64xbf16>
    %23 = vector.shape_cast %17 : vector<1x64xbf16> to vector<1x1x64xbf16>
    tpu.vector_store %arg4[%c0_18, %c17, %c0_19], %23 {strides = array<i32>} : memref<1x18x64xbf16, #tpu.memory_space<vmem>>, vector<1x1x64xbf16>,
    %24 = arith.truncf %16 : vector<16x64xf32> to vector<16x64xbf16>
    %c0_20 = arith.constant 0 : index
    %c1_21 = arith.constant 1 : index
    %c0_22 = arith.constant 0 : index
    %25 = vector.load %arg4[%c0_20, %c1_21, %c0_22] : memref<1x18x64xbf16, #tpu.memory_space<vmem>>, vector<1x16x64xbf16>
    %26 = vector.shape_cast %25 : vector<1x16x64xbf16> to vector<16x64xbf16>
    %27 = vector.shape_cast %24 : vector<16x64xbf16> to vector<1x16x64xbf16>
    tpu.vector_store %arg4[%c0_20, %c1_21, %c0_22], %27 {strides = array<i32>} : memref<1x18x64xbf16, #tpu.memory_space<vmem>>, vector<1x16x64xbf16>,
    return
  }
  func.func @transform_0(%arg0: i32) -> (i32, i32, i32) {
    %c0_i32 = arith.constant 0 : i32
    %c0_i32_0 = arith.constant 0 : i32
    %c0_i32_1 = arith.constant 0 : i32
    return %arg0, %c0_i32, %c0_i32_0 : i32, i32, i32
  }
  func.func @transform_1(%arg0: i32) -> (i32, i32) {
    %c0_i32 = arith.constant 0 : i32
    %c0_i32_0 = arith.constant 0 : i32
    %c0_i32_1 = arith.constant 0 : i32
    return %c0_i32, %c0_i32_0 : i32, i32
  }
  func.func @transform_2(%arg0: i32) -> (i32, i32) {
    %c0_i32 = arith.constant 0 : i32
    %c0_i32_0 = arith.constant 0 : i32
    %c0_i32_1 = arith.constant 0 : i32
    return %c0_i32, %c0_i32_0 : i32, i32
  }
  func.func @transform_3(%arg0: i32) -> (i32, i32, i32) {
    %c0_i32 = arith.constant 0 : i32
    %c0_i32_0 = arith.constant 0 : i32
    %c0_i32_1 = arith.constant 0 : i32
    return %arg0, %c0_i32, %c0_i32_0 : i32, i32, i32
  }
}

module attributes {stable_mosaic.version = 11 : i64} {
  func.func @_resblock_kernel(%arg0: i32, %arg1: memref<1x18x64xbf16, #tpu.memory_space<vmem>>, %arg2: memref<192x64xbf16, #tpu.memory_space<vmem>>, %arg3: memref<1x64xf32, #tpu.memory_space<vmem>>, %arg4: memref<1x64xf32, #tpu.memory_space<vmem>>, %arg5: memref<1x64xf32, #tpu.memory_space<vmem>>, %arg6: memref<192x64xbf16, #tpu.memory_space<vmem>>, %arg7: memref<1x64xf32, #tpu.memory_space<vmem>>, %arg8: memref<1x64xf32, #tpu.memory_space<vmem>>, %arg9: memref<1x64xf32, #tpu.memory_space<vmem>>, %arg10: memref<64x8xf32, #tpu.memory_space<vmem>>, %arg11: memref<8x64xf32, #tpu.memory_space<vmem>>, %arg12: memref<1x18x64xbf16, #tpu.memory_space<vmem>>, %arg13: memref<18x64xbf16, #tpu.memory_space<vmem>>) attributes {dimension_semantics = [#tpu.dimension_semantics<parallel>], iteration_bounds = array<i64: 2>, scalar_prefetch = 0 : i64, scratch_operands = 1 : i64, tpu.core_type = #tpu.core_type<tc>, window_params = [{transform_indices = @transform_0, window_bounds = array<i64: 1, 18, 64>}, {pipeline_mode = #tpu.pipeline_mode<synchronous>, transform_indices = @transform_1, window_bounds = array<i64: 192, 64>}, {pipeline_mode = #tpu.pipeline_mode<synchronous>, transform_indices = @transform_2, window_bounds = array<i64: 1, 64>}, {pipeline_mode = #tpu.pipeline_mode<synchronous>, transform_indices = @transform_3, window_bounds = array<i64: 1, 64>}, {pipeline_mode = #tpu.pipeline_mode<synchronous>, transform_indices = @transform_4, window_bounds = array<i64: 1, 64>}, {pipeline_mode = #tpu.pipeline_mode<synchronous>, transform_indices = @transform_5, window_bounds = array<i64: 192, 64>}, {pipeline_mode = #tpu.pipeline_mode<synchronous>, transform_indices = @transform_6, window_bounds = array<i64: 1, 64>}, {pipeline_mode = #tpu.pipeline_mode<synchronous>, transform_indices = @transform_7, window_bounds = array<i64: 1, 64>}, {pipeline_mode = #tpu.pipeline_mode<synchronous>, transform_indices = @transform_8, window_bounds = array<i64: 1, 64>}, {pipeline_mode = #tpu.pipeline_mode<synchronous>, transform_indices = @transform_9, window_bounds = array<i64: 64, 8>}, {pipeline_mode = #tpu.pipeline_mode<synchronous>, transform_indices = @transform_10, window_bounds = array<i64: 8, 64>}, {transform_indices = @transform_11, window_bounds = array<i64: 1, 18, 64>}]} {
    %c0 = arith.constant 0 : index
    %c0_0 = arith.constant 0 : index
    %c0_1 = arith.constant 0 : index
    %0 = vector.load %arg1[%c0, %c0_0, %c0_1] : memref<1x18x64xbf16, #tpu.memory_space<vmem>>, vector<1x16x64xbf16>
    %1 = vector.shape_cast %0 : vector<1x16x64xbf16> to vector<16x64xbf16>
    %c0_2 = arith.constant 0 : index
    %c0_3 = arith.constant 0 : index
    %2 = vector.load %arg2[%c0_2, %c0_3] : memref<192x64xbf16, #tpu.memory_space<vmem>>, vector<64x64xbf16>
    %cst = arith.constant dense<0.000000e+00> : vector<16x64xf32>
    %3 = tpu.matmul %1, %2, %cst {dimension_numbers = #tpu.dot_dimension_numbers<[1], [0], [0], [1], [0, 0, 1, 1], [], []>} : vector<16x64xbf16>, vector<64x64xbf16>, vector<16x64xf32> -> vector<16x64xf32>
    %c0_4 = arith.constant 0 : index
    %c1 = arith.constant 1 : index
    %c0_5 = arith.constant 0 : index
    %4 = vector.load %arg1[%c0_4, %c1, %c0_5] : memref<1x18x64xbf16, #tpu.memory_space<vmem>>, vector<1x16x64xbf16>
    %5 = vector.shape_cast %4 : vector<1x16x64xbf16> to vector<16x64xbf16>
    %c64 = arith.constant 64 : index
    %c0_6 = arith.constant 0 : index
    %6 = vector.load %arg2[%c64, %c0_6] : memref<192x64xbf16, #tpu.memory_space<vmem>>, vector<64x64xbf16>
    %cst_7 = arith.constant dense<0.000000e+00> : vector<16x64xf32>
    %7 = tpu.matmul %5, %6, %cst_7 {dimension_numbers = #tpu.dot_dimension_numbers<[1], [0], [0], [1], [0, 0, 1, 1], [], []>} : vector<16x64xbf16>, vector<64x64xbf16>, vector<16x64xf32> -> vector<16x64xf32>
    %8 = arith.addf %3, %7 : vector<16x64xf32>
    %c0_8 = arith.constant 0 : index
    %c2 = arith.constant 2 : index
    %c0_9 = arith.constant 0 : index
    %9 = vector.load %arg1[%c0_8, %c2, %c0_9] : memref<1x18x64xbf16, #tpu.memory_space<vmem>>, vector<1x16x64xbf16>
    %10 = vector.shape_cast %9 : vector<1x16x64xbf16> to vector<16x64xbf16>
    %c128 = arith.constant 128 : index
    %c0_10 = arith.constant 0 : index
    %11 = vector.load %arg2[%c128, %c0_10] : memref<192x64xbf16, #tpu.memory_space<vmem>>, vector<64x64xbf16>
    %cst_11 = arith.constant dense<0.000000e+00> : vector<16x64xf32>
    %12 = tpu.matmul %10, %11, %cst_11 {dimension_numbers = #tpu.dot_dimension_numbers<[1], [0], [0], [1], [0, 0, 1, 1], [], []>} : vector<16x64xbf16>, vector<64x64xbf16>, vector<16x64xf32> -> vector<16x64xf32>
    %13 = arith.addf %8, %12 : vector<16x64xf32>
    %c0_12 = arith.constant 0 : index
    %c0_13 = arith.constant 0 : index
    %14 = vector.load %arg3[%c0_12, %c0_13] : memref<1x64xf32, #tpu.memory_space<vmem>>, vector<1x64xf32>
    %15 = vector.broadcast %14 : vector<1x64xf32> to vector<16x64xf32>
    %16 = arith.addf %13, %15 : vector<16x64xf32>
    %c0_14 = arith.constant 0 : index
    %c0_15 = arith.constant 0 : index
    %17 = vector.load %arg4[%c0_14, %c0_15] : memref<1x64xf32, #tpu.memory_space<vmem>>, vector<1x64xf32>
    %c0_16 = arith.constant 0 : index
    %c0_17 = arith.constant 0 : index
    %18 = vector.load %arg5[%c0_16, %c0_17] : memref<1x64xf32, #tpu.memory_space<vmem>>, vector<1x64xf32>
    %c0_18 = arith.constant 0 : index
    %c0_19 = arith.constant 0 : index
    %19 = vector.load %arg10[%c0_18, %c0_19] : memref<64x8xf32, #tpu.memory_space<vmem>>, vector<64x8xf32>
    %c0_20 = arith.constant 0 : index
    %c0_21 = arith.constant 0 : index
    %20 = vector.load %arg11[%c0_20, %c0_21] : memref<8x64xf32, #tpu.memory_space<vmem>>, vector<8x64xf32>
    %cst_22 = arith.constant dense<0.000000e+00> : vector<64xf32>
    %21 = vector.multi_reduction <add>, %16, %cst_22 [0] : vector<16x64xf32> to vector<64xf32>
    %22 = vector.shape_cast %21 : vector<64xf32> to vector<1x64xf32>
    %cst_23 = arith.constant dense<0.000000e+00> : vector<1x8xf32>
    %23 = tpu.matmul %22, %19, %cst_23 {dimension_numbers = #tpu.dot_dimension_numbers<[1], [0], [0], [1], [0, 0, 1, 1], [], []>} : vector<1x64xf32>, vector<64x8xf32>, vector<1x8xf32> -> vector<1x8xf32>
    %cst_24 = arith.constant 7.812500e-03 : f32
    %24 = vector.broadcast %cst_24 : f32 to vector<1x8xf32>
    %25 = arith.mulf %23, %24 : vector<1x8xf32>
    %cst_25 = arith.constant dense<0.000000e+00> : vector<1x64xf32>
    %26 = tpu.matmul %25, %20, %cst_25 {dimension_numbers = #tpu.dot_dimension_numbers<[1], [0], [0], [1], [0, 0, 1, 1], [], []>} : vector<1x8xf32>, vector<8x64xf32>, vector<1x64xf32> -> vector<1x64xf32>
    %27 = vector.broadcast %26 : vector<1x64xf32> to vector<16x64xf32>
    %28 = arith.subf %16, %27 : vector<16x64xf32>
    %29 = arith.mulf %28, %28 : vector<16x64xf32>
    %cst_26 = arith.constant dense<0.000000e+00> : vector<64xf32>
    %30 = vector.multi_reduction <add>, %29, %cst_26 [0] : vector<16x64xf32> to vector<64xf32>
    %31 = vector.shape_cast %30 : vector<64xf32> to vector<1x64xf32>
    %cst_27 = arith.constant dense<0.000000e+00> : vector<1x8xf32>
    %32 = tpu.matmul %31, %19, %cst_27 {dimension_numbers = #tpu.dot_dimension_numbers<[1], [0], [0], [1], [0, 0, 1, 1], [], []>} : vector<1x64xf32>, vector<64x8xf32>, vector<1x8xf32> -> vector<1x8xf32>
    %cst_28 = arith.constant 7.812500e-03 : f32
    %33 = vector.broadcast %cst_28 : f32 to vector<1x8xf32>
    %34 = arith.mulf %32, %33 : vector<1x8xf32>
    %cst_29 = arith.constant dense<0.000000e+00> : vector<1x64xf32>
    %35 = tpu.matmul %34, %20, %cst_29 {dimension_numbers = #tpu.dot_dimension_numbers<[1], [0], [0], [1], [0, 0, 1, 1], [], []>} : vector<1x8xf32>, vector<8x64xf32>, vector<1x64xf32> -> vector<1x64xf32>
    %cst_30 = arith.constant 9.99999974E-6 : f32
    %36 = vector.broadcast %cst_30 : f32 to vector<1x64xf32>
    %37 = arith.addf %35, %36 : vector<1x64xf32>
    %38 = math.rsqrt %37 : vector<1x64xf32>
    %39 = vector.broadcast %38 : vector<1x64xf32> to vector<16x64xf32>
    %40 = arith.mulf %28, %39 : vector<16x64xf32>
    %41 = vector.broadcast %17 : vector<1x64xf32> to vector<16x64xf32>
    %42 = arith.mulf %40, %41 : vector<16x64xf32>
    %43 = vector.broadcast %18 : vector<1x64xf32> to vector<16x64xf32>
    %44 = arith.addf %42, %43 : vector<16x64xf32>
    %cst_31 = arith.constant 0.000000e+00 : f32
    %45 = vector.broadcast %cst_31 : f32 to vector<16x64xf32>
    %46 = arith.maximumf %44, %45 : vector<16x64xf32>
    %cst_32 = arith.constant 0.000000e+00 : bf16
    %47 = vector.broadcast %cst_32 : bf16 to vector<1x64xbf16>
    %c0_33 = arith.constant 0 : index
    %c0_34 = arith.constant 0 : index
    %48 = vector.load %arg13[%c0_33, %c0_34] : memref<18x64xbf16, #tpu.memory_space<vmem>>, vector<1x64xbf16>
    tpu.vector_store %arg13[%c0_33, %c0_34], %47 {strides = array<i32>} : memref<18x64xbf16, #tpu.memory_space<vmem>>, vector<1x64xbf16>,
    %c17 = arith.constant 17 : index
    %c0_35 = arith.constant 0 : index
    %49 = vector.load %arg13[%c17, %c0_35] : memref<18x64xbf16, #tpu.memory_space<vmem>>, vector<1x64xbf16>
    tpu.vector_store %arg13[%c17, %c0_35], %47 {strides = array<i32>} : memref<18x64xbf16, #tpu.memory_space<vmem>>, vector<1x64xbf16>,
    %50 = arith.truncf %46 : vector<16x64xf32> to vector<16x64xbf16>
    %c1_36 = arith.constant 1 : index
    %c0_37 = arith.constant 0 : index
    %51 = vector.load %arg13[%c1_36, %c0_37] : memref<18x64xbf16, #tpu.memory_space<vmem>>, vector<16x64xbf16>
    tpu.vector_store %arg13[%c1_36, %c0_37], %50 {strides = array<i32>} : memref<18x64xbf16, #tpu.memory_space<vmem>>, vector<16x64xbf16>,
    %c0_38 = arith.constant 0 : index
    %c0_39 = arith.constant 0 : index
    %52 = vector.load %arg13[%c0_38, %c0_39] : memref<18x64xbf16, #tpu.memory_space<vmem>>, vector<16x64xbf16>
    %c0_40 = arith.constant 0 : index
    %c0_41 = arith.constant 0 : index
    %53 = vector.load %arg6[%c0_40, %c0_41] : memref<192x64xbf16, #tpu.memory_space<vmem>>, vector<64x64xbf16>
    %cst_42 = arith.constant dense<0.000000e+00> : vector<16x64xf32>
    %54 = tpu.matmul %52, %53, %cst_42 {dimension_numbers = #tpu.dot_dimension_numbers<[1], [0], [0], [1], [0, 0, 1, 1], [], []>} : vector<16x64xbf16>, vector<64x64xbf16>, vector<16x64xf32> -> vector<16x64xf32>
    %c1_43 = arith.constant 1 : index
    %c0_44 = arith.constant 0 : index
    %55 = vector.load %arg13[%c1_43, %c0_44] : memref<18x64xbf16, #tpu.memory_space<vmem>>, vector<16x64xbf16>
    %c64_45 = arith.constant 64 : index
    %c0_46 = arith.constant 0 : index
    %56 = vector.load %arg6[%c64_45, %c0_46] : memref<192x64xbf16, #tpu.memory_space<vmem>>, vector<64x64xbf16>
    %cst_47 = arith.constant dense<0.000000e+00> : vector<16x64xf32>
    %57 = tpu.matmul %55, %56, %cst_47 {dimension_numbers = #tpu.dot_dimension_numbers<[1], [0], [0], [1], [0, 0, 1, 1], [], []>} : vector<16x64xbf16>, vector<64x64xbf16>, vector<16x64xf32> -> vector<16x64xf32>
    %58 = arith.addf %54, %57 : vector<16x64xf32>
    %c2_48 = arith.constant 2 : index
    %c0_49 = arith.constant 0 : index
    %59 = vector.load %arg13[%c2_48, %c0_49] : memref<18x64xbf16, #tpu.memory_space<vmem>>, vector<16x64xbf16>
    %c128_50 = arith.constant 128 : index
    %c0_51 = arith.constant 0 : index
    %60 = vector.load %arg6[%c128_50, %c0_51] : memref<192x64xbf16, #tpu.memory_space<vmem>>, vector<64x64xbf16>
    %cst_52 = arith.constant dense<0.000000e+00> : vector<16x64xf32>
    %61 = tpu.matmul %59, %60, %cst_52 {dimension_numbers = #tpu.dot_dimension_numbers<[1], [0], [0], [1], [0, 0, 1, 1], [], []>} : vector<16x64xbf16>, vector<64x64xbf16>, vector<16x64xf32> -> vector<16x64xf32>
    %62 = arith.addf %58, %61 : vector<16x64xf32>
    %c0_53 = arith.constant 0 : index
    %c0_54 = arith.constant 0 : index
    %63 = vector.load %arg7[%c0_53, %c0_54] : memref<1x64xf32, #tpu.memory_space<vmem>>, vector<1x64xf32>
    %64 = vector.broadcast %63 : vector<1x64xf32> to vector<16x64xf32>
    %65 = arith.addf %62, %64 : vector<16x64xf32>
    %c0_55 = arith.constant 0 : index
    %c0_56 = arith.constant 0 : index
    %66 = vector.load %arg8[%c0_55, %c0_56] : memref<1x64xf32, #tpu.memory_space<vmem>>, vector<1x64xf32>
    %c0_57 = arith.constant 0 : index
    %c0_58 = arith.constant 0 : index
    %67 = vector.load %arg9[%c0_57, %c0_58] : memref<1x64xf32, #tpu.memory_space<vmem>>, vector<1x64xf32>
    %c0_59 = arith.constant 0 : index
    %c0_60 = arith.constant 0 : index
    %68 = vector.load %arg10[%c0_59, %c0_60] : memref<64x8xf32, #tpu.memory_space<vmem>>, vector<64x8xf32>
    %c0_61 = arith.constant 0 : index
    %c0_62 = arith.constant 0 : index
    %69 = vector.load %arg11[%c0_61, %c0_62] : memref<8x64xf32, #tpu.memory_space<vmem>>, vector<8x64xf32>
    %cst_63 = arith.constant dense<0.000000e+00> : vector<64xf32>
    %70 = vector.multi_reduction <add>, %65, %cst_63 [0] : vector<16x64xf32> to vector<64xf32>
    %71 = vector.shape_cast %70 : vector<64xf32> to vector<1x64xf32>
    %cst_64 = arith.constant dense<0.000000e+00> : vector<1x8xf32>
    %72 = tpu.matmul %71, %68, %cst_64 {dimension_numbers = #tpu.dot_dimension_numbers<[1], [0], [0], [1], [0, 0, 1, 1], [], []>} : vector<1x64xf32>, vector<64x8xf32>, vector<1x8xf32> -> vector<1x8xf32>
    %cst_65 = arith.constant 7.812500e-03 : f32
    %73 = vector.broadcast %cst_65 : f32 to vector<1x8xf32>
    %74 = arith.mulf %72, %73 : vector<1x8xf32>
    %cst_66 = arith.constant dense<0.000000e+00> : vector<1x64xf32>
    %75 = tpu.matmul %74, %69, %cst_66 {dimension_numbers = #tpu.dot_dimension_numbers<[1], [0], [0], [1], [0, 0, 1, 1], [], []>} : vector<1x8xf32>, vector<8x64xf32>, vector<1x64xf32> -> vector<1x64xf32>
    %76 = vector.broadcast %75 : vector<1x64xf32> to vector<16x64xf32>
    %77 = arith.subf %65, %76 : vector<16x64xf32>
    %78 = arith.mulf %77, %77 : vector<16x64xf32>
    %cst_67 = arith.constant dense<0.000000e+00> : vector<64xf32>
    %79 = vector.multi_reduction <add>, %78, %cst_67 [0] : vector<16x64xf32> to vector<64xf32>
    %80 = vector.shape_cast %79 : vector<64xf32> to vector<1x64xf32>
    %cst_68 = arith.constant dense<0.000000e+00> : vector<1x8xf32>
    %81 = tpu.matmul %80, %68, %cst_68 {dimension_numbers = #tpu.dot_dimension_numbers<[1], [0], [0], [1], [0, 0, 1, 1], [], []>} : vector<1x64xf32>, vector<64x8xf32>, vector<1x8xf32> -> vector<1x8xf32>
    %cst_69 = arith.constant 7.812500e-03 : f32
    %82 = vector.broadcast %cst_69 : f32 to vector<1x8xf32>
    %83 = arith.mulf %81, %82 : vector<1x8xf32>
    %cst_70 = arith.constant dense<0.000000e+00> : vector<1x64xf32>
    %84 = tpu.matmul %83, %69, %cst_70 {dimension_numbers = #tpu.dot_dimension_numbers<[1], [0], [0], [1], [0, 0, 1, 1], [], []>} : vector<1x8xf32>, vector<8x64xf32>, vector<1x64xf32> -> vector<1x64xf32>
    %cst_71 = arith.constant 9.99999974E-6 : f32
    %85 = vector.broadcast %cst_71 : f32 to vector<1x64xf32>
    %86 = arith.addf %84, %85 : vector<1x64xf32>
    %87 = math.rsqrt %86 : vector<1x64xf32>
    %88 = vector.broadcast %87 : vector<1x64xf32> to vector<16x64xf32>
    %89 = arith.mulf %77, %88 : vector<16x64xf32>
    %90 = vector.broadcast %66 : vector<1x64xf32> to vector<16x64xf32>
    %91 = arith.mulf %89, %90 : vector<16x64xf32>
    %92 = vector.broadcast %67 : vector<1x64xf32> to vector<16x64xf32>
    %93 = arith.addf %91, %92 : vector<16x64xf32>
    %c0_72 = arith.constant 0 : index
    %c1_73 = arith.constant 1 : index
    %c0_74 = arith.constant 0 : index
    %94 = vector.load %arg1[%c0_72, %c1_73, %c0_74] : memref<1x18x64xbf16, #tpu.memory_space<vmem>>, vector<1x16x64xbf16>
    %95 = vector.shape_cast %94 : vector<1x16x64xbf16> to vector<16x64xbf16>
    %96 = arith.extf %95 : vector<16x64xbf16> to vector<16x64xf32>
    %97 = arith.addf %93, %96 : vector<16x64xf32>
    %cst_75 = arith.constant 0.000000e+00 : f32
    %98 = vector.broadcast %cst_75 : f32 to vector<16x64xf32>
    %99 = arith.maximumf %97, %98 : vector<16x64xf32>
    %cst_76 = arith.constant 0.000000e+00 : bf16
    %100 = vector.broadcast %cst_76 : bf16 to vector<1x64xbf16>
    %c0_77 = arith.constant 0 : index
    %c0_78 = arith.constant 0 : index
    %c0_79 = arith.constant 0 : index
    %101 = vector.load %arg12[%c0_77, %c0_78, %c0_79] : memref<1x18x64xbf16, #tpu.memory_space<vmem>>, vector<1x1x64xbf16>
    %102 = vector.shape_cast %101 : vector<1x1x64xbf16> to vector<1x64xbf16>
    %103 = vector.shape_cast %100 : vector<1x64xbf16> to vector<1x1x64xbf16>
    tpu.vector_store %arg12[%c0_77, %c0_78, %c0_79], %103 {strides = array<i32>} : memref<1x18x64xbf16, #tpu.memory_space<vmem>>, vector<1x1x64xbf16>,
    %c0_80 = arith.constant 0 : index
    %c17_81 = arith.constant 17 : index
    %c0_82 = arith.constant 0 : index
    %104 = vector.load %arg12[%c0_80, %c17_81, %c0_82] : memref<1x18x64xbf16, #tpu.memory_space<vmem>>, vector<1x1x64xbf16>
    %105 = vector.shape_cast %104 : vector<1x1x64xbf16> to vector<1x64xbf16>
    %106 = vector.shape_cast %100 : vector<1x64xbf16> to vector<1x1x64xbf16>
    tpu.vector_store %arg12[%c0_80, %c17_81, %c0_82], %106 {strides = array<i32>} : memref<1x18x64xbf16, #tpu.memory_space<vmem>>, vector<1x1x64xbf16>,
    %107 = arith.truncf %99 : vector<16x64xf32> to vector<16x64xbf16>
    %c0_83 = arith.constant 0 : index
    %c1_84 = arith.constant 1 : index
    %c0_85 = arith.constant 0 : index
    %108 = vector.load %arg12[%c0_83, %c1_84, %c0_85] : memref<1x18x64xbf16, #tpu.memory_space<vmem>>, vector<1x16x64xbf16>
    %109 = vector.shape_cast %108 : vector<1x16x64xbf16> to vector<16x64xbf16>
    %110 = vector.shape_cast %107 : vector<16x64xbf16> to vector<1x16x64xbf16>
    tpu.vector_store %arg12[%c0_83, %c1_84, %c0_85], %110 {strides = array<i32>} : memref<1x18x64xbf16, #tpu.memory_space<vmem>>, vector<1x16x64xbf16>,
    return
  }
  func.func @transform_0(%arg0: i32) -> (i32, i32, i32) {
    %c0_i32 = arith.constant 0 : i32
    %c0_i32_0 = arith.constant 0 : i32
    %c0_i32_1 = arith.constant 0 : i32
    return %arg0, %c0_i32, %c0_i32_0 : i32, i32, i32
  }
  func.func @transform_1(%arg0: i32) -> (i32, i32) {
    %c0_i32 = arith.constant 0 : i32
    %c0_i32_0 = arith.constant 0 : i32
    %c0_i32_1 = arith.constant 0 : i32
    return %c0_i32, %c0_i32_0 : i32, i32
  }
  func.func @transform_2(%arg0: i32) -> (i32, i32) {
    %c0_i32 = arith.constant 0 : i32
    %c0_i32_0 = arith.constant 0 : i32
    %c0_i32_1 = arith.constant 0 : i32
    return %c0_i32, %c0_i32_0 : i32, i32
  }
  func.func @transform_3(%arg0: i32) -> (i32, i32) {
    %c0_i32 = arith.constant 0 : i32
    %c0_i32_0 = arith.constant 0 : i32
    %c0_i32_1 = arith.constant 0 : i32
    return %c0_i32, %c0_i32_0 : i32, i32
  }
  func.func @transform_4(%arg0: i32) -> (i32, i32) {
    %c0_i32 = arith.constant 0 : i32
    %c0_i32_0 = arith.constant 0 : i32
    %c0_i32_1 = arith.constant 0 : i32
    return %c0_i32, %c0_i32_0 : i32, i32
  }
  func.func @transform_5(%arg0: i32) -> (i32, i32) {
    %c0_i32 = arith.constant 0 : i32
    %c0_i32_0 = arith.constant 0 : i32
    %c0_i32_1 = arith.constant 0 : i32
    return %c0_i32, %c0_i32_0 : i32, i32
  }
  func.func @transform_6(%arg0: i32) -> (i32, i32) {
    %c0_i32 = arith.constant 0 : i32
    %c0_i32_0 = arith.constant 0 : i32
    %c0_i32_1 = arith.constant 0 : i32
    return %c0_i32, %c0_i32_0 : i32, i32
  }
  func.func @transform_7(%arg0: i32) -> (i32, i32) {
    %c0_i32 = arith.constant 0 : i32
    %c0_i32_0 = arith.constant 0 : i32
    %c0_i32_1 = arith.constant 0 : i32
    return %c0_i32, %c0_i32_0 : i32, i32
  }
  func.func @transform_8(%arg0: i32) -> (i32, i32) {
    %c0_i32 = arith.constant 0 : i32
    %c0_i32_0 = arith.constant 0 : i32
    %c0_i32_1 = arith.constant 0 : i32
    return %c0_i32, %c0_i32_0 : i32, i32
  }
  func.func @transform_9(%arg0: i32) -> (i32, i32) {
    %c0_i32 = arith.constant 0 : i32
    %c0_i32_0 = arith.constant 0 : i32
    %c0_i32_1 = arith.constant 0 : i32
    return %c0_i32, %c0_i32_0 : i32, i32
  }
  func.func @transform_10(%arg0: i32) -> (i32, i32) {
    %c0_i32 = arith.constant 0 : i32
    %c0_i32_0 = arith.constant 0 : i32
    %c0_i32_1 = arith.constant 0 : i32
    return %c0_i32, %c0_i32_0 : i32, i32
  }
  func.func @transform_11(%arg0: i32) -> (i32, i32, i32) {
    %c0_i32 = arith.constant 0 : i32
    %c0_i32_0 = arith.constant 0 : i32
    %c0_i32_1 = arith.constant 0 : i32
    return %arg0, %c0_i32, %c0_i32_0 : i32, i32, i32
  }
}

module attributes {stable_mosaic.version = 11 : i64} {
  func.func @_conv_gn_relu_kernel(%arg0: i32, %arg1: memref<1x9x128xbf16, #tpu.memory_space<vmem>>, %arg2: memref<192x128xbf16, #tpu.memory_space<vmem>>, %arg3: memref<1x128xf32, #tpu.memory_space<vmem>>, %arg4: memref<1x128xf32, #tpu.memory_space<vmem>>, %arg5: memref<1x128xf32, #tpu.memory_space<vmem>>, %arg6: memref<128x16xf32, #tpu.memory_space<vmem>>, %arg7: memref<16x128xf32, #tpu.memory_space<vmem>>, %arg8: memref<1x10x128xbf16, #tpu.memory_space<vmem>>) attributes {dimension_semantics = [#tpu.dimension_semantics<parallel>], iteration_bounds = array<i64: 2>, scalar_prefetch = 0 : i64, scratch_operands = 0 : i64, tpu.core_type = #tpu.core_type<tc>, window_params = [{transform_indices = @transform_0, window_bounds = array<i64: 1, 9, 128>}, {pipeline_mode = #tpu.pipeline_mode<synchronous>, transform_indices = @transform_1, window_bounds = array<i64: 192, 128>}, {pipeline_mode = #tpu.pipeline_mode<synchronous>, transform_indices = @transform_2, window_bounds = array<i64: 1, 128>}, {pipeline_mode = #tpu.pipeline_mode<synchronous>, transform_indices = @transform_3, window_bounds = array<i64: 1, 128>}, {pipeline_mode = #tpu.pipeline_mode<synchronous>, transform_indices = @transform_4, window_bounds = array<i64: 1, 128>}, {pipeline_mode = #tpu.pipeline_mode<synchronous>, transform_indices = @transform_5, window_bounds = array<i64: 128, 16>}, {pipeline_mode = #tpu.pipeline_mode<synchronous>, transform_indices = @transform_6, window_bounds = array<i64: 16, 128>}, {transform_indices = @transform_7, window_bounds = array<i64: 1, 10, 128>}]} {
    %c0 = arith.constant 0 : index
    %c0_0 = arith.constant 0 : index
    %c0_1 = arith.constant 0 : index
    %0 = vector.load %arg1[%c0, %c0_0, %c0_1] : memref<1x9x128xbf16, #tpu.memory_space<vmem>>, vector<1x8x128xbf16>
    %1 = vector.shape_cast %0 : vector<1x8x128xbf16> to vector<8x128xbf16>
    %c0_2 = arith.constant 0 : index
    %c1 = arith.constant 1 : index
    %c0_3 = arith.constant 0 : index
    %2 = vector.load %arg1[%c0_2, %c1, %c0_3] : memref<1x9x128xbf16, #tpu.memory_space<vmem>>, vector<1x8x64xbf16>
    %3 = vector.shape_cast %2 : vector<1x8x64xbf16> to vector<8x64xbf16>
    %4 = vector.extract_strided_slice %1 {offsets = [0, 0], sizes = [8, 64], strides = [1, 1]} : vector<8x128xbf16> to vector<8x64xbf16>
    %c0_4 = arith.constant 0 : index
    %c0_5 = arith.constant 0 : index
    %5 = vector.load %arg2[%c0_4, %c0_5] : memref<192x128xbf16, #tpu.memory_space<vmem>>, vector<64x128xbf16>
    %cst = arith.constant dense<0.000000e+00> : vector<8x128xf32>
    %6 = tpu.matmul %4, %5, %cst {dimension_numbers = #tpu.dot_dimension_numbers<[1], [0], [0], [1], [0, 0, 1, 1], [], []>} : vector<8x64xbf16>, vector<64x128xbf16>, vector<8x128xf32> -> vector<8x128xf32>
    %7 = vector.extract_strided_slice %1 {offsets = [0, 64], sizes = [8, 64], strides = [1, 1]} : vector<8x128xbf16> to vector<8x64xbf16>
    %c64 = arith.constant 64 : index
    %c0_6 = arith.constant 0 : index
    %8 = vector.load %arg2[%c64, %c0_6] : memref<192x128xbf16, #tpu.memory_space<vmem>>, vector<64x128xbf16>
    %cst_7 = arith.constant dense<0.000000e+00> : vector<8x128xf32>
    %9 = tpu.matmul %7, %8, %cst_7 {dimension_numbers = #tpu.dot_dimension_numbers<[1], [0], [0], [1], [0, 0, 1, 1], [], []>} : vector<8x64xbf16>, vector<64x128xbf16>, vector<8x128xf32> -> vector<8x128xf32>
    %10 = arith.addf %6, %9 : vector<8x128xf32>
    %c128 = arith.constant 128 : index
    %c0_8 = arith.constant 0 : index
    %11 = vector.load %arg2[%c128, %c0_8] : memref<192x128xbf16, #tpu.memory_space<vmem>>, vector<64x128xbf16>
    %cst_9 = arith.constant dense<0.000000e+00> : vector<8x128xf32>
    %12 = tpu.matmul %3, %11, %cst_9 {dimension_numbers = #tpu.dot_dimension_numbers<[1], [0], [0], [1], [0, 0, 1, 1], [], []>} : vector<8x64xbf16>, vector<64x128xbf16>, vector<8x128xf32> -> vector<8x128xf32>
    %13 = arith.addf %10, %12 : vector<8x128xf32>
    %c0_10 = arith.constant 0 : index
    %c0_11 = arith.constant 0 : index
    %14 = vector.load %arg3[%c0_10, %c0_11] : memref<1x128xf32, #tpu.memory_space<vmem>>, vector<1x128xf32>
    %15 = vector.broadcast %14 : vector<1x128xf32> to vector<8x128xf32>
    %16 = arith.addf %13, %15 : vector<8x128xf32>
    %c0_12 = arith.constant 0 : index
    %c0_13 = arith.constant 0 : index
    %17 = vector.load %arg4[%c0_12, %c0_13] : memref<1x128xf32, #tpu.memory_space<vmem>>, vector<1x128xf32>
    %c0_14 = arith.constant 0 : index
    %c0_15 = arith.constant 0 : index
    %18 = vector.load %arg5[%c0_14, %c0_15] : memref<1x128xf32, #tpu.memory_space<vmem>>, vector<1x128xf32>
    %c0_16 = arith.constant 0 : index
    %c0_17 = arith.constant 0 : index
    %19 = vector.load %arg6[%c0_16, %c0_17] : memref<128x16xf32, #tpu.memory_space<vmem>>, vector<128x16xf32>
    %c0_18 = arith.constant 0 : index
    %c0_19 = arith.constant 0 : index
    %20 = vector.load %arg7[%c0_18, %c0_19] : memref<16x128xf32, #tpu.memory_space<vmem>>, vector<16x128xf32>
    %cst_20 = arith.constant dense<0.000000e+00> : vector<128xf32>
    %21 = vector.multi_reduction <add>, %16, %cst_20 [0] : vector<8x128xf32> to vector<128xf32>
    %22 = vector.shape_cast %21 : vector<128xf32> to vector<1x128xf32>
    %cst_21 = arith.constant dense<0.000000e+00> : vector<1x16xf32>
    %23 = tpu.matmul %22, %19, %cst_21 {dimension_numbers = #tpu.dot_dimension_numbers<[1], [0], [0], [1], [0, 0, 1, 1], [], []>} : vector<1x128xf32>, vector<128x16xf32>, vector<1x16xf32> -> vector<1x16xf32>
    %cst_22 = arith.constant 1.562500e-02 : f32
    %24 = vector.broadcast %cst_22 : f32 to vector<1x16xf32>
    %25 = arith.mulf %23, %24 : vector<1x16xf32>
    %cst_23 = arith.constant dense<0.000000e+00> : vector<1x128xf32>
    %26 = tpu.matmul %25, %20, %cst_23 {dimension_numbers = #tpu.dot_dimension_numbers<[1], [0], [0], [1], [0, 0, 1, 1], [], []>} : vector<1x16xf32>, vector<16x128xf32>, vector<1x128xf32> -> vector<1x128xf32>
    %27 = vector.broadcast %26 : vector<1x128xf32> to vector<8x128xf32>
    %28 = arith.subf %16, %27 : vector<8x128xf32>
    %29 = arith.mulf %28, %28 : vector<8x128xf32>
    %cst_24 = arith.constant dense<0.000000e+00> : vector<128xf32>
    %30 = vector.multi_reduction <add>, %29, %cst_24 [0] : vector<8x128xf32> to vector<128xf32>
    %31 = vector.shape_cast %30 : vector<128xf32> to vector<1x128xf32>
    %cst_25 = arith.constant dense<0.000000e+00> : vector<1x16xf32>
    %32 = tpu.matmul %31, %19, %cst_25 {dimension_numbers = #tpu.dot_dimension_numbers<[1], [0], [0], [1], [0, 0, 1, 1], [], []>} : vector<1x128xf32>, vector<128x16xf32>, vector<1x16xf32> -> vector<1x16xf32>
    %cst_26 = arith.constant 1.562500e-02 : f32
    %33 = vector.broadcast %cst_26 : f32 to vector<1x16xf32>
    %34 = arith.mulf %32, %33 : vector<1x16xf32>
    %cst_27 = arith.constant dense<0.000000e+00> : vector<1x128xf32>
    %35 = tpu.matmul %34, %20, %cst_27 {dimension_numbers = #tpu.dot_dimension_numbers<[1], [0], [0], [1], [0, 0, 1, 1], [], []>} : vector<1x16xf32>, vector<16x128xf32>, vector<1x128xf32> -> vector<1x128xf32>
    %cst_28 = arith.constant 9.99999974E-6 : f32
    %36 = vector.broadcast %cst_28 : f32 to vector<1x128xf32>
    %37 = arith.addf %35, %36 : vector<1x128xf32>
    %38 = math.rsqrt %37 : vector<1x128xf32>
    %39 = vector.broadcast %38 : vector<1x128xf32> to vector<8x128xf32>
    %40 = arith.mulf %28, %39 : vector<8x128xf32>
    %41 = vector.broadcast %17 : vector<1x128xf32> to vector<8x128xf32>
    %42 = arith.mulf %40, %41 : vector<8x128xf32>
    %43 = vector.broadcast %18 : vector<1x128xf32> to vector<8x128xf32>
    %44 = arith.addf %42, %43 : vector<8x128xf32>
    %cst_29 = arith.constant 0.000000e+00 : f32
    %45 = vector.broadcast %cst_29 : f32 to vector<8x128xf32>
    %46 = arith.maximumf %44, %45 : vector<8x128xf32>
    %cst_30 = arith.constant 0.000000e+00 : bf16
    %47 = vector.broadcast %cst_30 : bf16 to vector<1x128xbf16>
    %c0_31 = arith.constant 0 : index
    %c0_32 = arith.constant 0 : index
    %c0_33 = arith.constant 0 : index
    %48 = vector.load %arg8[%c0_31, %c0_32, %c0_33] : memref<1x10x128xbf16, #tpu.memory_space<vmem>>, vector<1x1x128xbf16>
    %49 = vector.shape_cast %48 : vector<1x1x128xbf16> to vector<1x128xbf16>
    %50 = vector.shape_cast %47 : vector<1x128xbf16> to vector<1x1x128xbf16>
    tpu.vector_store %arg8[%c0_31, %c0_32, %c0_33], %50 {strides = array<i32>} : memref<1x10x128xbf16, #tpu.memory_space<vmem>>, vector<1x1x128xbf16>,
    %c0_34 = arith.constant 0 : index
    %c9 = arith.constant 9 : index
    %c0_35 = arith.constant 0 : index
    %51 = vector.load %arg8[%c0_34, %c9, %c0_35] : memref<1x10x128xbf16, #tpu.memory_space<vmem>>, vector<1x1x128xbf16>
    %52 = vector.shape_cast %51 : vector<1x1x128xbf16> to vector<1x128xbf16>
    %53 = vector.shape_cast %47 : vector<1x128xbf16> to vector<1x1x128xbf16>
    tpu.vector_store %arg8[%c0_34, %c9, %c0_35], %53 {strides = array<i32>} : memref<1x10x128xbf16, #tpu.memory_space<vmem>>, vector<1x1x128xbf16>,
    %54 = arith.truncf %46 : vector<8x128xf32> to vector<8x128xbf16>
    %c0_36 = arith.constant 0 : index
    %c1_37 = arith.constant 1 : index
    %c0_38 = arith.constant 0 : index
    %55 = vector.load %arg8[%c0_36, %c1_37, %c0_38] : memref<1x10x128xbf16, #tpu.memory_space<vmem>>, vector<1x8x128xbf16>
    %56 = vector.shape_cast %55 : vector<1x8x128xbf16> to vector<8x128xbf16>
    %57 = vector.shape_cast %54 : vector<8x128xbf16> to vector<1x8x128xbf16>
    tpu.vector_store %arg8[%c0_36, %c1_37, %c0_38], %57 {strides = array<i32>} : memref<1x10x128xbf16, #tpu.memory_space<vmem>>, vector<1x8x128xbf16>,
    return
  }
  func.func @transform_0(%arg0: i32) -> (i32, i32, i32) {
    %c0_i32 = arith.constant 0 : i32
    %c0_i32_0 = arith.constant 0 : i32
    %c0_i32_1 = arith.constant 0 : i32
    return %arg0, %c0_i32, %c0_i32_0 : i32, i32, i32
  }
  func.func @transform_1(%arg0: i32) -> (i32, i32) {
    %c0_i32 = arith.constant 0 : i32
    %c0_i32_0 = arith.constant 0 : i32
    %c0_i32_1 = arith.constant 0 : i32
    return %c0_i32, %c0_i32_0 : i32, i32
  }
  func.func @transform_2(%arg0: i32) -> (i32, i32) {
    %c0_i32 = arith.constant 0 : i32
    %c0_i32_0 = arith.constant 0 : i32
    %c0_i32_1 = arith.constant 0 : i32
    return %c0_i32, %c0_i32_0 : i32, i32
  }
  func.func @transform_3(%arg0: i32) -> (i32, i32) {
    %c0_i32 = arith.constant 0 : i32
    %c0_i32_0 = arith.constant 0 : i32
    %c0_i32_1 = arith.constant 0 : i32
    return %c0_i32, %c0_i32_0 : i32, i32
  }
  func.func @transform_4(%arg0: i32) -> (i32, i32) {
    %c0_i32 = arith.constant 0 : i32
    %c0_i32_0 = arith.constant 0 : i32
    %c0_i32_1 = arith.constant 0 : i32
    return %c0_i32, %c0_i32_0 : i32, i32
  }
  func.func @transform_5(%arg0: i32) -> (i32, i32) {
    %c0_i32 = arith.constant 0 : i32
    %c0_i32_0 = arith.constant 0 : i32
    %c0_i32_1 = arith.constant 0 : i32
    return %c0_i32, %c0_i32_0 : i32, i32
  }
  func.func @transform_6(%arg0: i32) -> (i32, i32) {
    %c0_i32 = arith.constant 0 : i32
    %c0_i32_0 = arith.constant 0 : i32
    %c0_i32_1 = arith.constant 0 : i32
    return %c0_i32, %c0_i32_0 : i32, i32
  }
  func.func @transform_7(%arg0: i32) -> (i32, i32, i32) {
    %c0_i32 = arith.constant 0 : i32
    %c0_i32_0 = arith.constant 0 : i32
    %c0_i32_1 = arith.constant 0 : i32
    return %arg0, %c0_i32, %c0_i32_0 : i32, i32, i32
  }
}

module attributes {stable_mosaic.version = 11 : i64} {
  func.func @_resblock_kernel(%arg0: i32, %arg1: memref<1x10x128xbf16, #tpu.memory_space<vmem>>, %arg2: memref<384x128xbf16, #tpu.memory_space<vmem>>, %arg3: memref<1x128xf32, #tpu.memory_space<vmem>>, %arg4: memref<1x128xf32, #tpu.memory_space<vmem>>, %arg5: memref<1x128xf32, #tpu.memory_space<vmem>>, %arg6: memref<384x128xbf16, #tpu.memory_space<vmem>>, %arg7: memref<1x128xf32, #tpu.memory_space<vmem>>, %arg8: memref<1x128xf32, #tpu.memory_space<vmem>>, %arg9: memref<1x128xf32, #tpu.memory_space<vmem>>, %arg10: memref<128x16xf32, #tpu.memory_space<vmem>>, %arg11: memref<16x128xf32, #tpu.memory_space<vmem>>, %arg12: memref<1x10x128xbf16, #tpu.memory_space<vmem>>, %arg13: memref<10x128xbf16, #tpu.memory_space<vmem>>) attributes {dimension_semantics = [#tpu.dimension_semantics<parallel>], iteration_bounds = array<i64: 2>, scalar_prefetch = 0 : i64, scratch_operands = 1 : i64, tpu.core_type = #tpu.core_type<tc>, window_params = [{transform_indices = @transform_0, window_bounds = array<i64: 1, 10, 128>}, {pipeline_mode = #tpu.pipeline_mode<synchronous>, transform_indices = @transform_1, window_bounds = array<i64: 384, 128>}, {pipeline_mode = #tpu.pipeline_mode<synchronous>, transform_indices = @transform_2, window_bounds = array<i64: 1, 128>}, {pipeline_mode = #tpu.pipeline_mode<synchronous>, transform_indices = @transform_3, window_bounds = array<i64: 1, 128>}, {pipeline_mode = #tpu.pipeline_mode<synchronous>, transform_indices = @transform_4, window_bounds = array<i64: 1, 128>}, {pipeline_mode = #tpu.pipeline_mode<synchronous>, transform_indices = @transform_5, window_bounds = array<i64: 384, 128>}, {pipeline_mode = #tpu.pipeline_mode<synchronous>, transform_indices = @transform_6, window_bounds = array<i64: 1, 128>}, {pipeline_mode = #tpu.pipeline_mode<synchronous>, transform_indices = @transform_7, window_bounds = array<i64: 1, 128>}, {pipeline_mode = #tpu.pipeline_mode<synchronous>, transform_indices = @transform_8, window_bounds = array<i64: 1, 128>}, {pipeline_mode = #tpu.pipeline_mode<synchronous>, transform_indices = @transform_9, window_bounds = array<i64: 128, 16>}, {pipeline_mode = #tpu.pipeline_mode<synchronous>, transform_indices = @transform_10, window_bounds = array<i64: 16, 128>}, {transform_indices = @transform_11, window_bounds = array<i64: 1, 10, 128>}]} {
    %c0 = arith.constant 0 : index
    %c0_0 = arith.constant 0 : index
    %c0_1 = arith.constant 0 : index
    %0 = vector.load %arg1[%c0, %c0_0, %c0_1] : memref<1x10x128xbf16, #tpu.memory_space<vmem>>, vector<1x8x128xbf16>
    %1 = vector.shape_cast %0 : vector<1x8x128xbf16> to vector<8x128xbf16>
    %c0_2 = arith.constant 0 : index
    %c1 = arith.constant 1 : index
    %c0_3 = arith.constant 0 : index
    %2 = vector.load %arg1[%c0_2, %c1, %c0_3] : memref<1x10x128xbf16, #tpu.memory_space<vmem>>, vector<1x8x128xbf16>
    %3 = vector.shape_cast %2 : vector<1x8x128xbf16> to vector<8x128xbf16>
    %c0_4 = arith.constant 0 : index
    %c2 = arith.constant 2 : index
    %c0_5 = arith.constant 0 : index
    %4 = vector.load %arg1[%c0_4, %c2, %c0_5] : memref<1x10x128xbf16, #tpu.memory_space<vmem>>, vector<1x8x128xbf16>
    %5 = vector.shape_cast %4 : vector<1x8x128xbf16> to vector<8x128xbf16>
    %6 = tpu.concatenate %1, %3, %5 in 1 : vector<8x128xbf16>, vector<8x128xbf16>, vector<8x128xbf16> -> vector<8x384xbf16>
    %c0_6 = arith.constant 0 : index
    %c0_7 = arith.constant 0 : index
    %7 = vector.load %arg2[%c0_6, %c0_7] : memref<384x128xbf16, #tpu.memory_space<vmem>>, vector<384x128xbf16>
    %cst = arith.constant dense<0.000000e+00> : vector<8x128xf32>
    %8 = tpu.matmul %6, %7, %cst {dimension_numbers = #tpu.dot_dimension_numbers<[1], [0], [0], [1], [0, 0, 1, 1], [], []>} : vector<8x384xbf16>, vector<384x128xbf16>, vector<8x128xf32> -> vector<8x128xf32>
    %c0_8 = arith.constant 0 : index
    %c0_9 = arith.constant 0 : index
    %9 = vector.load %arg3[%c0_8, %c0_9] : memref<1x128xf32, #tpu.memory_space<vmem>>, vector<1x128xf32>
    %10 = vector.broadcast %9 : vector<1x128xf32> to vector<8x128xf32>
    %11 = arith.addf %8, %10 : vector<8x128xf32>
    %c0_10 = arith.constant 0 : index
    %c0_11 = arith.constant 0 : index
    %12 = vector.load %arg4[%c0_10, %c0_11] : memref<1x128xf32, #tpu.memory_space<vmem>>, vector<1x128xf32>
    %c0_12 = arith.constant 0 : index
    %c0_13 = arith.constant 0 : index
    %13 = vector.load %arg5[%c0_12, %c0_13] : memref<1x128xf32, #tpu.memory_space<vmem>>, vector<1x128xf32>
    %c0_14 = arith.constant 0 : index
    %c0_15 = arith.constant 0 : index
    %14 = vector.load %arg10[%c0_14, %c0_15] : memref<128x16xf32, #tpu.memory_space<vmem>>, vector<128x16xf32>
    %c0_16 = arith.constant 0 : index
    %c0_17 = arith.constant 0 : index
    %15 = vector.load %arg11[%c0_16, %c0_17] : memref<16x128xf32, #tpu.memory_space<vmem>>, vector<16x128xf32>
    %cst_18 = arith.constant dense<0.000000e+00> : vector<128xf32>
    %16 = vector.multi_reduction <add>, %11, %cst_18 [0] : vector<8x128xf32> to vector<128xf32>
    %17 = vector.shape_cast %16 : vector<128xf32> to vector<1x128xf32>
    %cst_19 = arith.constant dense<0.000000e+00> : vector<1x16xf32>
    %18 = tpu.matmul %17, %14, %cst_19 {dimension_numbers = #tpu.dot_dimension_numbers<[1], [0], [0], [1], [0, 0, 1, 1], [], []>} : vector<1x128xf32>, vector<128x16xf32>, vector<1x16xf32> -> vector<1x16xf32>
    %cst_20 = arith.constant 1.562500e-02 : f32
    %19 = vector.broadcast %cst_20 : f32 to vector<1x16xf32>
    %20 = arith.mulf %18, %19 : vector<1x16xf32>
    %cst_21 = arith.constant dense<0.000000e+00> : vector<1x128xf32>
    %21 = tpu.matmul %20, %15, %cst_21 {dimension_numbers = #tpu.dot_dimension_numbers<[1], [0], [0], [1], [0, 0, 1, 1], [], []>} : vector<1x16xf32>, vector<16x128xf32>, vector<1x128xf32> -> vector<1x128xf32>
    %22 = vector.broadcast %21 : vector<1x128xf32> to vector<8x128xf32>
    %23 = arith.subf %11, %22 : vector<8x128xf32>
    %24 = arith.mulf %23, %23 : vector<8x128xf32>
    %cst_22 = arith.constant dense<0.000000e+00> : vector<128xf32>
    %25 = vector.multi_reduction <add>, %24, %cst_22 [0] : vector<8x128xf32> to vector<128xf32>
    %26 = vector.shape_cast %25 : vector<128xf32> to vector<1x128xf32>
    %cst_23 = arith.constant dense<0.000000e+00> : vector<1x16xf32>
    %27 = tpu.matmul %26, %14, %cst_23 {dimension_numbers = #tpu.dot_dimension_numbers<[1], [0], [0], [1], [0, 0, 1, 1], [], []>} : vector<1x128xf32>, vector<128x16xf32>, vector<1x16xf32> -> vector<1x16xf32>
    %cst_24 = arith.constant 1.562500e-02 : f32
    %28 = vector.broadcast %cst_24 : f32 to vector<1x16xf32>
    %29 = arith.mulf %27, %28 : vector<1x16xf32>
    %cst_25 = arith.constant dense<0.000000e+00> : vector<1x128xf32>
    %30 = tpu.matmul %29, %15, %cst_25 {dimension_numbers = #tpu.dot_dimension_numbers<[1], [0], [0], [1], [0, 0, 1, 1], [], []>} : vector<1x16xf32>, vector<16x128xf32>, vector<1x128xf32> -> vector<1x128xf32>
    %cst_26 = arith.constant 9.99999974E-6 : f32
    %31 = vector.broadcast %cst_26 : f32 to vector<1x128xf32>
    %32 = arith.addf %30, %31 : vector<1x128xf32>
    %33 = math.rsqrt %32 : vector<1x128xf32>
    %34 = vector.broadcast %33 : vector<1x128xf32> to vector<8x128xf32>
    %35 = arith.mulf %23, %34 : vector<8x128xf32>
    %36 = vector.broadcast %12 : vector<1x128xf32> to vector<8x128xf32>
    %37 = arith.mulf %35, %36 : vector<8x128xf32>
    %38 = vector.broadcast %13 : vector<1x128xf32> to vector<8x128xf32>
    %39 = arith.addf %37, %38 : vector<8x128xf32>
    %cst_27 = arith.constant 0.000000e+00 : f32
    %40 = vector.broadcast %cst_27 : f32 to vector<8x128xf32>
    %41 = arith.maximumf %39, %40 : vector<8x128xf32>
    %cst_28 = arith.constant 0.000000e+00 : bf16
    %42 = vector.broadcast %cst_28 : bf16 to vector<1x128xbf16>
    %c0_29 = arith.constant 0 : index
    %c0_30 = arith.constant 0 : index
    %43 = vector.load %arg13[%c0_29, %c0_30] : memref<10x128xbf16, #tpu.memory_space<vmem>>, vector<1x128xbf16>
    tpu.vector_store %arg13[%c0_29, %c0_30], %42 {strides = array<i32>} : memref<10x128xbf16, #tpu.memory_space<vmem>>, vector<1x128xbf16>,
    %c9 = arith.constant 9 : index
    %c0_31 = arith.constant 0 : index
    %44 = vector.load %arg13[%c9, %c0_31] : memref<10x128xbf16, #tpu.memory_space<vmem>>, vector<1x128xbf16>
    tpu.vector_store %arg13[%c9, %c0_31], %42 {strides = array<i32>} : memref<10x128xbf16, #tpu.memory_space<vmem>>, vector<1x128xbf16>,
    %45 = arith.truncf %41 : vector<8x128xf32> to vector<8x128xbf16>
    %c1_32 = arith.constant 1 : index
    %c0_33 = arith.constant 0 : index
    %46 = vector.load %arg13[%c1_32, %c0_33] : memref<10x128xbf16, #tpu.memory_space<vmem>>, vector<8x128xbf16>
    tpu.vector_store %arg13[%c1_32, %c0_33], %45 {strides = array<i32>} : memref<10x128xbf16, #tpu.memory_space<vmem>>, vector<8x128xbf16>,
    %c0_34 = arith.constant 0 : index
    %c0_35 = arith.constant 0 : index
    %47 = vector.load %arg13[%c0_34, %c0_35] : memref<10x128xbf16, #tpu.memory_space<vmem>>, vector<8x128xbf16>
    %c1_36 = arith.constant 1 : index
    %c0_37 = arith.constant 0 : index
    %48 = vector.load %arg13[%c1_36, %c0_37] : memref<10x128xbf16, #tpu.memory_space<vmem>>, vector<8x128xbf16>
    %c2_38 = arith.constant 2 : index
    %c0_39 = arith.constant 0 : index
    %49 = vector.load %arg13[%c2_38, %c0_39] : memref<10x128xbf16, #tpu.memory_space<vmem>>, vector<8x128xbf16>
    %50 = tpu.concatenate %47, %48, %49 in 1 : vector<8x128xbf16>, vector<8x128xbf16>, vector<8x128xbf16> -> vector<8x384xbf16>
    %c0_40 = arith.constant 0 : index
    %c0_41 = arith.constant 0 : index
    %51 = vector.load %arg6[%c0_40, %c0_41] : memref<384x128xbf16, #tpu.memory_space<vmem>>, vector<384x128xbf16>
    %cst_42 = arith.constant dense<0.000000e+00> : vector<8x128xf32>
    %52 = tpu.matmul %50, %51, %cst_42 {dimension_numbers = #tpu.dot_dimension_numbers<[1], [0], [0], [1], [0, 0, 1, 1], [], []>} : vector<8x384xbf16>, vector<384x128xbf16>, vector<8x128xf32> -> vector<8x128xf32>
    %c0_43 = arith.constant 0 : index
    %c0_44 = arith.constant 0 : index
    %53 = vector.load %arg7[%c0_43, %c0_44] : memref<1x128xf32, #tpu.memory_space<vmem>>, vector<1x128xf32>
    %54 = vector.broadcast %53 : vector<1x128xf32> to vector<8x128xf32>
    %55 = arith.addf %52, %54 : vector<8x128xf32>
    %c0_45 = arith.constant 0 : index
    %c0_46 = arith.constant 0 : index
    %56 = vector.load %arg8[%c0_45, %c0_46] : memref<1x128xf32, #tpu.memory_space<vmem>>, vector<1x128xf32>
    %c0_47 = arith.constant 0 : index
    %c0_48 = arith.constant 0 : index
    %57 = vector.load %arg9[%c0_47, %c0_48] : memref<1x128xf32, #tpu.memory_space<vmem>>, vector<1x128xf32>
    %c0_49 = arith.constant 0 : index
    %c0_50 = arith.constant 0 : index
    %58 = vector.load %arg10[%c0_49, %c0_50] : memref<128x16xf32, #tpu.memory_space<vmem>>, vector<128x16xf32>
    %c0_51 = arith.constant 0 : index
    %c0_52 = arith.constant 0 : index
    %59 = vector.load %arg11[%c0_51, %c0_52] : memref<16x128xf32, #tpu.memory_space<vmem>>, vector<16x128xf32>
    %cst_53 = arith.constant dense<0.000000e+00> : vector<128xf32>
    %60 = vector.multi_reduction <add>, %55, %cst_53 [0] : vector<8x128xf32> to vector<128xf32>
    %61 = vector.shape_cast %60 : vector<128xf32> to vector<1x128xf32>
    %cst_54 = arith.constant dense<0.000000e+00> : vector<1x16xf32>
    %62 = tpu.matmul %61, %58, %cst_54 {dimension_numbers = #tpu.dot_dimension_numbers<[1], [0], [0], [1], [0, 0, 1, 1], [], []>} : vector<1x128xf32>, vector<128x16xf32>, vector<1x16xf32> -> vector<1x16xf32>
    %cst_55 = arith.constant 1.562500e-02 : f32
    %63 = vector.broadcast %cst_55 : f32 to vector<1x16xf32>
    %64 = arith.mulf %62, %63 : vector<1x16xf32>
    %cst_56 = arith.constant dense<0.000000e+00> : vector<1x128xf32>
    %65 = tpu.matmul %64, %59, %cst_56 {dimension_numbers = #tpu.dot_dimension_numbers<[1], [0], [0], [1], [0, 0, 1, 1], [], []>} : vector<1x16xf32>, vector<16x128xf32>, vector<1x128xf32> -> vector<1x128xf32>
    %66 = vector.broadcast %65 : vector<1x128xf32> to vector<8x128xf32>
    %67 = arith.subf %55, %66 : vector<8x128xf32>
    %68 = arith.mulf %67, %67 : vector<8x128xf32>
    %cst_57 = arith.constant dense<0.000000e+00> : vector<128xf32>
    %69 = vector.multi_reduction <add>, %68, %cst_57 [0] : vector<8x128xf32> to vector<128xf32>
    %70 = vector.shape_cast %69 : vector<128xf32> to vector<1x128xf32>
    %cst_58 = arith.constant dense<0.000000e+00> : vector<1x16xf32>
    %71 = tpu.matmul %70, %58, %cst_58 {dimension_numbers = #tpu.dot_dimension_numbers<[1], [0], [0], [1], [0, 0, 1, 1], [], []>} : vector<1x128xf32>, vector<128x16xf32>, vector<1x16xf32> -> vector<1x16xf32>
    %cst_59 = arith.constant 1.562500e-02 : f32
    %72 = vector.broadcast %cst_59 : f32 to vector<1x16xf32>
    %73 = arith.mulf %71, %72 : vector<1x16xf32>
    %cst_60 = arith.constant dense<0.000000e+00> : vector<1x128xf32>
    %74 = tpu.matmul %73, %59, %cst_60 {dimension_numbers = #tpu.dot_dimension_numbers<[1], [0], [0], [1], [0, 0, 1, 1], [], []>} : vector<1x16xf32>, vector<16x128xf32>, vector<1x128xf32> -> vector<1x128xf32>
    %cst_61 = arith.constant 9.99999974E-6 : f32
    %75 = vector.broadcast %cst_61 : f32 to vector<1x128xf32>
    %76 = arith.addf %74, %75 : vector<1x128xf32>
    %77 = math.rsqrt %76 : vector<1x128xf32>
    %78 = vector.broadcast %77 : vector<1x128xf32> to vector<8x128xf32>
    %79 = arith.mulf %67, %78 : vector<8x128xf32>
    %80 = vector.broadcast %56 : vector<1x128xf32> to vector<8x128xf32>
    %81 = arith.mulf %79, %80 : vector<8x128xf32>
    %82 = vector.broadcast %57 : vector<1x128xf32> to vector<8x128xf32>
    %83 = arith.addf %81, %82 : vector<8x128xf32>
    %c0_62 = arith.constant 0 : index
    %c1_63 = arith.constant 1 : index
    %c0_64 = arith.constant 0 : index
    %84 = vector.load %arg1[%c0_62, %c1_63, %c0_64] : memref<1x10x128xbf16, #tpu.memory_space<vmem>>, vector<1x8x128xbf16>
    %85 = vector.shape_cast %84 : vector<1x8x128xbf16> to vector<8x128xbf16>
    %86 = arith.extf %85 : vector<8x128xbf16> to vector<8x128xf32>
    %87 = arith.addf %83, %86 : vector<8x128xf32>
    %cst_65 = arith.constant 0.000000e+00 : f32
    %88 = vector.broadcast %cst_65 : f32 to vector<8x128xf32>
    %89 = arith.maximumf %87, %88 : vector<8x128xf32>
    %cst_66 = arith.constant 0.000000e+00 : bf16
    %90 = vector.broadcast %cst_66 : bf16 to vector<1x128xbf16>
    %c0_67 = arith.constant 0 : index
    %c0_68 = arith.constant 0 : index
    %c0_69 = arith.constant 0 : index
    %91 = vector.load %arg12[%c0_67, %c0_68, %c0_69] : memref<1x10x128xbf16, #tpu.memory_space<vmem>>, vector<1x1x128xbf16>
    %92 = vector.shape_cast %91 : vector<1x1x128xbf16> to vector<1x128xbf16>
    %93 = vector.shape_cast %90 : vector<1x128xbf16> to vector<1x1x128xbf16>
    tpu.vector_store %arg12[%c0_67, %c0_68, %c0_69], %93 {strides = array<i32>} : memref<1x10x128xbf16, #tpu.memory_space<vmem>>, vector<1x1x128xbf16>,
    %c0_70 = arith.constant 0 : index
    %c9_71 = arith.constant 9 : index
    %c0_72 = arith.constant 0 : index
    %94 = vector.load %arg12[%c0_70, %c9_71, %c0_72] : memref<1x10x128xbf16, #tpu.memory_space<vmem>>, vector<1x1x128xbf16>
    %95 = vector.shape_cast %94 : vector<1x1x128xbf16> to vector<1x128xbf16>
    %96 = vector.shape_cast %90 : vector<1x128xbf16> to vector<1x1x128xbf16>
    tpu.vector_store %arg12[%c0_70, %c9_71, %c0_72], %96 {strides = array<i32>} : memref<1x10x128xbf16, #tpu.memory_space<vmem>>, vector<1x1x128xbf16>,
    %97 = arith.truncf %89 : vector<8x128xf32> to vector<8x128xbf16>
    %c0_73 = arith.constant 0 : index
    %c1_74 = arith.constant 1 : index
    %c0_75 = arith.constant 0 : index
    %98 = vector.load %arg12[%c0_73, %c1_74, %c0_75] : memref<1x10x128xbf16, #tpu.memory_space<vmem>>, vector<1x8x128xbf16>
    %99 = vector.shape_cast %98 : vector<1x8x128xbf16> to vector<8x128xbf16>
    %100 = vector.shape_cast %97 : vector<8x128xbf16> to vector<1x8x128xbf16>
    tpu.vector_store %arg12[%c0_73, %c1_74, %c0_75], %100 {strides = array<i32>} : memref<1x10x128xbf16, #tpu.memory_space<vmem>>, vector<1x8x128xbf16>,
    return
  }
  func.func @transform_0(%arg0: i32) -> (i32, i32, i32) {
    %c0_i32 = arith.constant 0 : i32
    %c0_i32_0 = arith.constant 0 : i32
    %c0_i32_1 = arith.constant 0 : i32
    return %arg0, %c0_i32, %c0_i32_0 : i32, i32, i32
  }
  func.func @transform_1(%arg0: i32) -> (i32, i32) {
    %c0_i32 = arith.constant 0 : i32
    %c0_i32_0 = arith.constant 0 : i32
    %c0_i32_1 = arith.constant 0 : i32
    return %c0_i32, %c0_i32_0 : i32, i32
  }
  func.func @transform_2(%arg0: i32) -> (i32, i32) {
    %c0_i32 = arith.constant 0 : i32
    %c0_i32_0 = arith.constant 0 : i32
    %c0_i32_1 = arith.constant 0 : i32
    return %c0_i32, %c0_i32_0 : i32, i32
  }
  func.func @transform_3(%arg0: i32) -> (i32, i32) {
    %c0_i32 = arith.constant 0 : i32
    %c0_i32_0 = arith.constant 0 : i32
    %c0_i32_1 = arith.constant 0 : i32
    return %c0_i32, %c0_i32_0 : i32, i32
  }
  func.func @transform_4(%arg0: i32) -> (i32, i32) {
    %c0_i32 = arith.constant 0 : i32
    %c0_i32_0 = arith.constant 0 : i32
    %c0_i32_1 = arith.constant 0 : i32
    return %c0_i32, %c0_i32_0 : i32, i32
  }
  func.func @transform_5(%arg0: i32) -> (i32, i32) {
    %c0_i32 = arith.constant 0 : i32
    %c0_i32_0 = arith.constant 0 : i32
    %c0_i32_1 = arith.constant 0 : i32
    return %c0_i32, %c0_i32_0 : i32, i32
  }
  func.func @transform_6(%arg0: i32) -> (i32, i32) {
    %c0_i32 = arith.constant 0 : i32
    %c0_i32_0 = arith.constant 0 : i32
    %c0_i32_1 = arith.constant 0 : i32
    return %c0_i32, %c0_i32_0 : i32, i32
  }
  func.func @transform_7(%arg0: i32) -> (i32, i32) {
    %c0_i32 = arith.constant 0 : i32
    %c0_i32_0 = arith.constant 0 : i32
    %c0_i32_1 = arith.constant 0 : i32
    return %c0_i32, %c0_i32_0 : i32, i32
  }
  func.func @transform_8(%arg0: i32) -> (i32, i32) {
    %c0_i32 = arith.constant 0 : i32
    %c0_i32_0 = arith.constant 0 : i32
    %c0_i32_1 = arith.constant 0 : i32
    return %c0_i32, %c0_i32_0 : i32, i32
  }
  func.func @transform_9(%arg0: i32) -> (i32, i32) {
    %c0_i32 = arith.constant 0 : i32
    %c0_i32_0 = arith.constant 0 : i32
    %c0_i32_1 = arith.constant 0 : i32
    return %c0_i32, %c0_i32_0 : i32, i32
  }
  func.func @transform_10(%arg0: i32) -> (i32, i32) {
    %c0_i32 = arith.constant 0 : i32
    %c0_i32_0 = arith.constant 0 : i32
    %c0_i32_1 = arith.constant 0 : i32
    return %c0_i32, %c0_i32_0 : i32, i32
  }
  func.func @transform_11(%arg0: i32) -> (i32, i32, i32) {
    %c0_i32 = arith.constant 0 : i32
    %c0_i32_0 = arith.constant 0 : i32
    %c0_i32_1 = arith.constant 0 : i32
    return %arg0, %c0_i32, %c0_i32_0 : i32, i32, i32
  }
}

module attributes {stable_mosaic.version = 11 : i64} {
  func.func @_conv_gn_relu_kernel(%arg0: i32, %arg1: memref<1x5x256xbf16, #tpu.memory_space<vmem>>, %arg2: memref<384x256xbf16, #tpu.memory_space<vmem>>, %arg3: memref<1x256xf32, #tpu.memory_space<vmem>>, %arg4: memref<1x256xf32, #tpu.memory_space<vmem>>, %arg5: memref<1x256xf32, #tpu.memory_space<vmem>>, %arg6: memref<256x32xf32, #tpu.memory_space<vmem>>, %arg7: memref<32x256xf32, #tpu.memory_space<vmem>>, %arg8: memref<1x6x256xbf16, #tpu.memory_space<vmem>>) attributes {dimension_semantics = [#tpu.dimension_semantics<parallel>], iteration_bounds = array<i64: 2>, scalar_prefetch = 0 : i64, scratch_operands = 0 : i64, tpu.core_type = #tpu.core_type<tc>, window_params = [{transform_indices = @transform_0, window_bounds = array<i64: 1, 5, 256>}, {pipeline_mode = #tpu.pipeline_mode<synchronous>, transform_indices = @transform_1, window_bounds = array<i64: 384, 256>}, {pipeline_mode = #tpu.pipeline_mode<synchronous>, transform_indices = @transform_2, window_bounds = array<i64: 1, 256>}, {pipeline_mode = #tpu.pipeline_mode<synchronous>, transform_indices = @transform_3, window_bounds = array<i64: 1, 256>}, {pipeline_mode = #tpu.pipeline_mode<synchronous>, transform_indices = @transform_4, window_bounds = array<i64: 1, 256>}, {pipeline_mode = #tpu.pipeline_mode<synchronous>, transform_indices = @transform_5, window_bounds = array<i64: 256, 32>}, {pipeline_mode = #tpu.pipeline_mode<synchronous>, transform_indices = @transform_6, window_bounds = array<i64: 32, 256>}, {transform_indices = @transform_7, window_bounds = array<i64: 1, 6, 256>}]} {
    %c0 = arith.constant 0 : index
    %c0_0 = arith.constant 0 : index
    %c0_1 = arith.constant 0 : index
    %0 = vector.load %arg1[%c0, %c0_0, %c0_1] : memref<1x5x256xbf16, #tpu.memory_space<vmem>>, vector<1x4x256xbf16>
    %1 = vector.shape_cast %0 : vector<1x4x256xbf16> to vector<4x256xbf16>
    %c0_2 = arith.constant 0 : index
    %c1 = arith.constant 1 : index
    %c0_3 = arith.constant 0 : index
    %2 = vector.load %arg1[%c0_2, %c1, %c0_3] : memref<1x5x256xbf16, #tpu.memory_space<vmem>>, vector<1x4x128xbf16>
    %3 = vector.shape_cast %2 : vector<1x4x128xbf16> to vector<4x128xbf16>
    %4 = tpu.concatenate %1, %3 in 1 : vector<4x256xbf16>, vector<4x128xbf16> -> vector<4x384xbf16>
    %c0_4 = arith.constant 0 : index
    %c0_5 = arith.constant 0 : index
    %5 = vector.load %arg2[%c0_4, %c0_5] : memref<384x256xbf16, #tpu.memory_space<vmem>>, vector<384x256xbf16>
    %cst = arith.constant dense<0.000000e+00> : vector<4x256xf32>
    %6 = tpu.matmul %4, %5, %cst {dimension_numbers = #tpu.dot_dimension_numbers<[1], [0], [0], [1], [0, 0, 1, 1], [], []>} : vector<4x384xbf16>, vector<384x256xbf16>, vector<4x256xf32> -> vector<4x256xf32>
    %c0_6 = arith.constant 0 : index
    %c0_7 = arith.constant 0 : index
    %7 = vector.load %arg3[%c0_6, %c0_7] : memref<1x256xf32, #tpu.memory_space<vmem>>, vector<1x256xf32>
    %8 = vector.broadcast %7 : vector<1x256xf32> to vector<4x256xf32>
    %9 = arith.addf %6, %8 : vector<4x256xf32>
    %c0_8 = arith.constant 0 : index
    %c0_9 = arith.constant 0 : index
    %10 = vector.load %arg4[%c0_8, %c0_9] : memref<1x256xf32, #tpu.memory_space<vmem>>, vector<1x256xf32>
    %c0_10 = arith.constant 0 : index
    %c0_11 = arith.constant 0 : index
    %11 = vector.load %arg5[%c0_10, %c0_11] : memref<1x256xf32, #tpu.memory_space<vmem>>, vector<1x256xf32>
    %c0_12 = arith.constant 0 : index
    %c0_13 = arith.constant 0 : index
    %12 = vector.load %arg6[%c0_12, %c0_13] : memref<256x32xf32, #tpu.memory_space<vmem>>, vector<256x32xf32>
    %c0_14 = arith.constant 0 : index
    %c0_15 = arith.constant 0 : index
    %13 = vector.load %arg7[%c0_14, %c0_15] : memref<32x256xf32, #tpu.memory_space<vmem>>, vector<32x256xf32>
    %cst_16 = arith.constant dense<0.000000e+00> : vector<256xf32>
    %14 = vector.multi_reduction <add>, %9, %cst_16 [0] : vector<4x256xf32> to vector<256xf32>
    %15 = vector.shape_cast %14 : vector<256xf32> to vector<1x256xf32>
    %cst_17 = arith.constant dense<0.000000e+00> : vector<1x32xf32>
    %16 = tpu.matmul %15, %12, %cst_17 {dimension_numbers = #tpu.dot_dimension_numbers<[1], [0], [0], [1], [0, 0, 1, 1], [], []>} : vector<1x256xf32>, vector<256x32xf32>, vector<1x32xf32> -> vector<1x32xf32>
    %cst_18 = arith.constant 3.125000e-02 : f32
    %17 = vector.broadcast %cst_18 : f32 to vector<1x32xf32>
    %18 = arith.mulf %16, %17 : vector<1x32xf32>
    %cst_19 = arith.constant dense<0.000000e+00> : vector<1x256xf32>
    %19 = tpu.matmul %18, %13, %cst_19 {dimension_numbers = #tpu.dot_dimension_numbers<[1], [0], [0], [1], [0, 0, 1, 1], [], []>} : vector<1x32xf32>, vector<32x256xf32>, vector<1x256xf32> -> vector<1x256xf32>
    %20 = vector.broadcast %19 : vector<1x256xf32> to vector<4x256xf32>
    %21 = arith.subf %9, %20 : vector<4x256xf32>
    %22 = arith.mulf %21, %21 : vector<4x256xf32>
    %cst_20 = arith.constant dense<0.000000e+00> : vector<256xf32>
    %23 = vector.multi_reduction <add>, %22, %cst_20 [0] : vector<4x256xf32> to vector<256xf32>
    %24 = vector.shape_cast %23 : vector<256xf32> to vector<1x256xf32>
    %cst_21 = arith.constant dense<0.000000e+00> : vector<1x32xf32>
    %25 = tpu.matmul %24, %12, %cst_21 {dimension_numbers = #tpu.dot_dimension_numbers<[1], [0], [0], [1], [0, 0, 1, 1], [], []>} : vector<1x256xf32>, vector<256x32xf32>, vector<1x32xf32> -> vector<1x32xf32>
    %cst_22 = arith.constant 3.125000e-02 : f32
    %26 = vector.broadcast %cst_22 : f32 to vector<1x32xf32>
    %27 = arith.mulf %25, %26 : vector<1x32xf32>
    %cst_23 = arith.constant dense<0.000000e+00> : vector<1x256xf32>
    %28 = tpu.matmul %27, %13, %cst_23 {dimension_numbers = #tpu.dot_dimension_numbers<[1], [0], [0], [1], [0, 0, 1, 1], [], []>} : vector<1x32xf32>, vector<32x256xf32>, vector<1x256xf32> -> vector<1x256xf32>
    %cst_24 = arith.constant 9.99999974E-6 : f32
    %29 = vector.broadcast %cst_24 : f32 to vector<1x256xf32>
    %30 = arith.addf %28, %29 : vector<1x256xf32>
    %31 = math.rsqrt %30 : vector<1x256xf32>
    %32 = vector.broadcast %31 : vector<1x256xf32> to vector<4x256xf32>
    %33 = arith.mulf %21, %32 : vector<4x256xf32>
    %34 = vector.broadcast %10 : vector<1x256xf32> to vector<4x256xf32>
    %35 = arith.mulf %33, %34 : vector<4x256xf32>
    %36 = vector.broadcast %11 : vector<1x256xf32> to vector<4x256xf32>
    %37 = arith.addf %35, %36 : vector<4x256xf32>
    %cst_25 = arith.constant 0.000000e+00 : f32
    %38 = vector.broadcast %cst_25 : f32 to vector<4x256xf32>
    %39 = arith.maximumf %37, %38 : vector<4x256xf32>
    %cst_26 = arith.constant 0.000000e+00 : bf16
    %40 = vector.broadcast %cst_26 : bf16 to vector<1x256xbf16>
    %c0_27 = arith.constant 0 : index
    %c0_28 = arith.constant 0 : index
    %c0_29 = arith.constant 0 : index
    %41 = vector.load %arg8[%c0_27, %c0_28, %c0_29] : memref<1x6x256xbf16, #tpu.memory_space<vmem>>, vector<1x1x256xbf16>
    %42 = vector.shape_cast %41 : vector<1x1x256xbf16> to vector<1x256xbf16>
    %43 = vector.shape_cast %40 : vector<1x256xbf16> to vector<1x1x256xbf16>
    tpu.vector_store %arg8[%c0_27, %c0_28, %c0_29], %43 {strides = array<i32>} : memref<1x6x256xbf16, #tpu.memory_space<vmem>>, vector<1x1x256xbf16>,
    %c0_30 = arith.constant 0 : index
    %c5 = arith.constant 5 : index
    %c0_31 = arith.constant 0 : index
    %44 = vector.load %arg8[%c0_30, %c5, %c0_31] : memref<1x6x256xbf16, #tpu.memory_space<vmem>>, vector<1x1x256xbf16>
    %45 = vector.shape_cast %44 : vector<1x1x256xbf16> to vector<1x256xbf16>
    %46 = vector.shape_cast %40 : vector<1x256xbf16> to vector<1x1x256xbf16>
    tpu.vector_store %arg8[%c0_30, %c5, %c0_31], %46 {strides = array<i32>} : memref<1x6x256xbf16, #tpu.memory_space<vmem>>, vector<1x1x256xbf16>,
    %47 = arith.truncf %39 : vector<4x256xf32> to vector<4x256xbf16>
    %c0_32 = arith.constant 0 : index
    %c1_33 = arith.constant 1 : index
    %c0_34 = arith.constant 0 : index
    %48 = vector.load %arg8[%c0_32, %c1_33, %c0_34] : memref<1x6x256xbf16, #tpu.memory_space<vmem>>, vector<1x4x256xbf16>
    %49 = vector.shape_cast %48 : vector<1x4x256xbf16> to vector<4x256xbf16>
    %50 = vector.shape_cast %47 : vector<4x256xbf16> to vector<1x4x256xbf16>
    tpu.vector_store %arg8[%c0_32, %c1_33, %c0_34], %50 {strides = array<i32>} : memref<1x6x256xbf16, #tpu.memory_space<vmem>>, vector<1x4x256xbf16>,
    return
  }
  func.func @transform_0(%arg0: i32) -> (i32, i32, i32) {
    %c0_i32 = arith.constant 0 : i32
    %c0_i32_0 = arith.constant 0 : i32
    %c0_i32_1 = arith.constant 0 : i32
    return %arg0, %c0_i32, %c0_i32_0 : i32, i32, i32
  }
  func.func @transform_1(%arg0: i32) -> (i32, i32) {
    %c0_i32 = arith.constant 0 : i32
    %c0_i32_0 = arith.constant 0 : i32
    %c0_i32_1 = arith.constant 0 : i32
    return %c0_i32, %c0_i32_0 : i32, i32
  }
  func.func @transform_2(%arg0: i32) -> (i32, i32) {
    %c0_i32 = arith.constant 0 : i32
    %c0_i32_0 = arith.constant 0 : i32
    %c0_i32_1 = arith.constant 0 : i32
    return %c0_i32, %c0_i32_0 : i32, i32
  }
  func.func @transform_3(%arg0: i32) -> (i32, i32) {
    %c0_i32 = arith.constant 0 : i32
    %c0_i32_0 = arith.constant 0 : i32
    %c0_i32_1 = arith.constant 0 : i32
    return %c0_i32, %c0_i32_0 : i32, i32
  }
  func.func @transform_4(%arg0: i32) -> (i32, i32) {
    %c0_i32 = arith.constant 0 : i32
    %c0_i32_0 = arith.constant 0 : i32
    %c0_i32_1 = arith.constant 0 : i32
    return %c0_i32, %c0_i32_0 : i32, i32
  }
  func.func @transform_5(%arg0: i32) -> (i32, i32) {
    %c0_i32 = arith.constant 0 : i32
    %c0_i32_0 = arith.constant 0 : i32
    %c0_i32_1 = arith.constant 0 : i32
    return %c0_i32, %c0_i32_0 : i32, i32
  }
  func.func @transform_6(%arg0: i32) -> (i32, i32) {
    %c0_i32 = arith.constant 0 : i32
    %c0_i32_0 = arith.constant 0 : i32
    %c0_i32_1 = arith.constant 0 : i32
    return %c0_i32, %c0_i32_0 : i32, i32
  }
  func.func @transform_7(%arg0: i32) -> (i32, i32, i32) {
    %c0_i32 = arith.constant 0 : i32
    %c0_i32_0 = arith.constant 0 : i32
    %c0_i32_1 = arith.constant 0 : i32
    return %arg0, %c0_i32, %c0_i32_0 : i32, i32, i32
  }
}

module attributes {stable_mosaic.version = 11 : i64} {
  func.func @_resblock_kernel(%arg0: i32, %arg1: memref<1x6x256xbf16, #tpu.memory_space<vmem>>, %arg2: memref<768x256xbf16, #tpu.memory_space<vmem>>, %arg3: memref<1x256xf32, #tpu.memory_space<vmem>>, %arg4: memref<1x256xf32, #tpu.memory_space<vmem>>, %arg5: memref<1x256xf32, #tpu.memory_space<vmem>>, %arg6: memref<768x256xbf16, #tpu.memory_space<vmem>>, %arg7: memref<1x256xf32, #tpu.memory_space<vmem>>, %arg8: memref<1x256xf32, #tpu.memory_space<vmem>>, %arg9: memref<1x256xf32, #tpu.memory_space<vmem>>, %arg10: memref<256x32xf32, #tpu.memory_space<vmem>>, %arg11: memref<32x256xf32, #tpu.memory_space<vmem>>, %arg12: memref<1x6x256xbf16, #tpu.memory_space<vmem>>, %arg13: memref<6x256xbf16, #tpu.memory_space<vmem>>) attributes {dimension_semantics = [#tpu.dimension_semantics<parallel>], iteration_bounds = array<i64: 2>, scalar_prefetch = 0 : i64, scratch_operands = 1 : i64, tpu.core_type = #tpu.core_type<tc>, window_params = [{transform_indices = @transform_0, window_bounds = array<i64: 1, 6, 256>}, {pipeline_mode = #tpu.pipeline_mode<synchronous>, transform_indices = @transform_1, window_bounds = array<i64: 768, 256>}, {pipeline_mode = #tpu.pipeline_mode<synchronous>, transform_indices = @transform_2, window_bounds = array<i64: 1, 256>}, {pipeline_mode = #tpu.pipeline_mode<synchronous>, transform_indices = @transform_3, window_bounds = array<i64: 1, 256>}, {pipeline_mode = #tpu.pipeline_mode<synchronous>, transform_indices = @transform_4, window_bounds = array<i64: 1, 256>}, {pipeline_mode = #tpu.pipeline_mode<synchronous>, transform_indices = @transform_5, window_bounds = array<i64: 768, 256>}, {pipeline_mode = #tpu.pipeline_mode<synchronous>, transform_indices = @transform_6, window_bounds = array<i64: 1, 256>}, {pipeline_mode = #tpu.pipeline_mode<synchronous>, transform_indices = @transform_7, window_bounds = array<i64: 1, 256>}, {pipeline_mode = #tpu.pipeline_mode<synchronous>, transform_indices = @transform_8, window_bounds = array<i64: 1, 256>}, {pipeline_mode = #tpu.pipeline_mode<synchronous>, transform_indices = @transform_9, window_bounds = array<i64: 256, 32>}, {pipeline_mode = #tpu.pipeline_mode<synchronous>, transform_indices = @transform_10, window_bounds = array<i64: 32, 256>}, {transform_indices = @transform_11, window_bounds = array<i64: 1, 6, 256>}]} {
    %c0 = arith.constant 0 : index
    %c0_0 = arith.constant 0 : index
    %c0_1 = arith.constant 0 : index
    %0 = vector.load %arg1[%c0, %c0_0, %c0_1] : memref<1x6x256xbf16, #tpu.memory_space<vmem>>, vector<1x4x256xbf16>
    %1 = vector.shape_cast %0 : vector<1x4x256xbf16> to vector<4x256xbf16>
    %c0_2 = arith.constant 0 : index
    %c1 = arith.constant 1 : index
    %c0_3 = arith.constant 0 : index
    %2 = vector.load %arg1[%c0_2, %c1, %c0_3] : memref<1x6x256xbf16, #tpu.memory_space<vmem>>, vector<1x4x256xbf16>
    %3 = vector.shape_cast %2 : vector<1x4x256xbf16> to vector<4x256xbf16>
    %c0_4 = arith.constant 0 : index
    %c2 = arith.constant 2 : index
    %c0_5 = arith.constant 0 : index
    %4 = vector.load %arg1[%c0_4, %c2, %c0_5] : memref<1x6x256xbf16, #tpu.memory_space<vmem>>, vector<1x4x256xbf16>
    %5 = vector.shape_cast %4 : vector<1x4x256xbf16> to vector<4x256xbf16>
    %6 = tpu.concatenate %1, %3, %5 in 1 : vector<4x256xbf16>, vector<4x256xbf16>, vector<4x256xbf16> -> vector<4x768xbf16>
    %c0_6 = arith.constant 0 : index
    %c0_7 = arith.constant 0 : index
    %7 = vector.load %arg2[%c0_6, %c0_7] : memref<768x256xbf16, #tpu.memory_space<vmem>>, vector<768x256xbf16>
    %cst = arith.constant dense<0.000000e+00> : vector<4x256xf32>
    %8 = tpu.matmul %6, %7, %cst {dimension_numbers = #tpu.dot_dimension_numbers<[1], [0], [0], [1], [0, 0, 1, 1], [], []>} : vector<4x768xbf16>, vector<768x256xbf16>, vector<4x256xf32> -> vector<4x256xf32>
    %c0_8 = arith.constant 0 : index
    %c0_9 = arith.constant 0 : index
    %9 = vector.load %arg3[%c0_8, %c0_9] : memref<1x256xf32, #tpu.memory_space<vmem>>, vector<1x256xf32>
    %10 = vector.broadcast %9 : vector<1x256xf32> to vector<4x256xf32>
    %11 = arith.addf %8, %10 : vector<4x256xf32>
    %c0_10 = arith.constant 0 : index
    %c0_11 = arith.constant 0 : index
    %12 = vector.load %arg4[%c0_10, %c0_11] : memref<1x256xf32, #tpu.memory_space<vmem>>, vector<1x256xf32>
    %c0_12 = arith.constant 0 : index
    %c0_13 = arith.constant 0 : index
    %13 = vector.load %arg5[%c0_12, %c0_13] : memref<1x256xf32, #tpu.memory_space<vmem>>, vector<1x256xf32>
    %c0_14 = arith.constant 0 : index
    %c0_15 = arith.constant 0 : index
    %14 = vector.load %arg10[%c0_14, %c0_15] : memref<256x32xf32, #tpu.memory_space<vmem>>, vector<256x32xf32>
    %c0_16 = arith.constant 0 : index
    %c0_17 = arith.constant 0 : index
    %15 = vector.load %arg11[%c0_16, %c0_17] : memref<32x256xf32, #tpu.memory_space<vmem>>, vector<32x256xf32>
    %cst_18 = arith.constant dense<0.000000e+00> : vector<256xf32>
    %16 = vector.multi_reduction <add>, %11, %cst_18 [0] : vector<4x256xf32> to vector<256xf32>
    %17 = vector.shape_cast %16 : vector<256xf32> to vector<1x256xf32>
    %cst_19 = arith.constant dense<0.000000e+00> : vector<1x32xf32>
    %18 = tpu.matmul %17, %14, %cst_19 {dimension_numbers = #tpu.dot_dimension_numbers<[1], [0], [0], [1], [0, 0, 1, 1], [], []>} : vector<1x256xf32>, vector<256x32xf32>, vector<1x32xf32> -> vector<1x32xf32>
    %cst_20 = arith.constant 3.125000e-02 : f32
    %19 = vector.broadcast %cst_20 : f32 to vector<1x32xf32>
    %20 = arith.mulf %18, %19 : vector<1x32xf32>
    %cst_21 = arith.constant dense<0.000000e+00> : vector<1x256xf32>
    %21 = tpu.matmul %20, %15, %cst_21 {dimension_numbers = #tpu.dot_dimension_numbers<[1], [0], [0], [1], [0, 0, 1, 1], [], []>} : vector<1x32xf32>, vector<32x256xf32>, vector<1x256xf32> -> vector<1x256xf32>
    %22 = vector.broadcast %21 : vector<1x256xf32> to vector<4x256xf32>
    %23 = arith.subf %11, %22 : vector<4x256xf32>
    %24 = arith.mulf %23, %23 : vector<4x256xf32>
    %cst_22 = arith.constant dense<0.000000e+00> : vector<256xf32>
    %25 = vector.multi_reduction <add>, %24, %cst_22 [0] : vector<4x256xf32> to vector<256xf32>
    %26 = vector.shape_cast %25 : vector<256xf32> to vector<1x256xf32>
    %cst_23 = arith.constant dense<0.000000e+00> : vector<1x32xf32>
    %27 = tpu.matmul %26, %14, %cst_23 {dimension_numbers = #tpu.dot_dimension_numbers<[1], [0], [0], [1], [0, 0, 1, 1], [], []>} : vector<1x256xf32>, vector<256x32xf32>, vector<1x32xf32> -> vector<1x32xf32>
    %cst_24 = arith.constant 3.125000e-02 : f32
    %28 = vector.broadcast %cst_24 : f32 to vector<1x32xf32>
    %29 = arith.mulf %27, %28 : vector<1x32xf32>
    %cst_25 = arith.constant dense<0.000000e+00> : vector<1x256xf32>
    %30 = tpu.matmul %29, %15, %cst_25 {dimension_numbers = #tpu.dot_dimension_numbers<[1], [0], [0], [1], [0, 0, 1, 1], [], []>} : vector<1x32xf32>, vector<32x256xf32>, vector<1x256xf32> -> vector<1x256xf32>
    %cst_26 = arith.constant 9.99999974E-6 : f32
    %31 = vector.broadcast %cst_26 : f32 to vector<1x256xf32>
    %32 = arith.addf %30, %31 : vector<1x256xf32>
    %33 = math.rsqrt %32 : vector<1x256xf32>
    %34 = vector.broadcast %33 : vector<1x256xf32> to vector<4x256xf32>
    %35 = arith.mulf %23, %34 : vector<4x256xf32>
    %36 = vector.broadcast %12 : vector<1x256xf32> to vector<4x256xf32>
    %37 = arith.mulf %35, %36 : vector<4x256xf32>
    %38 = vector.broadcast %13 : vector<1x256xf32> to vector<4x256xf32>
    %39 = arith.addf %37, %38 : vector<4x256xf32>
    %cst_27 = arith.constant 0.000000e+00 : f32
    %40 = vector.broadcast %cst_27 : f32 to vector<4x256xf32>
    %41 = arith.maximumf %39, %40 : vector<4x256xf32>
    %cst_28 = arith.constant 0.000000e+00 : bf16
    %42 = vector.broadcast %cst_28 : bf16 to vector<1x256xbf16>
    %c0_29 = arith.constant 0 : index
    %c0_30 = arith.constant 0 : index
    %43 = vector.load %arg13[%c0_29, %c0_30] : memref<6x256xbf16, #tpu.memory_space<vmem>>, vector<1x256xbf16>
    tpu.vector_store %arg13[%c0_29, %c0_30], %42 {strides = array<i32>} : memref<6x256xbf16, #tpu.memory_space<vmem>>, vector<1x256xbf16>,
    %c5 = arith.constant 5 : index
    %c0_31 = arith.constant 0 : index
    %44 = vector.load %arg13[%c5, %c0_31] : memref<6x256xbf16, #tpu.memory_space<vmem>>, vector<1x256xbf16>
    tpu.vector_store %arg13[%c5, %c0_31], %42 {strides = array<i32>} : memref<6x256xbf16, #tpu.memory_space<vmem>>, vector<1x256xbf16>,
    %45 = arith.truncf %41 : vector<4x256xf32> to vector<4x256xbf16>
    %c1_32 = arith.constant 1 : index
    %c0_33 = arith.constant 0 : index
    %46 = vector.load %arg13[%c1_32, %c0_33] : memref<6x256xbf16, #tpu.memory_space<vmem>>, vector<4x256xbf16>
    tpu.vector_store %arg13[%c1_32, %c0_33], %45 {strides = array<i32>} : memref<6x256xbf16, #tpu.memory_space<vmem>>, vector<4x256xbf16>,
    %c0_34 = arith.constant 0 : index
    %c0_35 = arith.constant 0 : index
    %47 = vector.load %arg13[%c0_34, %c0_35] : memref<6x256xbf16, #tpu.memory_space<vmem>>, vector<4x256xbf16>
    %c1_36 = arith.constant 1 : index
    %c0_37 = arith.constant 0 : index
    %48 = vector.load %arg13[%c1_36, %c0_37] : memref<6x256xbf16, #tpu.memory_space<vmem>>, vector<4x256xbf16>
    %c2_38 = arith.constant 2 : index
    %c0_39 = arith.constant 0 : index
    %49 = vector.load %arg13[%c2_38, %c0_39] : memref<6x256xbf16, #tpu.memory_space<vmem>>, vector<4x256xbf16>
    %50 = tpu.concatenate %47, %48, %49 in 1 : vector<4x256xbf16>, vector<4x256xbf16>, vector<4x256xbf16> -> vector<4x768xbf16>
    %c0_40 = arith.constant 0 : index
    %c0_41 = arith.constant 0 : index
    %51 = vector.load %arg6[%c0_40, %c0_41] : memref<768x256xbf16, #tpu.memory_space<vmem>>, vector<768x256xbf16>
    %cst_42 = arith.constant dense<0.000000e+00> : vector<4x256xf32>
    %52 = tpu.matmul %50, %51, %cst_42 {dimension_numbers = #tpu.dot_dimension_numbers<[1], [0], [0], [1], [0, 0, 1, 1], [], []>} : vector<4x768xbf16>, vector<768x256xbf16>, vector<4x256xf32> -> vector<4x256xf32>
    %c0_43 = arith.constant 0 : index
    %c0_44 = arith.constant 0 : index
    %53 = vector.load %arg7[%c0_43, %c0_44] : memref<1x256xf32, #tpu.memory_space<vmem>>, vector<1x256xf32>
    %54 = vector.broadcast %53 : vector<1x256xf32> to vector<4x256xf32>
    %55 = arith.addf %52, %54 : vector<4x256xf32>
    %c0_45 = arith.constant 0 : index
    %c0_46 = arith.constant 0 : index
    %56 = vector.load %arg8[%c0_45, %c0_46] : memref<1x256xf32, #tpu.memory_space<vmem>>, vector<1x256xf32>
    %c0_47 = arith.constant 0 : index
    %c0_48 = arith.constant 0 : index
    %57 = vector.load %arg9[%c0_47, %c0_48] : memref<1x256xf32, #tpu.memory_space<vmem>>, vector<1x256xf32>
    %c0_49 = arith.constant 0 : index
    %c0_50 = arith.constant 0 : index
    %58 = vector.load %arg10[%c0_49, %c0_50] : memref<256x32xf32, #tpu.memory_space<vmem>>, vector<256x32xf32>
    %c0_51 = arith.constant 0 : index
    %c0_52 = arith.constant 0 : index
    %59 = vector.load %arg11[%c0_51, %c0_52] : memref<32x256xf32, #tpu.memory_space<vmem>>, vector<32x256xf32>
    %cst_53 = arith.constant dense<0.000000e+00> : vector<256xf32>
    %60 = vector.multi_reduction <add>, %55, %cst_53 [0] : vector<4x256xf32> to vector<256xf32>
    %61 = vector.shape_cast %60 : vector<256xf32> to vector<1x256xf32>
    %cst_54 = arith.constant dense<0.000000e+00> : vector<1x32xf32>
    %62 = tpu.matmul %61, %58, %cst_54 {dimension_numbers = #tpu.dot_dimension_numbers<[1], [0], [0], [1], [0, 0, 1, 1], [], []>} : vector<1x256xf32>, vector<256x32xf32>, vector<1x32xf32> -> vector<1x32xf32>
    %cst_55 = arith.constant 3.125000e-02 : f32
    %63 = vector.broadcast %cst_55 : f32 to vector<1x32xf32>
    %64 = arith.mulf %62, %63 : vector<1x32xf32>
    %cst_56 = arith.constant dense<0.000000e+00> : vector<1x256xf32>
    %65 = tpu.matmul %64, %59, %cst_56 {dimension_numbers = #tpu.dot_dimension_numbers<[1], [0], [0], [1], [0, 0, 1, 1], [], []>} : vector<1x32xf32>, vector<32x256xf32>, vector<1x256xf32> -> vector<1x256xf32>
    %66 = vector.broadcast %65 : vector<1x256xf32> to vector<4x256xf32>
    %67 = arith.subf %55, %66 : vector<4x256xf32>
    %68 = arith.mulf %67, %67 : vector<4x256xf32>
    %cst_57 = arith.constant dense<0.000000e+00> : vector<256xf32>
    %69 = vector.multi_reduction <add>, %68, %cst_57 [0] : vector<4x256xf32> to vector<256xf32>
    %70 = vector.shape_cast %69 : vector<256xf32> to vector<1x256xf32>
    %cst_58 = arith.constant dense<0.000000e+00> : vector<1x32xf32>
    %71 = tpu.matmul %70, %58, %cst_58 {dimension_numbers = #tpu.dot_dimension_numbers<[1], [0], [0], [1], [0, 0, 1, 1], [], []>} : vector<1x256xf32>, vector<256x32xf32>, vector<1x32xf32> -> vector<1x32xf32>
    %cst_59 = arith.constant 3.125000e-02 : f32
    %72 = vector.broadcast %cst_59 : f32 to vector<1x32xf32>
    %73 = arith.mulf %71, %72 : vector<1x32xf32>
    %cst_60 = arith.constant dense<0.000000e+00> : vector<1x256xf32>
    %74 = tpu.matmul %73, %59, %cst_60 {dimension_numbers = #tpu.dot_dimension_numbers<[1], [0], [0], [1], [0, 0, 1, 1], [], []>} : vector<1x32xf32>, vector<32x256xf32>, vector<1x256xf32> -> vector<1x256xf32>
    %cst_61 = arith.constant 9.99999974E-6 : f32
    %75 = vector.broadcast %cst_61 : f32 to vector<1x256xf32>
    %76 = arith.addf %74, %75 : vector<1x256xf32>
    %77 = math.rsqrt %76 : vector<1x256xf32>
    %78 = vector.broadcast %77 : vector<1x256xf32> to vector<4x256xf32>
    %79 = arith.mulf %67, %78 : vector<4x256xf32>
    %80 = vector.broadcast %56 : vector<1x256xf32> to vector<4x256xf32>
    %81 = arith.mulf %79, %80 : vector<4x256xf32>
    %82 = vector.broadcast %57 : vector<1x256xf32> to vector<4x256xf32>
    %83 = arith.addf %81, %82 : vector<4x256xf32>
    %c0_62 = arith.constant 0 : index
    %c1_63 = arith.constant 1 : index
    %c0_64 = arith.constant 0 : index
    %84 = vector.load %arg1[%c0_62, %c1_63, %c0_64] : memref<1x6x256xbf16, #tpu.memory_space<vmem>>, vector<1x4x256xbf16>
    %85 = vector.shape_cast %84 : vector<1x4x256xbf16> to vector<4x256xbf16>
    %86 = arith.extf %85 : vector<4x256xbf16> to vector<4x256xf32>
    %87 = arith.addf %83, %86 : vector<4x256xf32>
    %cst_65 = arith.constant 0.000000e+00 : f32
    %88 = vector.broadcast %cst_65 : f32 to vector<4x256xf32>
    %89 = arith.maximumf %87, %88 : vector<4x256xf32>
    %cst_66 = arith.constant 0.000000e+00 : bf16
    %90 = vector.broadcast %cst_66 : bf16 to vector<1x256xbf16>
    %c0_67 = arith.constant 0 : index
    %c0_68 = arith.constant 0 : index
    %c0_69 = arith.constant 0 : index
    %91 = vector.load %arg12[%c0_67, %c0_68, %c0_69] : memref<1x6x256xbf16, #tpu.memory_space<vmem>>, vector<1x1x256xbf16>
    %92 = vector.shape_cast %91 : vector<1x1x256xbf16> to vector<1x256xbf16>
    %93 = vector.shape_cast %90 : vector<1x256xbf16> to vector<1x1x256xbf16>
    tpu.vector_store %arg12[%c0_67, %c0_68, %c0_69], %93 {strides = array<i32>} : memref<1x6x256xbf16, #tpu.memory_space<vmem>>, vector<1x1x256xbf16>,
    %c0_70 = arith.constant 0 : index
    %c5_71 = arith.constant 5 : index
    %c0_72 = arith.constant 0 : index
    %94 = vector.load %arg12[%c0_70, %c5_71, %c0_72] : memref<1x6x256xbf16, #tpu.memory_space<vmem>>, vector<1x1x256xbf16>
    %95 = vector.shape_cast %94 : vector<1x1x256xbf16> to vector<1x256xbf16>
    %96 = vector.shape_cast %90 : vector<1x256xbf16> to vector<1x1x256xbf16>
    tpu.vector_store %arg12[%c0_70, %c5_71, %c0_72], %96 {strides = array<i32>} : memref<1x6x256xbf16, #tpu.memory_space<vmem>>, vector<1x1x256xbf16>,
    %97 = arith.truncf %89 : vector<4x256xf32> to vector<4x256xbf16>
    %c0_73 = arith.constant 0 : index
    %c1_74 = arith.constant 1 : index
    %c0_75 = arith.constant 0 : index
    %98 = vector.load %arg12[%c0_73, %c1_74, %c0_75] : memref<1x6x256xbf16, #tpu.memory_space<vmem>>, vector<1x4x256xbf16>
    %99 = vector.shape_cast %98 : vector<1x4x256xbf16> to vector<4x256xbf16>
    %100 = vector.shape_cast %97 : vector<4x256xbf16> to vector<1x4x256xbf16>
    tpu.vector_store %arg12[%c0_73, %c1_74, %c0_75], %100 {strides = array<i32>} : memref<1x6x256xbf16, #tpu.memory_space<vmem>>, vector<1x4x256xbf16>,
    return
  }
  func.func @transform_0(%arg0: i32) -> (i32, i32, i32) {
    %c0_i32 = arith.constant 0 : i32
    %c0_i32_0 = arith.constant 0 : i32
    %c0_i32_1 = arith.constant 0 : i32
    return %arg0, %c0_i32, %c0_i32_0 : i32, i32, i32
  }
  func.func @transform_1(%arg0: i32) -> (i32, i32) {
    %c0_i32 = arith.constant 0 : i32
    %c0_i32_0 = arith.constant 0 : i32
    %c0_i32_1 = arith.constant 0 : i32
    return %c0_i32, %c0_i32_0 : i32, i32
  }
  func.func @transform_2(%arg0: i32) -> (i32, i32) {
    %c0_i32 = arith.constant 0 : i32
    %c0_i32_0 = arith.constant 0 : i32
    %c0_i32_1 = arith.constant 0 : i32
    return %c0_i32, %c0_i32_0 : i32, i32
  }
  func.func @transform_3(%arg0: i32) -> (i32, i32) {
    %c0_i32 = arith.constant 0 : i32
    %c0_i32_0 = arith.constant 0 : i32
    %c0_i32_1 = arith.constant 0 : i32
    return %c0_i32, %c0_i32_0 : i32, i32
  }
  func.func @transform_4(%arg0: i32) -> (i32, i32) {
    %c0_i32 = arith.constant 0 : i32
    %c0_i32_0 = arith.constant 0 : i32
    %c0_i32_1 = arith.constant 0 : i32
    return %c0_i32, %c0_i32_0 : i32, i32
  }
  func.func @transform_5(%arg0: i32) -> (i32, i32) {
    %c0_i32 = arith.constant 0 : i32
    %c0_i32_0 = arith.constant 0 : i32
    %c0_i32_1 = arith.constant 0 : i32
    return %c0_i32, %c0_i32_0 : i32, i32
  }
  func.func @transform_6(%arg0: i32) -> (i32, i32) {
    %c0_i32 = arith.constant 0 : i32
    %c0_i32_0 = arith.constant 0 : i32
    %c0_i32_1 = arith.constant 0 : i32
    return %c0_i32, %c0_i32_0 : i32, i32
  }
  func.func @transform_7(%arg0: i32) -> (i32, i32) {
    %c0_i32 = arith.constant 0 : i32
    %c0_i32_0 = arith.constant 0 : i32
    %c0_i32_1 = arith.constant 0 : i32
    return %c0_i32, %c0_i32_0 : i32, i32
  }
  func.func @transform_8(%arg0: i32) -> (i32, i32) {
    %c0_i32 = arith.constant 0 : i32
    %c0_i32_0 = arith.constant 0 : i32
    %c0_i32_1 = arith.constant 0 : i32
    return %c0_i32, %c0_i32_0 : i32, i32
  }
  func.func @transform_9(%arg0: i32) -> (i32, i32) {
    %c0_i32 = arith.constant 0 : i32
    %c0_i32_0 = arith.constant 0 : i32
    %c0_i32_1 = arith.constant 0 : i32
    return %c0_i32, %c0_i32_0 : i32, i32
  }
  func.func @transform_10(%arg0: i32) -> (i32, i32) {
    %c0_i32 = arith.constant 0 : i32
    %c0_i32_0 = arith.constant 0 : i32
    %c0_i32_1 = arith.constant 0 : i32
    return %c0_i32, %c0_i32_0 : i32, i32
  }
  func.func @transform_11(%arg0: i32) -> (i32, i32, i32) {
    %c0_i32 = arith.constant 0 : i32
    %c0_i32_0 = arith.constant 0 : i32
    %c0_i32_1 = arith.constant 0 : i32
    return %arg0, %c0_i32, %c0_i32_0 : i32, i32, i32
  }
}

</mosaic_0001>

<bundles_post_ra>
// kernel: mel_encoder_forward.12
= control target key start
LH: loop header
LB: loop body
LE: loop exit
PB: predicated region body
PF: predicated region fallthrough
CT: control target
= control target key end

     0   :  { %s1258_s24 = smov 0   ;;  %s1467_s0 = inlined_call_operand.vmem [shape: bf16[2,9,128], index: 0, kind: input, shape index: {}]   ;;  %s1468_s1 = inlined_call_operand.vmem [shape: bf16[192,128], index: 1, kind: input, shape index: {}]   ;;  %s1469_s2 = inlined_call_operand.vmem [shape: f32[1,128], index: 2, kind: input, shape index: {}]   ;;  %s1470_s3 = inlined_call_operand.vmem [shape: f32[1,128], index: 3, kind: input, shape index: {}]   ;;  %s1471_s4 = inlined_call_operand.vmem [shape: f32[1,128], index: 4, kind: input, shape index: {}]   ;;  %s1472_s5 = inlined_call_operand.vmem [shape: f32[128,16], index: 5, kind: input, shape index: {}]   ;;  %s1473_s6 = inlined_call_operand.vmem [shape: f32[16,128], index: 6, kind: input, shape index: {}]   ;;  %s1474_s7 = inlined_call_operand.vmem [shape: bf16[2,10,128], index: 7, kind: output, shape index: {}]  }
   0x1 LB: > { %s968_s25 = sadd.s32 4294967295, %s1213_s24   ;;  %p972_p0 = scmp.ge.s32.totalorder %s1213_s24, 1  ;;  %s1213_s24 = sphi %s1258_s24, %s17_s24  }
   0x2   : > { %p237_p1 = scmp.lt.s32.totalorder %s1213_s24, 3 }
   0x4   : > { %p238_p2 = pnand %p972_p0, %p237_p1 }
   0x5   : > { %p269_p3 = scmp.lt.s32.totalorder (!%p238_p2), %s968_s25, 1  ;;  %s1217_s20 = smov (!%p238_p2), 64  }
   0x6   : > { %241 = sbr.rel (%p238_p2) target bundleno = 1188 (0x4a4), region = 48 }
   0xb   : > { %vm880_vm0 = vcmask 1040384   ;;  %vm881_vm1 = vsmask.f32 256  ;;  %vm886_vm2 = vsmask.f32 7938  ;;  %v1193_v0 = vld [vmem:[%s1468_s1 + $0x38] sm:$0xff]  }
   0xc   : > { %s1480_s25 = smov (!%p269_p3, %s968_s25), 1  ;;  %vm1269_vm3 = vmand %vm880_vm0, %vm881_vm1  ;;  %v1215_v2 = vmov 0.0   ;;  %v1194_v4 = vld [vmem:[%s1468_s1 + $0x18] sm:$0xff]   ;;  %vm1216_vm5 = vmmov 0   ;;  %v1195_v5 = vld [vmem:[%s1468_s1 + $0x30] sm:$0xff]   ;;  %vm327_vm6 = vcmask 523264  }
   0xd   : > { %1060 = vmatprep.subr.bf16.mxu0 %v1215_v2  ;;  %1072 = vmatprep.subr.bf16.mxu1 %v1215_v2  ;;  %vm1276_vm4 = vmand %vm880_vm0, %vm886_vm2  ;;  %s1002_s30 = sshll.u32 %s1480_s25, 3  ;;  %v1196_v6 = vld [vmem:[%s1468_s1 + $0x10] sm:$0xff]   ;;  %v1197_v14 = vld [vmem:[%s1468_s1 + $0x28] sm:$0xff]   ;;  %vm629_vm7 = vcmask 130048   ;;  %vm905_vm8 = vcmask 1043456  }
   0xe   : > { %1061 = vmatpush3.bf16.msra.mxu0 %v1193_v0  ;;  %1068 = vmatprep.mubr.msk.bf16.mxu0 %vm1216_vm5, %v1215_v2  ;;  %s273_s12 = scalar_lea.vmem %s1467_s0, %s1002_s30  ;;  %s1297_s15 = scalar_lea.vmem %s1474_s7, %s1002_s30  ;;  %v1198_v16 = vld [vmem:[%s1468_s1 + $0x8] sm:$0xff]   ;;  %v1199_v17 = vld [vmem:[%s1468_s1 + $0x20] sm:$0xff]   ;;  %v1201_v19 = vld [vmem:[%s1468_s1 + $0x58] sm:$0xff]  }
   0xf   : > { %1062 = vmatprep.subr.bf16.mxu0 %v1215_v2  ;;  %1080 = vmatprep.mubr.msk.bf16.mxu1 %vm1216_vm5, %v1215_v2  ;;  %v280_v7 = vld [vmem:[%s273_s12] sm:$0xf]  ;;  %v281_v8 = vld [vmem:[%s273_s12 + $0x4] sm:$0x1]  ;;  %v1202_v21 = vld [vmem:[%s1468_s1 + $0x50] sm:$0xff]  }
  0x10   : > { %1073 = vmatpush3.bf16.msra.mxu1 %v1194_v4  ;;  %v883_v9 = vld [vmem:[%s1297_s15] sm:$0x1]  ;;  %v977_v10 = vcombine.low %v280_v7, %v280_v7  ;;  %v988_v11 = vcombine.low %v280_v7, %v281_v8  ;;  %v888_v13 = vld [vmem:[%s1297_s15 + $0x4] sm:$0x1]  ;;  %v1203_v23 = vld [vmem:[%s1468_s1 + $0x48] sm:$0xff]  }
  0x11   : > { %1074 = vmatprep.subr.bf16.mxu1 %v1215_v2  ;;  %v884_v12 = vsel %vm1269_vm3, 0, %v883_v9  ;;  %v889_v15 = vsel %vm1276_vm4, 0, %v888_v13  ;;  %v1200_v18 = vld [vmem:[%s1468_s1] sm:$0xff]   ;;  %v549_v28 = vld [vmem:[%s1472_s5 + $0x78] sm:$0xff]  ;;  %v548_v29 = vld [vmem:[%s1472_s5 + $0x70] sm:$0xff]  ;;  %v703_v9 = vlaneseq }
  0x12   : > { %1063 = vmatpush3.bf16.msra.mxu0 %v1195_v5  ;;  %885 = vst [vmem:[%s1297_s15] sm:$0x1] %v884_v12  ;;  %301 = vrot.lane.b32.xlu0 %v977_v10, %s1217_s20  ;;  %890 = vst [vmem:[%s1297_s15 + $0x4] sm:$0x1] %v889_v15  ;;  %v452_v22 = vshll.u32 %v988_v11, 16  ;;  %v450_v24 = vshrl.u32 %v988_v11, 16  ;;  %v1204_v26 = vld [vmem:[%s1468_s1 + $0x40] sm:$0xff]  }
  0x13   : > { %1064 = vmatprep.subr.bf16.mxu0 %v1215_v2  ;;  %v547_v30 = vld [vmem:[%s1472_s5 + $0x68] sm:$0xff]  ;;  %v546_v31 = vld [vmem:[%s1472_s5 + $0x60] sm:$0xff]  ;;  %v545_v32 = vld [vmem:[%s1472_s5 + $0x58] sm:$0xff]  ;;  %v704_v10 = vshrl.u32 %v703_v9, 7 }
  0x14   : > { %1075 = vmatpush3.bf16.msra.mxu1 %v1196_v6  ;;  %v454_v25 = vrot.slane %v452_v22, 1  ;;  %v544_v33 = vld [vmem:[%s1472_s5 + $0x50] sm:$0xff]  ;;  %v543_v34 = vld [vmem:[%s1472_s5 + $0x48] sm:$0xff]  ;;  %v542_v35 = vld [vmem:[%s1472_s5 + $0x40] sm:$0xff] }
  0x15   : > { %1076 = vmatprep.subr.bf16.mxu1 %v1215_v2  ;;  %v541_v36 = vld [vmem:[%s1472_s5 + $0x38] sm:$0xff]  ;;  %v540_v37 = vld [vmem:[%s1472_s5 + $0x30] sm:$0xff]  ;;  %v539_v38 = vld [vmem:[%s1472_s5 + $0x28] sm:$0xff]  ;;  %v705_v11 = vsub.s32 0, %v704_v10 }
  0x16   : > { %1065 = vmatpush3.bf16.msra.mxu0 %v1197_v14  ;;  %v455_v27 = vor.u32 %v454_v25, %v450_v24  ;;  %v538_v39 = vld [vmem:[%s1472_s5 + $0x20] sm:$0xff]  ;;  %v537_v41 = vld [vmem:[%s1472_s5 + $0x18] sm:$0xff]  ;;  %v536_v43 = vld [vmem:[%s1472_s5 + $0x10] sm:$0xff] }
  0x17   : > { %1066 = vmatprep.subr.bf16.mxu0 %v1215_v2  ;;  %v535_v44 = vld [vmem:[%s1472_s5 + $0x8] sm:$0xff]  ;;  %v534_v46 = vld [vmem:[%s1472_s5] sm:$0xff]  ;;  %vm906_vm9 = vmand %vm905_vm8, %vm886_vm2 }
  0x18   : > { %1077 = vmatpush3.bf16.msra.mxu1 %v1198_v16  ;;  %v994_v54 = vld [vmem:[%s1469_s2] ss:$0 sm:$0xff]  ;;  %v551_v4 = vld [vmem:[%s1473_s6 + $0x8] sm:$0xff] }
  0x19   : > { %1078 = vmatprep.subr.bf16.mxu1 %v1215_v2  ;;  %v550_v5 = vld [vmem:[%s1473_s6] sm:$0xff] }
  0x1a   : > { %1067 = vmatpush3.bf16.msra.mxu0 %v1199_v17 }
  0x1b   : > { %1084 = vmatprep.subr.bf16.mxu0 %v1215_v2 }
  0x1c   : > { %1079 = vmatpush3.bf16.msra.mxu1 %v1200_v18 }
  0x1d   : > { %1096 = vmatprep.subr.mxu1 %v1215_v2 }
  0x1f   : > { %1081 = vmatmul.mubr.msk.bf16.vlgmr.msra.gmra.mxu1 %vm327_vm6, %v280_v7 }
  0x20   : > { %1128 = vmatprep.mubr.msk.f32.mxu1 %vm1216_vm5, %v1215_v2  ;;  %1097 = vmatpush3.msra.mxu1 %v549_v28 }
  0x21   : > { %1098 = vmatprep.subr.mxu1 %v1215_v2 }
  0x22   : > { %1099 = vmatpush3.msra.mxu1 %v548_v29 }
  0x23   : > { %1100 = vmatprep.subr.mxu1 %v1215_v2 }
  0x24   : > { %1101 = vmatpush3.msra.mxu1 %v547_v30 }
  0x25   : > { %1102 = vmatprep.subr.mxu1 %v1215_v2 }
  0x26   : > { %1103 = vmatpush3.msra.mxu1 %v546_v31 }
  0x27   : > { %1104 = vmatprep.subr.mxu1 %v1215_v2 }
  0x28   : > { %1105 = vmatpush3.msra.mxu1 %v545_v32 }
  0x29   : > { %1106 = vmatprep.subr.mxu1 %v1215_v2 }
  0x2a   : > { %1107 = vmatpush3.msra.mxu1 %v544_v33 }
  0x2b   : > { %1108 = vmatprep.subr.mxu1 %v1215_v2 }
  0x2c   : > { %1109 = vmatpush3.msra.mxu1 %v543_v34 }
  0x2d   : > { %1110 = vmatprep.subr.mxu1 %v1215_v2 }
  0x2e   : > { %1111 = vmatpush3.msra.mxu1 %v542_v35 }
  0x2f   : > { %1112 = vmatprep.subr.mxu1 %v1215_v2 }
  0x30   : > { %1113 = vmatpush3.msra.mxu1 %v541_v36 }
  0x31   : > { %1114 = vmatprep.subr.mxu1 %v1215_v2 }
  0x32   : > { %1115 = vmatpush3.msra.mxu1 %v540_v37 }
  0x33   : > { %1116 = vmatprep.subr.mxu1 %v1215_v2 }
  0x34   : > { %1117 = vmatpush3.msra.mxu1 %v539_v38 }
  0x35   : > { %1118 = vmatprep.subr.mxu1 %v1215_v2 }
  0x36   : > { %1119 = vmatpush3.msra.mxu1 %v538_v39 }
  0x37   : > { %1120 = vmatprep.subr.mxu1 %v1215_v2 }
  0x38   : > { %1121 = vmatpush3.msra.mxu1 %v537_v41 }
  0x39   : > { %1122 = vmatprep.subr.mxu1 %v1215_v2 }
  0x3a   : > { %1123 = vmatpush3.msra.mxu1 %v536_v43 }
  0x3b   : > { %1124 = vmatprep.subr.mxu1 %v1215_v2 }
  0x3c   : > { %1125 = vmatpush3.msra.mxu1 %v535_v44 }
  0x3d   : > { %1126 = vmatprep.subr.mxu1 %v1215_v2 }
  0x3e   : > { %1127 = vmatpush3.msra.mxu1 %v534_v46 }
  0x3f   : > { %1131 = vmatprep.subr.mxu1 %v1215_v2 }
  0x84   : > { %v302_v20 = vpop.permute.xlu0 %301 }
  0x85   : > { %1069 = vmatmul.mubr.msk.bf16.vlgmr.msra.gmra.mxu0 %vm327_vm6, %v302_v20 }
  0x86   : > { %1085 = vmatpush3.bf16.msra.mxu0 %v1201_v19  ;;  %1092 = vmatprep.mubr.msk.bf16.mxu0 %vm1216_vm5, %v1215_v2 }
  0x87   : > { %1086 = vmatprep.subr.bf16.mxu0 %v1215_v2 }
  0x8a   : > { %1087 = vmatpush3.bf16.msra.mxu0 %v1202_v21 }
  0x8b   : > { %1088 = vmatprep.subr.bf16.mxu0 %v1215_v2 }
  0x8e   : > { %1089 = vmatpush3.bf16.msra.mxu0 %v1203_v23 }
  0x8f   : > { %1090 = vmatprep.subr.bf16.mxu0 %v1215_v2 }
  0x92   : > { %1091 = vmatpush3.bf16.msra.mxu0 %v1204_v26 }
  0x93   : > { %1138 = vmatprep.subr.mxu0 %v1215_v2 }
  0x95   : > { %1093 = vmatmul.mubr.msk.bf16.vlgmr.msra.gmra.mxu0 %vm327_vm6, %v455_v27 }
  0x96   : > { %1170 = vmatprep.mubr.msk.f32.mxu0 %vm1216_vm5, %v1215_v2  ;;  %1139 = vmatpush3.msra.mxu0 %v549_v28 }
  0x97   : > { %1140 = vmatprep.subr.mxu0 %v1215_v2 }
  0x98   : > { %1141 = vmatpush3.msra.mxu0 %v548_v29 }
  0x99   : > { %1142 = vmatprep.subr.mxu0 %v1215_v2 }
  0x9a   : > { %1143 = vmatpush3.msra.mxu0 %v547_v30  ;;  %v997_v30 = vld [vmem:[%s1470_s3] ss:$0 sm:$0xff] }
  0x9b   : > { %1144 = vmatprep.subr.mxu0 %v1215_v2 }
  0x9c   : > { %1145 = vmatpush3.msra.mxu0 %v546_v31 }
  0x9d   : > { %1146 = vmatprep.subr.mxu0 %v1215_v2 }
  0x9e   : > { %1147 = vmatpush3.msra.mxu0 %v545_v32  ;;  %v998_v32 = vld [vmem:[%s1471_s4] ss:$0 sm:$0xff] }
  0x9f   : > { %1148 = vmatprep.subr.mxu0 %v1215_v2 }
  0xa0   : > { %1149 = vmatpush3.msra.mxu0 %v544_v33 }
  0xa1   : > { %1150 = vmatprep.subr.mxu0 %v1215_v2 }
  0xa2   : > { %1151 = vmatpush3.msra.mxu0 %v543_v34 }
  0xa3   : > { %1152 = vmatprep.subr.mxu0 %v1215_v2 }
  0xa4   : > { %1153 = vmatpush3.msra.mxu0 %v542_v35 }
  0xa5   : > { %1154 = vmatprep.subr.mxu0 %v1215_v2 }
  0xa6   : > { %1155 = vmatpush3.msra.mxu0 %v541_v36 }
  0xa7   : > { %1156 = vmatprep.subr.mxu0 %v1215_v2 }
  0xa8   : > { %1157 = vmatpush3.msra.mxu0 %v540_v37 }
  0xa9   : > { %1158 = vmatprep.subr.mxu0 %v1215_v2 }
  0xaa   : > { %1159 = vmatpush3.msra.mxu0 %v539_v38 }
  0xab   : > { %1160 = vmatprep.subr.mxu0 %v1215_v2 }
  0xac   : > { %1161 = vmatpush3.msra.mxu0 %v538_v39 }
  0xad   : > { %1162 = vmatprep.subr.mxu0 %v1215_v2 }
  0xae   : > { %1163 = vmatpush3.msra.mxu0 %v537_v41  ;;  %v910_v41 = vld [vmem:[%s1297_s15 + $0x4] sm:$0x1] }
  0xaf   : > { %1164 = vmatprep.subr.mxu0 %v1215_v2 }
  0xb0   : > { %1165 = vmatpush3.msra.mxu0 %v536_v43 }
  0xb1   : > { %1166 = vmatprep.subr.mxu0 %v1215_v2 }
  0xb2   : > { %1167 = vmatpush3.msra.mxu0 %v535_v44 }
  0xb3   : > { %1168 = vmatprep.subr.mxu0 %v1215_v2 }
  0xb4   : > { %1169 = vmatpush3.msra.mxu0 %v534_v46 }
  0xdf   : > { %v432_v40 = vpop.f32.mrf.mxu1 }
  0xe1   : > { %v1082_v42 = vpop.f32.mrf.mxu1 }
  0xe3   : > { %v435_v45 = vpop.f32.mrf.mxu1 }
  0xe5   : > { %v1083_v47 = vpop.f32.mrf.mxu1 }
 0x145   : > { %v365_v48 = vpop.f32.mrf.mxu0 }
 0x146   : > { %v433_v52 = vadd.f32 %v432_v40, %v365_v48  ;;  %v907_v40 = vld [vmem:[%s1297_s15] sm:$0xf] }
 0x147   : > { %v1070_v49 = vpop.f32.mrf.mxu0 }
 0x149   : > { %v368_v50 = vpop.f32.mrf.mxu0 }
 0x14b   : > { %v1071_v51 = vpop.f32.mrf.mxu0 }
 0x155   : > { %v517_v53 = vpop.f32.mrf.mxu0 }
 0x156   : > { %v523_v55 = vadd.f32 %v517_v53, %v433_v52 }
 0x157   : > { %v1094_v56 = vpop.f32.mrf.mxu0 }
 0x158   : > { %v531_v57 = vadd.f32 %v994_v54, %v523_v55 }
 0x159   : > { %v520_v58 = vpop.f32.mrf.mxu0 }
 0x15a   : > { %v552_v59 = vrot.slane %v531_v57, 4 }
 0x15b   : > { %v1095_v60 = vpop.f32.mrf.mxu0 }
 0x15c   : > { %v553_v61 = vadd.f32 %v552_v59, %v531_v57 }
 0x15e   : > { %v554_v62 = vrot.slane %v553_v61, 2 }
 0x160   : > { %v555_v63 = vadd.f32 %v554_v62, %v553_v61 }
 0x162   : > { %v556_v0 = vrot.slane %v555_v63, 1 }
 0x164   : > { %v557_v3 = vadd.f32 %v556_v0, %v555_v63 }
 0x166   : > { %1129 = vmatmul.mubr.f32.vlgmr.msra.gmra.mxu1 %v557_v3 }
 0x167   : > { %1132 = vmatpush3.msra.mxu1 %v551_v4  ;;  %1135 = vmatprep.mubr.msk.f32.mxu1 %vm1216_vm5, %v1215_v2 }
 0x168   : > { %1133 = vmatprep.subr.mxu1 %v1215_v2 }
 0x169   : > { %1134 = vmatpush3.msra.mxu1 %v550_v5 }
 0x16a   : > { %1173 = vmatprep.subr.mxu1 %v1215_v2 }
 0x226   : > { %v624_v6 = vpop.f32.mrf.mxu1 }
 0x227   : > { %v628_v7 = vmul.f32 0.015625, %v624_v6 }
 0x228   : > { %v1130_v8 = vpop.f32.mrf.mxu1 }
 0x229   : > { %1136 = vmatmul.mubr.msk.f32.vlgmr.msra.gmra.mxu1 %vm629_vm7, %v628_v7 }
 0x22a   : > { %1174 = vmatpush3.msra.mxu1 %v551_v4  ;;  %1177 = vmatprep.mubr.msk.f32.mxu1 %vm1216_vm5, %v1215_v2 }
 0x22b   : > { %1175 = vmatprep.subr.mxu1 %v1215_v2 }
 0x22c   : > { %1176 = vmatpush3.msra.mxu1 %v550_v5 }
 0x2e9   : > { %v699_v12 = vpop.f32.mrf.mxu1 }
 0x2ea   : > { %v706_v13 = vrot.slane %v699_v12, %v705_v11 }
 0x2eb   : > { %v1137_v14 = vpop.f32.mrf.mxu1 }
 0x2ec   : > { %v707_v15 = vsub.f32 %v531_v57, %v706_v13 }
 0x2ee   : > { %v708_v16 = vmul.f32 %v707_v15, %v707_v15 }
 0x2f0   : > { %v709_v17 = vrot.slane %v708_v16, 4 }
 0x2f2   : > { %v710_v18 = vadd.f32 %v709_v17, %v708_v16 }
 0x2f4   : > { %v711_v19 = vrot.slane %v710_v18, 2 }
 0x2f6   : > { %v712_v20 = vadd.f32 %v711_v19, %v710_v18 }
 0x2f8   : > { %v713_v21 = vrot.slane %v712_v20, 1 }
 0x2fa   : > { %v714_v22 = vadd.f32 %v713_v21, %v712_v20 }
 0x2fc   : > { %1171 = vmatmul.mubr.f32.vlgmr.msra.gmra.mxu0 %v714_v22 }
 0x3bc   : > { %v781_v23 = vpop.f32.mrf.mxu0 }
 0x3bd   : > { %v785_v24 = vmul.f32 0.015625, %v781_v23 }
 0x3be   : > { %v1172_v25 = vpop.f32.mrf.mxu0 }
 0x3bf   : > { %1178 = vmatmul.mubr.msk.f32.vlgmr.msra.gmra.mxu1 %vm629_vm7, %v785_v24 }
 0x47f   : > { %v855_v2 = vpop.f32.mrf.mxu1 }
 0x480   : > { %v856_v26 = vadd.f32 1e-05, %v855_v2 }
 0x481   : > { %v1179_v27 = vpop.f32.mrf.mxu1 }
 0x482   : > { %1205 = vrsqrt.f32 %v856_v26 }
 0x48f   : > { %v1206_v28 = vpop.eup %1205 }
 0x490   : > { %v863_v29 = vrot.slane %v1206_v28, %v705_v11 }
 0x492   : > { %v864_v31 = vmul.f32 %v863_v29, %v707_v15 }
 0x494   : > { %v871_v33 = vmul.f32 %v997_v30, %v864_v31 }
 0x496   : > { %v878_v34 = vadd.f32 %v998_v32, %v871_v33 }
 0x498   : > { %v879_v35 = vmax.f32 %v878_v34, 0.0 }
 0x49a   : > { %v1004_v36 = vpack.c.bf16 %v879_v35, %v879_v35 }
 0x49c   : > { %v896_v37 = vshrl.u32 %v1004_v36, 16  ;;  %v899_v39 = vshll.u32 %v1004_v36, 16 }
 0x49e   : > { %v898_v38 = vrot.slane %v896_v37, 7 }
 0x4a0   : > { %v901_v42 = vor.u32 %v899_v39, %v898_v38  ;;  %v902_v43 = vrot.slane %v898_v38, 4 }
 0x4a2   : > { %v908_v44 = vsel %vm906_vm9, %v901_v42, %v907_v40  ;;  %v911_v45 = vsel %vm1269_vm3, %v902_v43, %v910_v41 }
 0x4a3   : > { %909 = vst [vmem:[%s1297_s15] sm:$0xf] %v908_v44  ;;  %912 = vst [vmem:[%s1297_s15 + $0x4] sm:$0x1] %v911_v45 }
 0x4a4 PF: > { %s17_s24 = sadd.s32 1, %s1213_s24  }
 0x4a5   : > { %p14_p4 = scmp.ge.s32.totalorder %s17_s24, 4  }
 0x4a7   :  { %16 = sbr.rel (!%p14_p4) target bundleno = 1 (0x1), region = 78 }

// kernel: mel_encoder_forward.9
= control target key start
LH: loop header
LB: loop body
LE: loop exit
PB: predicated region body
PF: predicated region fallthrough
CT: control target
= control target key end

     0   :  { %s725_s12 = smov 0   ;;  %s852_s0 = inlined_call_operand.vmem [shape: bf16[2,18,80], index: 0, kind: input, shape index: {}]   ;;  %s853_s1 = inlined_call_operand.vmem [shape: bf16[240,64], index: 1, kind: input, shape index: {}]   ;;  %s854_s2 = inlined_call_operand.vmem [shape: f32[1,64], index: 2, kind: input, shape index: {}]   ;;  %s855_s3 = inlined_call_operand.vmem [shape: bf16[2,18,64], index: 3, kind: output, shape index: {}]  }
   0x1 LB: > { %s571_s13 = sadd.s32 4294967295, %s701_s12   ;;  %p575_p0 = scmp.ge.s32.totalorder %s701_s12, 1  ;;  %s701_s12 = sphi %s725_s12, %s13_s12  }
   0x2   : > { %p137_p1 = scmp.lt.s32.totalorder %s701_s12, 3 }
   0x4   : > { %p138_p2 = pnand %p575_p0, %p137_p1 }
   0x5   : > { %p161_p3 = scmp.lt.s32.totalorder (!%p138_p2), %s571_s13, 1 }
   0x6   : > { %141 = sbr.rel (%p138_p2) target bundleno = 263 (0x107), region = 32 }
   0xb   : > { %v677_v0 = vld [vmem:[%s853_s1 + $0x48] sm:$0xff]   ;;  %v703_v1 = vmov 0.0   ;;  %v678_v2 = vld [vmem:[%s853_s1 + $0x20] sm:$0xff]   ;;  %vm704_vm0 = vmmov 0   ;;  %v680_v4 = vld [vmem:[%s853_s1 + $0x18] sm:$0xff]   ;;  %s859_s13 = smov (!%p161_p3, %s571_s13), 1 }
   0xc   : > { %624 = vmatprep.subr.bf16.mxu0 %v703_v1  ;;  %638 = vmatprep.subr.bf16.mxu1 %v703_v1  ;;  %v679_v3 = vld [vmem:[%s853_s1 + $0x40] sm:$0xff]   ;;  %v681_v5 = vld [vmem:[%s853_s1 + $0x38] sm:$0xff]   ;;  %s666_s24 = smul.u32 12, %s859_s13  ;;  %v682_v6 = vld [vmem:[%s853_s1 + $0x10] sm:$0xff]   ;;  %vm203_vm1 = vsmask.f32 7424 }
   0xd   : > { %625 = vmatpush3.bf16.msra.mxu0 %v677_v0  ;;  %634 = vmatprep.mubr.msk.bf16.mxu0 %vm704_vm0, %v703_v1  ;;  %v683_v7 = vld [vmem:[%s853_s1 + $0x30] sm:$0xff]   ;;  %v684_v10 = vld [vmem:[%s853_s1 + $0x8] sm:$0xff]   ;;  %v686_v17 = vld [vmem:[%s853_s1] sm:$0xff]   ;;  %vm246_vm2 = vcmask 654336   ;;  %vm378_vm3 = vcmask 1046528   ;;  %vm467_vm4 = vcmask 516096  }
   0xe   : > { %639 = vmatpush3.bf16.msra.mxu1 %v678_v2  ;;  %626 = vmatprep.subr.bf16.mxu0 %v703_v1  ;;  %s769_s29 = scalar_lea.vmem %s852_s0, %s666_s24  ;;  %v685_v13 = vld [vmem:[%s853_s1 + $0x28] sm:$0xff]   ;;  %v689_v21 = vld [vmem:[%s853_s1 + $0x70] sm:$0xff]   ;;  %v691_v24 = vld [vmem:[%s853_s1 + $0x60] sm:$0xff]   ;;  %s821_s26 = scalar_lea.vmem %s855_s3, %s666_s24  ;;  %vm468_vm5 = vsmask.f32 256  ;;  %vm506_vm9 = vcmask 519168  }
   0xf   : > { %640 = vmatprep.subr.bf16.mxu1 %v703_v1  ;;  %648 = vmatprep.mubr.msk.bf16.mxu1 %vm704_vm0, %v703_v1  ;;  %v172_v8 = vld [vmem:[%s769_s29] sm:$0xf]  ;;  %v173_v9 = vld [vmem:[%s769_s29 + $0x4] sm:$0xf]  ;;  %v690_v23 = vld [vmem:[%s853_s1 + $0x68] sm:$0xff]  }
  0x10   : > { %v578_v11 = vcombine.low %v172_v8, %v173_v9  ;;  %v688_v12 = vld [vmem:[%s769_s29 + $0x8] ss:$0 sps:$4 sm:$0x11]   ;;  %v364_v25 = vld [vmem:[%s769_s29] sm:$0xe]  ;;  %v692_v26 = vld [vmem:[%s853_s1 + $0x58] sm:$0xff]  }
  0x11   : > { %627 = vmatpush3.bf16.msra.mxu0 %v679_v3  ;;  %v212_v16 = vshll.u32 %v688_v12, 16  ;;  %v592_v27 = vcombine.low %v364_v25, %v173_v9  ;;  %v693_v28 = vld [vmem:[%s853_s1 + $0x50] sm:$0xff]   ;;  %v380_v30 = vrot.slane %v688_v12, 1  ;;  %v470_v32 = vld [vmem:[%s821_s26] sm:$0x1]  ;;  %vm825_vm6 = vmand %vm467_vm4, %vm468_vm5 }
  0x12   : > { %641 = vmatpush3.bf16.msra.mxu1 %v680_v4  ;;  %628 = vmatprep.subr.bf16.mxu0 %v703_v1  ;;  %v205_v14 = vshrl.u32 %v578_v11, 16  ;;  %v207_v15 = vshll.u32 %v578_v11, 16  ;;  %vm473_vm7 = vsmask.f32 7938  ;;  %v475_v34 = vld [vmem:[%s821_s26 + $0x8] sm:$0x1] }
  0x13   : > { %642 = vmatprep.subr.bf16.mxu1 %v703_v1  ;;  %v214_v19 = vrot.slane %v212_v16, 1  ;;  %v379_v29 = vrot.slane %v592_v27, 1  ;;  %v471_v35 = vsel %vm825_vm6, 0, %v470_v32  ;;  %vm474_vm8 = vmand %vm467_vm4, %vm473_vm7  ;;  %v599_v47 = vld [vmem:[%s854_s2] ss:$0 sm:$0xff] }
  0x14   : > { %v209_v18 = vrot.slane %v207_v15, 1  ;;  %472 = vst [vmem:[%s821_s26] sm:$0x1] %v471_v35  ;;  %v476_v36 = vsel %vm474_vm8, 0, %v475_v34  ;;  %vm507_vm10 = vmand %vm506_vm9, %vm473_vm7  ;;  %vm484_vm11 = vsmask.f32 4368 }
  0x15   : > { %629 = vmatpush3.bf16.msra.mxu0 %v681_v5  ;;  %v381_v31 = vsel %vm378_vm3, %v379_v29, %v380_v30  ;;  %477 = vst [vmem:[%s821_s26 + $0x8] sm:$0x1] %v476_v36  ;;  %vm485_vm12 = vmor %vm468_vm5, %vm484_vm11 }
  0x16   : > { %643 = vmatpush3.bf16.msra.mxu1 %v682_v6  ;;  %630 = vmatprep.subr.bf16.mxu0 %v703_v1  ;;  %v210_v20 = vor.u32 %v209_v18, %v205_v14 }
  0x17   : > { %644 = vmatprep.subr.bf16.mxu1 %v703_v1 }
  0x18   : > { %v215_v22 = vsel %vm203_vm1, %v210_v20, %v214_v19 }
  0x19   : > { %631 = vmatpush3.bf16.msra.mxu0 %v683_v7 }
  0x1a   : > { %645 = vmatpush3.bf16.msra.mxu1 %v684_v10  ;;  %632 = vmatprep.subr.bf16.mxu0 %v703_v1 }
  0x1b   : > { %646 = vmatprep.subr.bf16.mxu1 %v703_v1  ;;  %v508_v61 = vld [vmem:[%s821_s26] sm:$0xf] }
  0x1c   : > { %v513_v3 = vld [vmem:[%s821_s26 + $0x8] sm:$0x1] }
  0x1d   : > { %633 = vmatpush3.bf16.msra.mxu0 %v685_v13 }
  0x1e   : > { %647 = vmatpush3.bf16.msra.mxu1 %v686_v17  ;;  %652 = vmatprep.subr.bf16.mxu0 %v703_v1 }
  0x20   : > { %635 = vmatmul.mubr.msk.bf16.vlgmr.msra.gmra.mxu0 %vm246_vm2, %v215_v22 }
  0x21   : > { %649 = vmatmul.mubr.msk.bf16.vlgmr.msra.gmra.mxu1 %vm246_vm2, %v578_v11  ;;  %653 = vmatpush3.bf16.msra.mxu0 %v689_v21 }
  0x22   : > { %654 = vmatprep.subr.bf16.mxu0 %v703_v1  ;;  %662 = vmatprep.mubr.msk.bf16.mxu0 %vm704_vm0, %v703_v1 }
  0x25   : > { %655 = vmatpush3.bf16.msra.mxu0 %v690_v23 }
  0x26   : > { %656 = vmatprep.subr.bf16.mxu0 %v703_v1 }
  0x29   : > { %657 = vmatpush3.bf16.msra.mxu0 %v691_v24 }
  0x2a   : > { %658 = vmatprep.subr.bf16.mxu0 %v703_v1 }
  0x2d   : > { %659 = vmatpush3.bf16.msra.mxu0 %v692_v26 }
  0x2e   : > { %660 = vmatprep.subr.bf16.mxu0 %v703_v1 }
  0x31   : > { %661 = vmatpush3.bf16.msra.mxu0 %v693_v28 }
  0x34   : > { %663 = vmatmul.mubr.msk.bf16.vlgmr.msra.gmra.mxu0 %vm246_vm2, %v381_v31 }
  0xe0   : > { %v284_v37 = vpop.f32.mrf.mxu0 }
  0xe1   : > { %v357_v38 = vpop.f32.mrf.mxu1 }
  0xe2   : > { %v636_v39 = vpop.f32.mrf.mxu0  ;;  %v358_v45 = vadd.f32 %v357_v38, %v284_v37 }
  0xe3   : > { %v650_v40 = vpop.f32.mrf.mxu1 }
  0xe4   : > { %v287_v41 = vpop.f32.mrf.mxu0 }
  0xe5   : > { %v360_v42 = vpop.f32.mrf.mxu1 }
  0xe6   : > { %v637_v43 = vpop.f32.mrf.mxu0  ;;  %v361_v50 = vadd.f32 %v360_v42, %v287_v41 }
  0xe7   : > { %v651_v44 = vpop.f32.mrf.mxu1 }
  0xf4   : > { %v449_v46 = vpop.f32.mrf.mxu0 }
  0xf5   : > { %v456_v48 = vadd.f32 %v449_v46, %v358_v45 }
  0xf6   : > { %v664_v49 = vpop.f32.mrf.mxu0 }
  0xf7   : > { %v465_v51 = vadd.f32 %v599_v47, %v456_v48 }
  0xf8   : > { %v452_v52 = vpop.f32.mrf.mxu0 }
  0xf9   : > { %v604_v53 = vpack.c.bf16 %v465_v51, %v465_v51  ;;  %v457_v54 = vadd.f32 %v452_v52, %v361_v50 }
  0xfa   : > { %v665_v55 = vpop.f32.mrf.mxu0 }
  0xfb   : > { %v487_v56 = vshrl.u32 %v604_v53, 16  ;;  %v466_v57 = vadd.f32 %v599_v47, %v457_v54  ;;  %v490_v59 = vshll.u32 %v604_v53, 16 }
  0xfd   : > { %v489_v58 = vrot.slane %v487_v56, 7  ;;  %v605_v60 = vpack.c.bf16 %v466_v57, %v466_v57 }
  0xff   : > { %v492_v62 = vor.u32 %v490_v59, %v489_v58  ;;  %v495_v63 = vshrl.u32 %v605_v60, 16  ;;  %v498_v2 = vshll.u32 %v605_v60, 16  ;;  %v493_v4 = vrot.slane %v489_v58, 4 }
 0x101   : > { %v509_v0 = vsel %vm507_vm10, %v492_v62, %v508_v61  ;;  %v497_v1 = vrot.slane %v495_v63, 7 }
 0x102   : > { %510 = vst [vmem:[%s821_s26] sm:$0xf] %v509_v0 }
 0x103   : > { %v500_v5 = vor.u32 %v498_v2, %v497_v1  ;;  %v502_v6 = vrot.slane %v497_v1, 4 }
 0x105   : > { %v501_v7 = vsel %vm485_vm12, %v493_v4, %v500_v5  ;;  %v514_v8 = vsel %vm825_vm6, %v502_v6, %v513_v3 }
 0x106   : > { %512 = vst.msk [vmem:[%s821_s26 + $0x4] sm:$0xf] %vm506_vm9, %v501_v7  ;;  %515 = vst [vmem:[%s821_s26 + $0x8] sm:$0x1] %v514_v8 }
 0x107 PF: > { %s13_s12 = sadd.s32 1, %s701_s12  }
 0x108   : > { %p10_p4 = scmp.ge.s32.totalorder %s13_s12, 4  }
 0x10a   :  { %12 = sbr.rel (!%p10_p4) target bundleno = 1 (0x1), region = 62 }

// kernel: mel_encoder_forward.13
= control target key start
LH: loop header
LB: loop body
LE: loop exit
PB: predicated region body
PF: predicated region fallthrough
CT: control target
= control target key end

     0   :  { %s2374_s17 = smov 0   ;;  %s2891_s0 = inlined_call_operand.vmem [shape: bf16[2,10,128], index: 0, kind: input, shape index: {}]   ;;  %s2892_s1 = inlined_call_operand.vmem [shape: bf16[384,128], index: 1, kind: input, shape index: {}]   ;;  %s2893_s2 = inlined_call_operand.vmem [shape: f32[1,128], index: 2, kind: input, shape index: {}]   ;;  %s2894_s3 = inlined_call_operand.vmem [shape: f32[1,128], index: 3, kind: input, shape index: {}]   ;;  %s2895_s4 = inlined_call_operand.vmem [shape: f32[1,128], index: 4, kind: input, shape index: {}]   ;;  %s2896_s5 = inlined_call_operand.vmem [shape: bf16[384,128], index: 5, kind: input, shape index: {}]   ;;  %s2897_s6 = inlined_call_operand.vmem [shape: f32[1,128], index: 6, kind: input, shape index: {}]   ;;  %s2898_s7 = inlined_call_operand.vmem [shape: f32[1,128], index: 7, kind: input, shape index: {}]   ;;  %s2899_s8 = inlined_call_operand.vmem [shape: f32[1,128], index: 8, kind: input, shape index: {}]   ;;  %s2900_s9 = inlined_call_operand.vmem [shape: f32[128,16], index: 9, kind: input, shape index: {}]   ;;  %s2901_s10 = inlined_call_operand.vmem [shape: f32[16,128], index: 10, kind: input, shape index: {}]   ;;  %s2902_s11 = inlined_call_operand.vmem [shape: bf16[2,10,128], index: 11, kind: output, shape index: {}]  }
   0x1 LB: > { %s1809_s18 = sadd.s32 4294967295, %s2310_s17   ;;  %p1813_p0 = scmp.ge.s32.totalorder %s2310_s17, 1  ;;  %s2310_s17 = sphi %s2374_s17, %s21_s17  }
   0x2   : > { %p337_p1 = scmp.lt.s32.totalorder %s2310_s17, 3 }
   0x4   : > { %p338_p2 = pnand %p1813_p0, %p337_p1 }
   0x5   : > { %p377_p3 = scmp.lt.s32.totalorder (!%p338_p2), %s1809_s18, 1 }
   0x6   : > { %341 = sbr.rel (%p338_p2) target bundleno = 2149 (0x865), region = 64 }
   0xb   : > { %v2248_v0 = vld [vmem:[%s2892_s1 + $0x78] sm:$0xff]   ;;  %v2312_v1 = vmov 0.0   ;;  %v2251_v4 = vld [vmem:[%s2892_s1 + $0x70] sm:$0xff]   ;;  %v2254_v7 = vld [vmem:[%s2892_s1 + $0x68] sm:$0xff]   ;;  %vm2313_vm0 = vmmov 0   ;;  %s2910_s18 = smov (!%p377_p3, %s1809_s18), 1 }
   0xc   : > { %2030 = vmatprep.subr.bf16.mxu1 %v2312_v1  ;;  %v2249_v2 = vld [vmem:[%s2892_s1 + $0x38] sm:$0xff]   ;;  %1888 = vmatprep.subr.bf16.mxu0 %v2248_v0  ;;  %v2252_v5 = vld [vmem:[%s2892_s1 + $0x30] sm:$0xff]   ;;  %v2255_v8 = vld [vmem:[%s2892_s1 + $0x28] sm:$0xff]   ;;  %s1884_s19 = sshll.u32 %s2910_s18, 3  ;;  %vm1036_vm1 = vcmask 1040384   ;;  %vm785_vm6 = vcmask 130048  }
   0xd   : > { %v2250_v3 = vld [vmem:[%s2892_s1 + $0xb8] sm:$0xff]   ;;  %1889 = vmatpush3.bf16.msra.mxu0 %v2249_v2  ;;  %v2253_v6 = vld [vmem:[%s2892_s1 + $0xb0] sm:$0xff]   ;;  %2046 = vmatprep.mubr.msk.bf16.mxu1 %vm2313_vm0, %v2312_v1  ;;  %v2256_v9 = vld [vmem:[%s2892_s1 + $0xa8] sm:$0xff]   ;;  %s2457_s18 = scalar_lea.vmem %s2891_s0, %s1884_s19  ;;  %s2468_s15 = scalar_lea.vmem %s2902_s11, %s1884_s19  ;;  %vm1037_vm2 = vsmask.f32 256  ;;  %vm1061_vm7 = vcmask 1043456  }
   0xe   : > { %2031 = vmatpush3.bf16.msra.mxu1 %v2250_v3  ;;  %1890 = vmatprep.subr.bf16.mxu0 %v2251_v4  ;;  %v2257_v10 = vld [vmem:[%s2892_s1 + $0x60] sm:$0xff]   ;;  %v2260_v13 = vld [vmem:[%s2892_s1 + $0x58] sm:$0xff]   ;;  %v2263_v16 = vld [vmem:[%s2892_s1 + $0x50] sm:$0xff]   ;;  %vm1042_vm4 = vsmask.f32 7938  ;;  %vm1721_vm9 = vcmask 1046528  }
   0xf   : > { %2032 = vmatprep.subr.bf16.mxu1 %v2312_v1  ;;  %v2258_v11 = vld [vmem:[%s2892_s1 + $0x20] sm:$0xff]   ;;  %v2261_v14 = vld [vmem:[%s2892_s1 + $0x18] sm:$0xff]   ;;  %v2264_v17 = vld [vmem:[%s2892_s1 + $0x10] sm:$0xff]  }
  0x10   : > { %v2259_v12 = vld [vmem:[%s2892_s1 + $0xa0] sm:$0xff]   ;;  %v2262_v15 = vld [vmem:[%s2892_s1 + $0x98] sm:$0xff]   ;;  %v2265_v18 = vld [vmem:[%s2892_s1 + $0x90] sm:$0xff]  }
  0x11   : > { %1891 = vmatpush3.bf16.msra.mxu0 %v2252_v5  ;;  %v2266_v19 = vld [vmem:[%s2892_s1 + $0x48] sm:$0xff]   ;;  %v2269_v22 = vld [vmem:[%s2892_s1 + $0x40] sm:$0xff]   ;;  %vm2474_vm3 = vmand %vm1036_vm1, %vm1037_vm2 }
  0x12   : > { %2033 = vmatpush3.bf16.msra.mxu1 %v2253_v6  ;;  %1892 = vmatprep.subr.bf16.mxu0 %v2254_v7  ;;  %v2267_v20 = vld [vmem:[%s2892_s1 + $0x8] sm:$0xff]   ;;  %v388_v23 = vld [vmem:[%s2457_s18] sm:$0xf]  ;;  %v389_v24 = vld [vmem:[%s2457_s18 + $0x4] sm:$0x1] }
  0x13   : > { %2034 = vmatprep.subr.bf16.mxu1 %v2312_v1  ;;  %v2268_v21 = vld [vmem:[%s2892_s1 + $0x88] sm:$0xff]   ;;  %v1818_v25 = vcombine.low %v388_v23, %v389_v24  ;;  %v1039_v27 = vld [vmem:[#allocation2] sm:$0x1]  ;;  %v1044_v28 = vld [vmem:[#allocation2 + $0x4] sm:$0x1] }
  0x14   : > { %v1040_v29 = vsel %vm2474_vm3, 0, %v1039_v27  ;;  %vm2482_vm5 = vmand %vm1036_vm1, %vm1042_vm4  ;;  %v2270_v31 = vld [vmem:[%s2892_s1] sm:$0xff]   ;;  %v2507_v45 = vld [vmem:[%s2900_s9 + $0x78] sm:$0xff] }
  0x15   : > { %1893 = vmatpush3.bf16.msra.mxu0 %v2255_v8  ;;  %v397_v32 = vshrl.u32 %v1818_v25, 16  ;;  %v399_v33 = vshll.u32 %v1818_v25, 16  ;;  %v1045_v34 = vsel %vm2482_vm5, 0, %v1044_v28  ;;  %v1728_v35 = vld [vmem:[%s2468_s15] sm:$0x1]  ;;  %v2513_v46 = vld [vmem:[%s2900_s9 + $0x70] sm:$0xff]  ;;  %vm2779_vm8 = vmand %vm1061_vm7, %vm1042_vm4 }
  0x16   : > { %2035 = vmatpush3.bf16.msra.mxu1 %v2256_v9  ;;  %1894 = vmatprep.subr.bf16.mxu0 %v2257_v10  ;;  %1041 = vst [vmem:[#allocation2] sm:$0x1] %v1040_v29  ;;  %v2271_v36 = vld [vmem:[%s2892_s1 + $0x80] sm:$0xff]   ;;  %1046 = vst [vmem:[#allocation2 + $0x4] sm:$0x1] %v1045_v34  ;;  %v1729_v37 = vsel %vm2474_vm3, 0, %v1728_v35 }
  0x17   : > { %2036 = vmatprep.subr.bf16.mxu1 %v2312_v1  ;;  %v1731_v38 = vld [vmem:[%s2468_s15 + $0x4] sm:$0x1]  ;;  %v390_v39 = vld [vmem:[%s2457_s18] sm:$0xe]  ;;  %v401_v40 = vrot.slane %v399_v33, 1  ;;  %1730 = vst [vmem:[%s2468_s15] sm:$0x1] %v1729_v37 }
  0x18   : > { %v1732_v41 = vsel %vm2482_vm5, 0, %v1731_v38  ;;  %v1819_v42 = vcombine.low %v390_v39, %v389_v24  ;;  %v2521_v47 = vld [vmem:[%s2900_s9 + $0x68] sm:$0xff]  ;;  %v2529_v48 = vld [vmem:[%s2900_s9 + $0x60] sm:$0xff]  ;;  %v2536_v49 = vld [vmem:[%s2900_s9 + $0x58] sm:$0xff] }
  0x19   : > { %1895 = vmatpush3.bf16.msra.mxu0 %v2258_v11  ;;  %1733 = vst [vmem:[%s2468_s15 + $0x4] sm:$0x1] %v1732_v41  ;;  %v402_v43 = vor.u32 %v401_v40, %v397_v32  ;;  %v2558_v50 = vld [vmem:[%s2900_s9 + $0x50] sm:$0xff]  ;;  %v2566_v51 = vld [vmem:[%s2900_s9 + $0x48] sm:$0xff]  ;;  %v2575_v52 = vld [vmem:[%s2900_s9 + $0x40] sm:$0xff] }
  0x1a   : > { %2037 = vmatpush3.bf16.msra.mxu1 %v2259_v12  ;;  %1896 = vmatprep.subr.bf16.mxu0 %v2260_v13  ;;  %v407_v44 = vrot.slane %v1819_v42, 1  ;;  %v2584_v53 = vld [vmem:[%s2900_s9 + $0x38] sm:$0xff]  ;;  %v2593_v54 = vld [vmem:[%s2900_s9 + $0x30] sm:$0xff]  ;;  %v2602_v55 = vld [vmem:[%s2900_s9 + $0x28] sm:$0xff] }
  0x1b   : > { %2038 = vmatprep.subr.bf16.mxu1 %v2312_v1  ;;  %640 = vmatprep.mubr.bf16.mxu0 %v402_v43  ;;  %v2611_v56 = vld [vmem:[%s2900_s9 + $0x20] sm:$0xff]  ;;  %v2618_v57 = vld [vmem:[%s2900_s9 + $0x18] sm:$0xff]  ;;  %v2625_v58 = vld [vmem:[%s2900_s9 + $0x10] sm:$0xff] }
  0x1c   : > { %v2634_v59 = vld [vmem:[%s2900_s9 + $0x8] sm:$0xff]  ;;  %v2643_v60 = vld [vmem:[%s2900_s9] sm:$0xff]  ;;  %v2274_v39 = vld [vmem:[%s2896_s5 + $0xb8] sm:$0xff]  }
  0x1d   : > { %1897 = vmatpush3.bf16.msra.mxu0 %v2261_v14  ;;  %v1820_v63 = vld [vmem:[%s2893_s2] ss:$0 sm:$0xff]  ;;  %v2275_v40 = vld [vmem:[%s2896_s5 + $0x78] sm:$0xff]   ;;  %v2276_v41 = vld [vmem:[%s2896_s5 + $0xb0] sm:$0xff]  }
  0x1e   : > { %2039 = vmatpush3.bf16.msra.mxu1 %v2262_v15  ;;  %1898 = vmatprep.subr.bf16.mxu0 %v2263_v16  ;;  %v2660_v16 = vld [vmem:[%s2901_s10 + $0x8] sm:$0xff]  ;;  %v2277_v42 = vld [vmem:[%s2896_s5 + $0x38] sm:$0xff]   ;;  %v2278_v43 = vld [vmem:[%s2896_s5 + $0x70] sm:$0xff]  }
  0x1f   : > { %2040 = vmatprep.subr.bf16.mxu1 %v2312_v1 }
  0x21   : > { %1899 = vmatpush3.bf16.msra.mxu0 %v2264_v17  ;;  %v2669_v17 = vld [vmem:[%s2901_s10] sm:$0xff] }
  0x22   : > { %2041 = vmatpush3.bf16.msra.mxu1 %v2265_v18  ;;  %1900 = vmatprep.subr.bf16.mxu0 %v2266_v19 }
  0x23   : > { %2042 = vmatprep.subr.bf16.mxu1 %v2312_v1 }
  0x25   : > { %1901 = vmatpush3.bf16.msra.mxu0 %v2267_v20 }
  0x26   : > { %2043 = vmatpush3.bf16.msra.mxu1 %v2268_v21  ;;  %1902 = vmatprep.subr.bf16.mxu0 %v2269_v22  ;;  %v859_v21 = vlaneseq }
  0x27   : > { %2044 = vmatprep.subr.bf16.mxu1 %v2312_v1 }
  0x28   : > { %v860_v22 = vshrl.u32 %v859_v21, 7 }
  0x29   : > { %1903 = vmatpush3.bf16.msra.mxu0 %v2270_v31 }
  0x2a   : > { %2045 = vmatpush3.bf16.msra.mxu1 %v2271_v36  ;;  %2050 = vmatprep.subr.mxu0 %v2312_v1 }
  0x2b   : > { %2092 = vmatprep.subr.mxu1 %v2312_v1 }
  0x2c   : > { %641 = vmatmul.mubr.bf16.vlgmr.msra.gmra.mxu0 %v388_v23  ;;  %v2679_v23 = vsub.s32 0, %v860_v22 }
  0x2d   : > { %2047 = vmatmul.mubr.bf16.vlgmr.msra.gmra.mxu1 %v407_v44  ;;  %2051 = vmatpush3.msra.mxu0 %v2507_v45  ;;  %v2279_v44 = vld [vmem:[%s2896_s5 + $0xa8] sm:$0xff]  }
  0x2e   : > { %2052 = vmatprep.subr.mxu0 %v2312_v1  ;;  %2082 = vmatprep.mubr.msk.f32.mxu0 %vm2313_vm0, %v2312_v1 }
  0x2f   : > { %2053 = vmatpush3.msra.mxu0 %v2513_v46  ;;  %2093 = vmatpush3.msra.mxu1 %v2507_v45 }
  0x30   : > { %2054 = vmatprep.subr.mxu0 %v2312_v1  ;;  %2094 = vmatprep.subr.mxu1 %v2312_v1 }
  0x31   : > { %2055 = vmatpush3.msra.mxu0 %v2521_v47  ;;  %2095 = vmatpush3.msra.mxu1 %v2513_v46 }
  0x32   : > { %2056 = vmatprep.subr.mxu0 %v2312_v1  ;;  %2096 = vmatprep.subr.mxu1 %v2312_v1 }
  0x33   : > { %2057 = vmatpush3.msra.mxu0 %v2529_v48  ;;  %2097 = vmatpush3.msra.mxu1 %v2521_v47 }
  0x34   : > { %2058 = vmatprep.subr.mxu0 %v2312_v1  ;;  %2098 = vmatprep.subr.mxu1 %v2312_v1 }
  0x35   : > { %2059 = vmatpush3.msra.mxu0 %v2536_v49  ;;  %2099 = vmatpush3.msra.mxu1 %v2529_v48 }
  0x36   : > { %2060 = vmatprep.subr.mxu0 %v2312_v1  ;;  %2100 = vmatprep.subr.mxu1 %v2312_v1 }
  0x37   : > { %2101 = vmatpush3.msra.mxu1 %v2536_v49  ;;  %2124 = vmatprep.mubr.msk.f32.mxu1 %vm2313_vm0, %v2312_v1 }
  0x38   : > { %2102 = vmatprep.subr.mxu1 %v2312_v1  ;;  %2061 = vmatpush3.msra.mxu0 %v2558_v50 }
  0x39   : > { %2103 = vmatpush3.msra.mxu1 %v2558_v50  ;;  %2062 = vmatprep.subr.mxu0 %v2312_v1 }
  0x3a   : > { %2104 = vmatprep.subr.mxu1 %v2312_v1  ;;  %2063 = vmatpush3.msra.mxu0 %v2566_v51 }
  0x3b   : > { %2105 = vmatpush3.msra.mxu1 %v2566_v51  ;;  %2064 = vmatprep.subr.mxu0 %v2312_v1 }
  0x3c   : > { %2106 = vmatprep.subr.mxu1 %v2312_v1  ;;  %2065 = vmatpush3.msra.mxu0 %v2575_v52 }
  0x3d   : > { %2107 = vmatpush3.msra.mxu1 %v2575_v52  ;;  %2066 = vmatprep.subr.mxu0 %v2312_v1 }
  0x3e   : > { %2108 = vmatprep.subr.mxu1 %v2312_v1  ;;  %2067 = vmatpush3.msra.mxu0 %v2584_v53 }
  0x3f   : > { %2109 = vmatpush3.msra.mxu1 %v2584_v53  ;;  %2068 = vmatprep.subr.mxu0 %v2312_v1 }
  0x40   : > { %2110 = vmatprep.subr.mxu1 %v2312_v1  ;;  %2069 = vmatpush3.msra.mxu0 %v2593_v54 }
  0x41   : > { %2111 = vmatpush3.msra.mxu1 %v2593_v54  ;;  %2070 = vmatprep.subr.mxu0 %v2312_v1 }
  0x42   : > { %2112 = vmatprep.subr.mxu1 %v2312_v1  ;;  %2071 = vmatpush3.msra.mxu0 %v2602_v55 }
  0x43   : > { %2113 = vmatpush3.msra.mxu1 %v2602_v55  ;;  %2072 = vmatprep.subr.mxu0 %v2312_v1 }
  0x44   : > { %2114 = vmatprep.subr.mxu1 %v2312_v1  ;;  %2073 = vmatpush3.msra.mxu0 %v2611_v56 }
  0x45   : > { %2115 = vmatpush3.msra.mxu1 %v2611_v56  ;;  %2074 = vmatprep.subr.mxu0 %v2312_v1 }
  0x46   : > { %2116 = vmatprep.subr.mxu1 %v2312_v1  ;;  %2075 = vmatpush3.msra.mxu0 %v2618_v57 }
  0x47   : > { %2117 = vmatpush3.msra.mxu1 %v2618_v57  ;;  %2076 = vmatprep.subr.mxu0 %v2312_v1 }
  0x48   : > { %2118 = vmatprep.subr.mxu1 %v2312_v1  ;;  %2077 = vmatpush3.msra.mxu0 %v2625_v58 }
  0x49   : > { %2119 = vmatpush3.msra.mxu1 %v2625_v58  ;;  %2078 = vmatprep.subr.mxu0 %v2312_v1 }
  0x4a   : > { %2120 = vmatprep.subr.mxu1 %v2312_v1  ;;  %2079 = vmatpush3.msra.mxu0 %v2634_v59 }
  0x4b   : > { %2121 = vmatpush3.msra.mxu1 %v2634_v59  ;;  %2080 = vmatprep.subr.mxu0 %v2312_v1 }
  0x4c   : > { %2122 = vmatprep.subr.mxu1 %v2312_v1  ;;  %2081 = vmatpush3.msra.mxu0 %v2643_v60 }
  0x4d   : > { %2123 = vmatpush3.msra.mxu1 %v2643_v60  ;;  %2085 = vmatprep.subr.mxu0 %v2312_v1 }
  0x4e   : > { %2134 = vmatprep.subr.bf16.mxu1 %v2312_v1 }
  0xec   : > { %v1904_v61 = vpop.f32.mrf.mxu0 }
  0xed   : > { %v682_v62 = vpop.f32.mrf.mxu1 }
  0xee   : > { %v1905_v0 = vpop.f32.mrf.mxu0 }
  0xef   : > { %v1906_v2 = vadd.f32 %v1905_v0, %v1904_v61  ;;  %v2048_v3 = vpop.f32.mrf.mxu1  ;;  %v2280_v61 = vld [vmem:[%s2896_s5 + $0x30] sm:$0xff]   ;;  %v2283_v0 = vld [vmem:[%s2896_s5 + $0x28] sm:$0xff]  }
  0xf0   : > { %v1907_v4 = vpop.f32.mrf.mxu0  ;;  %v2285_v3 = vld [vmem:[%s2896_s5 + $0x98] sm:$0xff]  }
  0xf1   : > { %v643_v5 = vadd.f32 %v1906_v2, %v1820_v63  ;;  %v685_v6 = vpop.f32.mrf.mxu1  ;;  %v2282_v63 = vld [vmem:[%s2896_s5 + $0xa0] sm:$0xff]  }
  0xf2   : > { %v1908_v7 = vpop.f32.mrf.mxu0  ;;  %v2284_v2 = vld [vmem:[%s2896_s5 + $0x60] sm:$0xff]   ;;  %v2288_v6 = vld [vmem:[%s2896_s5 + $0x90] sm:$0xff]  }
  0xf3   : > { %v683_v8 = vadd.f32 %v682_v62, %v643_v5  ;;  %v2049_v9 = vpop.f32.mrf.mxu1  ;;  %v2281_v62 = vld [vmem:[%s2896_s5 + $0x68] sm:$0xff]   ;;  %v2286_v4 = vld [vmem:[%s2896_s5 + $0x20] sm:$0xff]   ;;  %v2287_v5 = vld [vmem:[%s2896_s5 + $0x58] sm:$0xff]  }
  0xf4   : > { %v2289_v7 = vld [vmem:[%s2896_s5 + $0x18] sm:$0xff]   ;;  %v2291_v9 = vld [vmem:[%s2896_s5 + $0x88] sm:$0xff]  }
  0xf5   : > { %v708_v10 = vrot.slane %v683_v8, 4 }
  0xf7   : > { %v709_v11 = vadd.f32 %v708_v10, %v683_v8  ;;  %v2292_v10 = vld [vmem:[%s2896_s5 + $0x10] sm:$0xff]  }
  0xf9   : > { %v710_v12 = vrot.slane %v709_v11, 2 }
  0xfb   : > { %v711_v13 = vadd.f32 %v710_v12, %v709_v11  ;;  %v2293_v11 = vld [vmem:[%s2896_s5 + $0x48] sm:$0xff]   ;;  %v2294_v12 = vld [vmem:[%s2896_s5 + $0x80] sm:$0xff]  }
  0xfd   : > { %v712_v14 = vrot.slane %v711_v13, 1 }
  0xff   : > { %v713_v15 = vadd.f32 %v712_v14, %v711_v13  ;;  %v2295_v13 = vld [vmem:[%s2896_s5 + $0x8] sm:$0xff]   ;;  %v2297_v14 = vld [vmem:[%s2896_s5 + $0x40] sm:$0xff]  }
 0x101   : > { %2083 = vmatmul.mubr.f32.vlgmr.msra.gmra.mxu0 %v713_v15  ;;  %v2298_v15 = vld [vmem:[%s2896_s5] sm:$0xff]  }
 0x102   : > { %2086 = vmatpush3.msra.mxu0 %v2660_v16  ;;  %2089 = vmatprep.mubr.msk.f32.mxu0 %vm2313_vm0, %v2312_v1 }
 0x103   : > { %2087 = vmatprep.subr.mxu0 %v2312_v1 }
 0x104   : > { %2088 = vmatpush3.msra.mxu0 %v2669_v17 }
 0x105   : > { %2127 = vmatprep.subr.mxu0 %v2312_v1 }
 0x1c1   : > { %v780_v18 = vpop.f32.mrf.mxu0 }
 0x1c2   : > { %v784_v19 = vmul.f32 0.015625, %v780_v18 }
 0x1c3   : > { %v2084_v20 = vpop.f32.mrf.mxu0 }
 0x1c4   : > { %2090 = vmatmul.mubr.msk.f32.vlgmr.msra.gmra.mxu0 %vm785_vm6, %v784_v19 }
 0x1c5   : > { %2128 = vmatpush3.msra.mxu0 %v2660_v16  ;;  %2131 = vmatprep.mubr.msk.f32.mxu0 %vm2313_vm0, %v2312_v1 }
 0x1c6   : > { %2129 = vmatprep.subr.mxu0 %v2312_v1 }
 0x1c7   : > { %2130 = vmatpush3.msra.mxu0 %v2669_v17 }
 0x1c8   : > { %1959 = vmatprep.subr.bf16.mxu0 %v2275_v40 }
 0x284   : > { %v855_v24 = vpop.f32.mrf.mxu0 }
 0x285   : > { %v862_v25 = vrot.slane %v855_v24, %v2679_v23  ;;  %v1847_v24 = vld [vmem:[%s2894_s3] ss:$0 sm:$0xff] }
 0x286   : > { %v2091_v27 = vpop.f32.mrf.mxu0 }
 0x287   : > { %v2682_v28 = vsub.f32 %v683_v8, %v862_v25  ;;  %v2290_v8 = vld [vmem:[%s2896_s5 + $0x50] sm:$0xff]   ;;  %v1848_v27 = vld [vmem:[%s2895_s4] ss:$0 sm:$0xff] }
 0x289   : > { %v864_v29 = vmul.f32 %v2682_v28, %v2682_v28 }
 0x28b   : > { %v865_v30 = vrot.slane %v864_v29, 4 }
 0x28d   : > { %v866_v31 = vadd.f32 %v865_v30, %v864_v29 }
 0x28f   : > { %v867_v32 = vrot.slane %v866_v31, 2 }
 0x291   : > { %v868_v33 = vadd.f32 %v867_v32, %v866_v31 }
 0x293   : > { %v869_v34 = vrot.slane %v868_v33, 1 }
 0x295   : > { %v870_v35 = vadd.f32 %v869_v34, %v868_v33 }
 0x297   : > { %2125 = vmatmul.mubr.f32.vlgmr.msra.gmra.mxu1 %v870_v35 }
 0x298   : > { %2150 = vmatprep.mubr.msk.bf16.mxu1 %vm2313_vm0, %v2312_v1  ;;  %2135 = vmatpush3.bf16.msra.mxu1 %v2274_v39 }
 0x299   : > { %2136 = vmatprep.subr.bf16.mxu1 %v2312_v1 }
 0x29c   : > { %2137 = vmatpush3.bf16.msra.mxu1 %v2276_v41 }
 0x29d   : > { %2138 = vmatprep.subr.bf16.mxu1 %v2312_v1 }
 0x2a0   : > { %2139 = vmatpush3.bf16.msra.mxu1 %v2279_v44 }
 0x2a1   : > { %2140 = vmatprep.subr.bf16.mxu1 %v2312_v1 }
 0x2a4   : > { %2141 = vmatpush3.bf16.msra.mxu1 %v2282_v63 }
 0x2a5   : > { %2142 = vmatprep.subr.bf16.mxu1 %v2312_v1 }
 0x2a8   : > { %2143 = vmatpush3.bf16.msra.mxu1 %v2285_v3 }
 0x2a9   : > { %2144 = vmatprep.subr.bf16.mxu1 %v2312_v1 }
 0x2ac   : > { %2145 = vmatpush3.bf16.msra.mxu1 %v2288_v6 }
 0x2ad   : > { %2146 = vmatprep.subr.bf16.mxu1 %v2312_v1 }
 0x2b0   : > { %2147 = vmatpush3.bf16.msra.mxu1 %v2291_v9 }
 0x2b1   : > { %2148 = vmatprep.subr.bf16.mxu1 %v2312_v1 }
 0x2b4   : > { %2149 = vmatpush3.bf16.msra.mxu1 %v2294_v12 }
 0x2b5   : > { %2189 = vmatprep.subr.mxu1 %v2312_v1 }
 0x357   : > { %v937_v36 = vpop.f32.mrf.mxu1 }
 0x358   : > { %v941_v37 = vmul.f32 0.015625, %v937_v36 }
 0x359   : > { %v2126_v38 = vpop.f32.mrf.mxu1 }
 0x35a   : > { %2132 = vmatmul.mubr.msk.f32.vlgmr.msra.gmra.mxu0 %vm785_vm6, %v941_v37  ;;  %v1063_v37 = vld [vmem:[#allocation2] sm:$0xf]  ;;  %v1066_v38 = vld [vmem:[#allocation2 + $0x4] sm:$0x1] }
 0x35b   : > { %1960 = vmatpush3.bf16.msra.mxu0 %v2277_v42 }
 0x35c   : > { %1961 = vmatprep.subr.bf16.mxu0 %v2278_v43 }
 0x35f   : > { %1962 = vmatpush3.bf16.msra.mxu0 %v2280_v61 }
 0x360   : > { %1963 = vmatprep.subr.bf16.mxu0 %v2281_v62 }
 0x363   : > { %1964 = vmatpush3.bf16.msra.mxu0 %v2283_v0 }
 0x364   : > { %1965 = vmatprep.subr.bf16.mxu0 %v2284_v2 }
 0x367   : > { %1966 = vmatpush3.bf16.msra.mxu0 %v2286_v4 }
 0x368   : > { %1967 = vmatprep.subr.bf16.mxu0 %v2287_v5 }
 0x36b   : > { %1968 = vmatpush3.bf16.msra.mxu0 %v2289_v7 }
 0x36c   : > { %1969 = vmatprep.subr.bf16.mxu0 %v2290_v8 }
 0x36f   : > { %1970 = vmatpush3.bf16.msra.mxu0 %v2292_v10  ;;  %v1852_v10 = vld [vmem:[%s2897_s6] ss:$0 sm:$0xff] }
 0x370   : > { %1971 = vmatprep.subr.bf16.mxu0 %v2293_v11 }
 0x373   : > { %1972 = vmatpush3.bf16.msra.mxu0 %v2295_v13 }
 0x374   : > { %1973 = vmatprep.subr.bf16.mxu0 %v2297_v14 }
 0x377   : > { %1974 = vmatpush3.bf16.msra.mxu0 %v2298_v15 }
 0x378   : > { %2154 = vmatprep.subr.mxu0 %v2312_v1 }
 0x41a   : > { %v1011_v18 = vpop.f32.mrf.mxu0 }
 0x41b   : > { %v1012_v19 = vadd.f32 1e-05, %v1011_v18 }
 0x41c   : > { %v2133_v20 = vpop.f32.mrf.mxu0 }
 0x41d   : > { %2300 = vrsqrt.f32 %v1012_v19 }
 0x42a   : > { %v2301_v21 = vpop.eup %2300 }
 0x42b   : > { %v1019_v22 = vrot.slane %v2301_v21, %v2679_v23 }
 0x42d   : > { %v1020_v25 = vmul.f32 %v1019_v22, %v2682_v28 }
 0x42f   : > { %v1027_v29 = vmul.f32 %v1847_v24, %v1020_v25 }
 0x431   : > { %v1034_v30 = vadd.f32 %v1848_v27, %v1027_v29 }
 0x433   : > { %v1035_v31 = vmax.f32 %v1034_v30, 0.0 }
 0x435   : > { %v1886_v32 = vpack.c.bf16 %v1035_v31, %v1035_v31 }
 0x437   : > { %v1052_v33 = vshrl.u32 %v1886_v32, 16  ;;  %v1055_v35 = vshll.u32 %v1886_v32, 16 }
 0x439   : > { %v1054_v34 = vrot.slane %v1052_v33, 7 }
 0x43b   : > { %v1057_v28 = vor.u32 %v1055_v35, %v1054_v34  ;;  %v1058_v39 = vrot.slane %v1054_v34, 4 }
 0x43d   : > { %v1064_v40 = vsel %vm2779_vm8, %v1057_v28, %v1063_v37  ;;  %v1067_v41 = vsel %vm2474_vm3, %v1058_v39, %v1066_v38  ;;  %v1879_v38 = vld [vmem:[%s2898_s7] ss:$0 sm:$0xff] }
 0x43e   : > { %1065 = vst [vmem:[#allocation2] sm:$0xf] %v1064_v40  ;;  %1068 = vst [vmem:[#allocation2 + $0x4] sm:$0x1] %v1067_v41  ;;  %v1880_v39 = vld [vmem:[%s2899_s8] ss:$0 sm:$0xff] }
 0x445   : > { %v1070_v42 = vld [vmem:[#allocation2 + $0x4] sm:$0x1]  ;;  %v1071_v43 = vld [vmem:[#allocation2] sm:$0xe] }
 0x446   : > { %v1069_v44 = vld [vmem:[#allocation2] sm:$0xf]  ;;  %v1851_v61 = vcombine.low %v1071_v43, %v1070_v42 }
 0x447   : > { %v1850_v62 = vcombine.low %v1069_v44, %v1070_v42 }
 0x448   : > { %v1088_v63 = vrot.slane %v1851_v61, 1 }
 0x449   : > { %v1080_v0 = vshll.u32 %v1850_v62, 16  ;;  %v1078_v2 = vshrl.u32 %v1850_v62, 16 }
 0x44a   : > { %2151 = vmatmul.mubr.bf16.vlgmr.msra.gmra.mxu1 %v1088_v63 }
 0x44b   : > { %v1082_v3 = vrot.slane %v1080_v0, 1  ;;  %2190 = vmatpush3.msra.mxu1 %v2660_v16  ;;  %2193 = vmatprep.mubr.msk.f32.mxu1 %vm2313_vm0, %v2312_v1  ;;  %v1748_v0 = vld [vmem:[%s2468_s15] sm:$0xf] }
 0x44c   : > { %2191 = vmatprep.subr.mxu1 %v2312_v1 }
 0x44d   : > { %v1083_v4 = vor.u32 %v1082_v3, %v1078_v2  ;;  %2192 = vmatpush3.msra.mxu1 %v2669_v17  ;;  %v1751_v2 = vld [vmem:[%s2468_s15 + $0x4] sm:$0x1] }
 0x44e   : > { %2196 = vmatprep.subr.mxu1 %v2312_v1 }
 0x44f   : > { %1321 = vmatprep.mubr.bf16.mxu0 %v1083_v4 }
 0x450   : > { %1322 = vmatmul.mubr.bf16.vlgmr.msra.gmra.mxu0 %v1069_v44 }
 0x451   : > { %2155 = vmatpush3.msra.mxu0 %v2507_v45  ;;  %2186 = vmatprep.mubr.msk.f32.mxu0 %vm2313_vm0, %v2312_v1 }
 0x452   : > { %2156 = vmatprep.subr.mxu0 %v2312_v1 }
 0x453   : > { %2157 = vmatpush3.msra.mxu0 %v2513_v46 }
 0x454   : > { %2158 = vmatprep.subr.mxu0 %v2312_v1 }
 0x455   : > { %2159 = vmatpush3.msra.mxu0 %v2521_v47 }
 0x456   : > { %2160 = vmatprep.subr.mxu0 %v2312_v1 }
 0x457   : > { %2161 = vmatpush3.msra.mxu0 %v2529_v48 }
 0x458   : > { %2162 = vmatprep.subr.mxu0 %v2312_v1 }
 0x459   : > { %2163 = vmatpush3.msra.mxu0 %v2536_v49 }
 0x45a   : > { %2164 = vmatprep.subr.mxu0 %v2312_v1 }
 0x45b   : > { %2165 = vmatpush3.msra.mxu0 %v2558_v50 }
 0x45c   : > { %2166 = vmatprep.subr.mxu0 %v2312_v1 }
 0x45d   : > { %2167 = vmatpush3.msra.mxu0 %v2566_v51 }
 0x45e   : > { %2168 = vmatprep.subr.mxu0 %v2312_v1 }
 0x45f   : > { %2169 = vmatpush3.msra.mxu0 %v2575_v52 }
 0x460   : > { %2170 = vmatprep.subr.mxu0 %v2312_v1 }
 0x461   : > { %2171 = vmatpush3.msra.mxu0 %v2584_v53 }
 0x462   : > { %2172 = vmatprep.subr.mxu0 %v2312_v1 }
 0x463   : > { %2173 = vmatpush3.msra.mxu0 %v2593_v54 }
 0x464   : > { %2174 = vmatprep.subr.mxu0 %v2312_v1 }
 0x465   : > { %2175 = vmatpush3.msra.mxu0 %v2602_v55 }
 0x466   : > { %2176 = vmatprep.subr.mxu0 %v2312_v1 }
 0x467   : > { %2177 = vmatpush3.msra.mxu0 %v2611_v56 }
 0x468   : > { %2178 = vmatprep.subr.mxu0 %v2312_v1 }
 0x469   : > { %2179 = vmatpush3.msra.mxu0 %v2618_v57 }
 0x46a   : > { %2180 = vmatprep.subr.mxu0 %v2312_v1 }
 0x46b   : > { %2181 = vmatpush3.msra.mxu0 %v2625_v58 }
 0x46c   : > { %2182 = vmatprep.subr.mxu0 %v2312_v1 }
 0x46d   : > { %2183 = vmatpush3.msra.mxu0 %v2634_v59 }
 0x46e   : > { %2184 = vmatprep.subr.mxu0 %v2312_v1 }
 0x46f   : > { %2185 = vmatpush3.msra.mxu0 %v2643_v60 }
 0x470   : > { %2231 = vmatprep.subr.mxu0 %v2312_v1 }
 0x50a   : > { %v1363_v5 = vpop.f32.mrf.mxu1 }
 0x50c   : > { %v2152_v6 = vpop.f32.mrf.mxu1 }
 0x50e   : > { %v1366_v7 = vpop.f32.mrf.mxu1 }
 0x510   : > { %v1975_v8 = vpop.f32.mrf.mxu0  ;;  %v2153_v9 = vpop.f32.mrf.mxu1 }
 0x512   : > { %v1976_v11 = vpop.f32.mrf.mxu0 }
 0x513   : > { %v1977_v12 = vadd.f32 %v1976_v11, %v1975_v8 }
 0x514   : > { %v1978_v13 = vpop.f32.mrf.mxu0 }
 0x515   : > { %v1324_v14 = vadd.f32 %v1977_v12, %v1852_v10 }
 0x516   : > { %v1979_v15 = vpop.f32.mrf.mxu0 }
 0x517   : > { %v1364_v18 = vadd.f32 %v1363_v5, %v1324_v14 }
 0x519   : > { %v1389_v19 = vrot.slane %v1364_v18, 4 }
 0x51b   : > { %v1390_v20 = vadd.f32 %v1389_v19, %v1364_v18 }
 0x51d   : > { %v1391_v21 = vrot.slane %v1390_v20, 2 }
 0x51f   : > { %v1392_v22 = vadd.f32 %v1391_v21, %v1390_v20 }
 0x521   : > { %v1393_v24 = vrot.slane %v1392_v22, 1 }
 0x523   : > { %v1394_v25 = vadd.f32 %v1393_v24, %v1392_v22 }
 0x525   : > { %2187 = vmatmul.mubr.f32.vlgmr.msra.gmra.mxu0 %v1394_v25 }
 0x526   : > { %2232 = vmatpush3.msra.mxu0 %v2660_v16  ;;  %2235 = vmatprep.mubr.msk.f32.mxu0 %vm2313_vm0, %v2312_v1  ;;  %v1715_v16 = vld [vmem:[%s2457_s18] sm:$0xf] }
 0x527   : > { %2233 = vmatprep.subr.mxu0 %v2312_v1  ;;  %v1717_v31 = vunpack.c.l.bf16 %v1715_v16 }
 0x528   : > { %2234 = vmatpush3.msra.mxu0 %v2669_v17  ;;  %v1716_v17 = vld [vmem:[%s2457_s18 + $0x4] sm:$0x1] }
 0x529   : > { %v1718_v32 = vunpack.c.l.bf16 %v1716_v17  ;;  %v1722_v35 = vrot.slane %v1717_v31, 1 }
 0x52b   : > { %v1723_v37 = vrot.slane %v1718_v32, 1 }
 0x52d   : > { %v1724_v41 = vsel %vm1721_vm9, %v1722_v35, %v1723_v37 }
 0x5e5   : > { %v1461_v27 = vpop.f32.mrf.mxu0 }
 0x5e6   : > { %v1465_v29 = vmul.f32 0.015625, %v1461_v27 }
 0x5e7   : > { %v2188_v30 = vpop.f32.mrf.mxu0 }
 0x5e8   : > { %2194 = vmatmul.mubr.msk.f32.vlgmr.msra.gmra.mxu1 %vm785_vm6, %v1465_v29 }
 0x5e9   : > { %2197 = vmatpush3.msra.mxu1 %v2507_v45  ;;  %2228 = vmatprep.mubr.msk.f32.mxu1 %vm2313_vm0, %v2312_v1 }
 0x5ea   : > { %2198 = vmatprep.subr.mxu1 %v2312_v1 }
 0x5eb   : > { %2199 = vmatpush3.msra.mxu1 %v2513_v46 }
 0x5ec   : > { %2200 = vmatprep.subr.mxu1 %v2312_v1 }
 0x5ed   : > { %2201 = vmatpush3.msra.mxu1 %v2521_v47 }
 0x5ee   : > { %2202 = vmatprep.subr.mxu1 %v2312_v1 }
 0x5ef   : > { %2203 = vmatpush3.msra.mxu1 %v2529_v48 }
 0x5f0   : > { %2204 = vmatprep.subr.mxu1 %v2312_v1 }
 0x5f1   : > { %2205 = vmatpush3.msra.mxu1 %v2536_v49 }
 0x5f2   : > { %2206 = vmatprep.subr.mxu1 %v2312_v1 }
 0x5f3   : > { %2207 = vmatpush3.msra.mxu1 %v2558_v50 }
 0x5f4   : > { %2208 = vmatprep.subr.mxu1 %v2312_v1 }
 0x5f5   : > { %2209 = vmatpush3.msra.mxu1 %v2566_v51 }
 0x5f6   : > { %2210 = vmatprep.subr.mxu1 %v2312_v1 }
 0x5f7   : > { %2211 = vmatpush3.msra.mxu1 %v2575_v52 }
 0x5f8   : > { %2212 = vmatprep.subr.mxu1 %v2312_v1 }
 0x5f9   : > { %2213 = vmatpush3.msra.mxu1 %v2584_v53 }
 0x5fa   : > { %2214 = vmatprep.subr.mxu1 %v2312_v1 }
 0x5fb   : > { %2215 = vmatpush3.msra.mxu1 %v2593_v54 }
 0x5fc   : > { %2216 = vmatprep.subr.mxu1 %v2312_v1 }
 0x5fd   : > { %2217 = vmatpush3.msra.mxu1 %v2602_v55 }
 0x5fe   : > { %2218 = vmatprep.subr.mxu1 %v2312_v1 }
 0x5ff   : > { %2219 = vmatpush3.msra.mxu1 %v2611_v56 }
 0x600   : > { %2220 = vmatprep.subr.mxu1 %v2312_v1 }
 0x601   : > { %2221 = vmatpush3.msra.mxu1 %v2618_v57 }
 0x602   : > { %2222 = vmatprep.subr.mxu1 %v2312_v1 }
 0x603   : > { %2223 = vmatpush3.msra.mxu1 %v2625_v58 }
 0x604   : > { %2224 = vmatprep.subr.mxu1 %v2312_v1 }
 0x605   : > { %2225 = vmatpush3.msra.mxu1 %v2634_v59 }
 0x606   : > { %2226 = vmatprep.subr.mxu1 %v2312_v1 }
 0x607   : > { %2227 = vmatpush3.msra.mxu1 %v2643_v60 }
 0x6a8   : > { %v1535_v45 = vpop.f32.mrf.mxu1 }
 0x6a9   : > { %v1542_v46 = vrot.slane %v1535_v45, %v2679_v23 }
 0x6aa   : > { %v2195_v47 = vpop.f32.mrf.mxu1 }
 0x6ab   : > { %v1543_v48 = vsub.f32 %v1364_v18, %v1542_v46 }
 0x6ad   : > { %v1544_v49 = vmul.f32 %v1543_v48, %v1543_v48 }
 0x6af   : > { %v1545_v50 = vrot.slane %v1544_v49, 4 }
 0x6b1   : > { %v1546_v51 = vadd.f32 %v1545_v50, %v1544_v49 }
 0x6b3   : > { %v1547_v52 = vrot.slane %v1546_v51, 2 }
 0x6b5   : > { %v1548_v53 = vadd.f32 %v1547_v52, %v1546_v51 }
 0x6b7   : > { %v1549_v54 = vrot.slane %v1548_v53, 1 }
 0x6b9   : > { %v1550_v55 = vadd.f32 %v1549_v54, %v1548_v53 }
 0x6bb   : > { %2229 = vmatmul.mubr.f32.vlgmr.msra.gmra.mxu1 %v1550_v55 }
 0x77b   : > { %v1617_v56 = vpop.f32.mrf.mxu1 }
 0x77c   : > { %v1621_v57 = vmul.f32 0.015625, %v1617_v56 }
 0x77d   : > { %v2230_v1 = vpop.f32.mrf.mxu1 }
 0x77e   : > { %2236 = vmatmul.mubr.msk.f32.vlgmr.msra.gmra.mxu0 %vm785_vm6, %v1621_v57 }
 0x83e   : > { %v1691_v58 = vpop.f32.mrf.mxu0 }
 0x83f   : > { %v1692_v59 = vadd.f32 1e-05, %v1691_v58 }
 0x840   : > { %v2237_v60 = vpop.f32.mrf.mxu0 }
 0x841   : > { %2302 = vrsqrt.f32 %v1692_v59 }
 0x84e   : > { %v2303_v33 = vpop.eup %2302 }
 0x84f   : > { %v1699_v34 = vrot.slane %v2303_v33, %v2679_v23 }
 0x851   : > { %v1700_v28 = vmul.f32 %v1699_v34, %v1543_v48 }
 0x853   : > { %v1707_v40 = vmul.f32 %v1879_v38, %v1700_v28 }
 0x855   : > { %v1714_v42 = vadd.f32 %v1880_v39, %v1707_v40 }
 0x857   : > { %v1726_v23 = vadd.f32 %v1724_v41, %v1714_v42 }
 0x859   : > { %v1727_v43 = vmax.f32 %v1726_v23, 0.0 }
 0x85b   : > { %v1887_v44 = vpack.c.bf16 %v1727_v43, %v1727_v43 }
 0x85d   : > { %v1739_v61 = vshrl.u32 %v1887_v44, 16  ;;  %v1742_v63 = vshll.u32 %v1887_v44, 16 }
 0x85f   : > { %v1741_v62 = vrot.slane %v1739_v61, 7 }
 0x861   : > { %v1744_v3 = vor.u32 %v1742_v63, %v1741_v62  ;;  %v1745_v4 = vrot.slane %v1741_v62, 4 }
 0x863   : > { %v1749_v5 = vsel %vm2779_vm8, %v1744_v3, %v1748_v0  ;;  %v1752_v6 = vsel %vm2474_vm3, %v1745_v4, %v1751_v2 }
 0x864   : > { %1750 = vst [vmem:[%s2468_s15] sm:$0xf] %v1749_v5  ;;  %1753 = vst [vmem:[%s2468_s15 + $0x4] sm:$0x1] %v1752_v6 }
 0x865 PF: > { %s21_s17 = sadd.s32 1, %s2310_s17  }
 0x866   : > { %p18_p4 = scmp.ge.s32.totalorder %s21_s17, 4  }
 0x868   :  { %20 = sbr.rel (!%p18_p4) target bundleno = 1 (0x1), region = 94 }

// kernel: mel_encoder_forward.10
= control target key start
LH: loop header
LB: loop body
LE: loop exit
PB: predicated region body
PF: predicated region fallthrough
CT: control target
= control target key end

     0   :  { %s2230_s17 = smov 0   ;;  %s2619_s0 = inlined_call_operand.vmem [shape: bf16[2,18,64], index: 0, kind: input, shape index: {}]   ;;  %s2620_s1 = inlined_call_operand.vmem [shape: bf16[192,64], index: 1, kind: input, shape index: {}]   ;;  %s2621_s2 = inlined_call_operand.vmem [shape: f32[1,64], index: 2, kind: input, shape index: {}]   ;;  %s2622_s3 = inlined_call_operand.vmem [shape: f32[1,64], index: 3, kind: input, shape index: {}]   ;;  %s2623_s4 = inlined_call_operand.vmem [shape: f32[1,64], index: 4, kind: input, shape index: {}]   ;;  %s2624_s5 = inlined_call_operand.vmem [shape: bf16[192,64], index: 5, kind: input, shape index: {}]   ;;  %s2625_s6 = inlined_call_operand.vmem [shape: f32[1,64], index: 6, kind: input, shape index: {}]   ;;  %s2626_s7 = inlined_call_operand.vmem [shape: f32[1,64], index: 7, kind: input, shape index: {}]   ;;  %s2627_s8 = inlined_call_operand.vmem [shape: f32[1,64], index: 8, kind: input, shape index: {}]   ;;  %s2628_s9 = inlined_call_operand.vmem [shape: f32[64,8], index: 9, kind: input, shape index: {}]   ;;  %s2629_s10 = inlined_call_operand.vmem [shape: f32[8,64], index: 10, kind: input, shape index: {}]   ;;  %s2630_s11 = inlined_call_operand.vmem [shape: bf16[2,18,64], index: 11, kind: output, shape index: {}]  }
   0x1 LB: > { %s1802_s18 = sadd.s32 4294967295, %s2166_s17   ;;  %p1806_p0 = scmp.ge.s32.totalorder %s2166_s17, 1  ;;  %s2166_s17 = sphi %s2230_s17, %s21_s17  }
   0x2   : > { %p337_p1 = scmp.lt.s32.totalorder %s2166_s17, 3 }
   0x4   : > { %p338_p2 = pnand %p1806_p0, %p337_p1 }
   0x5   : > { %p377_p3 = scmp.lt.s32.totalorder (!%p338_p2), %s1802_s18, 1 }
   0x6   : > { %341 = sbr.rel (%p338_p2) target bundleno = 2177 (0x881), region = 64 }
   0xb   : > { %v2126_v0 = vld [vmem:[%s2620_s1 + $0x38] sm:$0xff]   ;;  %v2168_v1 = vmov 0.0   ;;  %v2128_v3 = vld [vmem:[%s2620_s1 + $0x30] sm:$0xff]   ;;  %vm2169_vm0 = vmmov 0   ;;  %s2640_s18 = smov (!%p377_p3, %s1802_s18), 1  ;;  %v2130_v5 = vld [vmem:[%s2620_s1 + $0x28] sm:$0xff]  }
   0xc   : > { %1947 = vmatprep.subr.bf16.mxu0 %v2168_v1  ;;  %1959 = vmatprep.subr.bf16.mxu1 %v2168_v1  ;;  %v2127_v2 = vld [vmem:[%s2620_s1 + $0x18] sm:$0xff]   ;;  %v2129_v4 = vld [vmem:[%s2620_s1 + $0x10] sm:$0xff]   ;;  %s2115_s29 = smul.u32 12, %s2640_s18  ;;  %v2131_v6 = vld [vmem:[%s2620_s1 + $0x8] sm:$0xff]   ;;  %vm415_vm1 = vsmask.f32 7424 }
   0xd   : > { %1948 = vmatpush3.bf16.msra.mxu0 %v2126_v0  ;;  %1955 = vmatprep.mubr.msk.bf16.mxu0 %vm2169_vm0, %v2168_v1  ;;  %v2132_v9 = vld [vmem:[%s2620_s1 + $0x20] sm:$0xff]   ;;  %vm452_vm2 = vcmask 523264   ;;  %v2136_v18 = vld [vmem:[%s2620_s1 + $0x58] sm:$0xff]   ;;  %v2137_v21 = vld [vmem:[%s2620_s1 + $0x50] sm:$0xff]   ;;  %vm576_vm3 = vcmask 1046528   ;;  %vm753_vm4 = vcmask 64512  }
   0xe   : > { %1960 = vmatpush3.bf16.msra.mxu1 %v2127_v2  ;;  %1949 = vmatprep.subr.bf16.mxu0 %v2168_v1  ;;  %s2274_s15 = scalar_lea.vmem %s2619_s0, %s2115_s29  ;;  %v2133_v12 = vld [vmem:[%s2620_s1] sm:$0xff]   ;;  %v2138_v23 = vld [vmem:[%s2620_s1 + $0x48] sm:$0xff]   ;;  %v2320_v29 = vld [vmem:[%s2628_s9 + $0x38] sm:$0xff]  ;;  %vm1016_vm5 = vcmask 516096   ;;  %vm1017_vm6 = vsmask.f32 256  ;;  %s2451_s24 = scalar_lea.vmem %s2630_s11, %s2115_s29 }
   0xf   : > { %1961 = vmatprep.subr.bf16.mxu1 %v2168_v1  ;;  %1967 = vmatprep.mubr.msk.bf16.mxu1 %vm2169_vm0, %v2168_v1  ;;  %v388_v7 = vld [vmem:[%s2274_s15] sm:$0xf]  ;;  %v389_v8 = vld [vmem:[%s2274_s15 + $0x4] sm:$0xf]  ;;  %v2328_v30 = vld [vmem:[%s2628_s9 + $0x30] sm:$0xff]  ;;  %vm1055_vm11 = vcmask 519168  }
  0x10   : > { %v1809_v10 = vcombine.low %v388_v7, %v389_v8  ;;  %v2135_v11 = vld [vmem:[%s2274_s15 + $0x8] ss:$0 sps:$4 sm:$0x11]   ;;  %v564_v22 = vld [vmem:[%s2274_s15] sm:$0xe]  ;;  %v2355_v33 = vld [vmem:[%s2628_s9 + $0x18] sm:$0xff] }
  0x11   : > { %1950 = vmatpush3.bf16.msra.mxu0 %v2128_v3  ;;  %v424_v15 = vshll.u32 %v2135_v11, 16  ;;  %v1821_v24 = vcombine.low %v564_v22, %v389_v8  ;;  %v2139_v25 = vld [vmem:[%s2620_s1 + $0x40] sm:$0xff]   ;;  %v578_v27 = vrot.slane %v2135_v11, 1  ;;  %v2337_v31 = vld [vmem:[%s2628_s9 + $0x28] sm:$0xff]  ;;  %v2364_v34 = vld [vmem:[%s2628_s9 + $0x10] sm:$0xff] }
  0x12   : > { %1962 = vmatpush3.bf16.msra.mxu1 %v2129_v4  ;;  %1951 = vmatprep.subr.bf16.mxu0 %v2168_v1  ;;  %v417_v13 = vshrl.u32 %v1809_v10, 16  ;;  %v419_v14 = vshll.u32 %v1809_v10, 16  ;;  %v2346_v32 = vld [vmem:[%s2628_s9 + $0x20] sm:$0xff]  ;;  %v2373_v35 = vld [vmem:[%s2628_s9 + $0x8] sm:$0xff]  ;;  %vm1022_vm7 = vsmask.f32 7938  ;;  %vm2429_vm8 = vmand %vm1016_vm5, %vm1017_vm6 }
  0x13   : > { %1963 = vmatprep.subr.bf16.mxu1 %v2168_v1  ;;  %v426_v17 = vrot.slane %v424_v15, 1  ;;  %v577_v26 = vrot.slane %v1821_v24, 1  ;;  %v2382_v36 = vld [vmem:[%s2628_s9] sm:$0xff]  ;;  %vm2436_vm9 = vmand %vm1016_vm5, %vm1022_vm7  ;;  %vm1033_vm10 = vsmask.f32 4368 }
  0x14   : > { %v421_v16 = vrot.slane %v419_v14, 1  ;;  %v1827_v48 = vld [vmem:[%s2621_s2] ss:$0 sm:$0xff]  ;;  %vm2499_vm12 = vmor %vm1017_vm6, %vm1033_vm10 }
  0x15   : > { %1952 = vmatpush3.bf16.msra.mxu0 %v2130_v5  ;;  %v579_v28 = vsel %vm576_vm3, %v577_v26, %v578_v27  ;;  %v2397_v2 = vld [vmem:[%s2629_s10] sm:$0xff]  ;;  %vm2505_vm13 = vmand %vm1055_vm11, %vm1022_vm7 }
  0x16   : > { %1964 = vmatpush3.bf16.msra.mxu1 %v2131_v6  ;;  %1953 = vmatprep.subr.bf16.mxu0 %v2168_v1  ;;  %v422_v19 = vor.u32 %v421_v16, %v417_v13  ;;  %v827_v6 = vlaneseq }
  0x17   : > { %1965 = vmatprep.subr.bf16.mxu1 %v2168_v1 }
  0x18   : > { %v427_v20 = vsel %vm415_vm1, %v422_v19, %v426_v17  ;;  %v828_v7 = vshrl.u32 %v827_v6, 7 }
  0x19   : > { %1954 = vmatpush3.bf16.msra.mxu0 %v2132_v9 }
  0x1a   : > { %1966 = vmatpush3.bf16.msra.mxu1 %v2133_v12  ;;  %1971 = vmatprep.subr.bf16.mxu0 %v2168_v1  ;;  %v2409_v8 = vsub.s32 0, %v828_v7 }
  0x1b   : > { %1983 = vmatprep.subr.mxu1 %v2168_v1 }
  0x1c   : > { %1956 = vmatmul.mubr.msk.bf16.vlgmr.msra.gmra.mxu0 %vm452_vm2, %v427_v20 }
  0x1d   : > { %1968 = vmatmul.mubr.msk.bf16.vlgmr.msra.gmra.mxu1 %vm452_vm2, %v1809_v10  ;;  %1972 = vmatpush3.bf16.msra.mxu0 %v2136_v18 }
  0x1e   : > { %1999 = vmatprep.mubr.msk.f32.mxu1 %vm2169_vm0, %v2168_v1  ;;  %1979 = vmatprep.mubr.msk.bf16.mxu0 %vm2169_vm0, %v2168_v1 }
  0x1f   : > { %1973 = vmatprep.subr.bf16.mxu0 %v2168_v1  ;;  %1984 = vmatpush3.msra.mxu1 %v2320_v29 }
  0x20   : > { %1985 = vmatprep.subr.mxu1 %v2168_v1 }
  0x21   : > { %1974 = vmatpush3.bf16.msra.mxu0 %v2137_v21  ;;  %1986 = vmatpush3.msra.mxu1 %v2328_v30 }
  0x22   : > { %1975 = vmatprep.subr.bf16.mxu0 %v2168_v1  ;;  %1987 = vmatprep.subr.mxu1 %v2168_v1 }
  0x23   : > { %1988 = vmatpush3.msra.mxu1 %v2337_v31 }
  0x24   : > { %1989 = vmatprep.subr.mxu1 %v2168_v1 }
  0x25   : > { %1976 = vmatpush3.bf16.msra.mxu0 %v2138_v23  ;;  %1990 = vmatpush3.msra.mxu1 %v2346_v32 }
  0x26   : > { %1977 = vmatprep.subr.bf16.mxu0 %v2168_v1  ;;  %1991 = vmatprep.subr.mxu1 %v2168_v1 }
  0x27   : > { %1992 = vmatpush3.msra.mxu1 %v2355_v33 }
  0x28   : > { %1993 = vmatprep.subr.mxu1 %v2168_v1 }
  0x29   : > { %1978 = vmatpush3.bf16.msra.mxu0 %v2139_v25  ;;  %1994 = vmatpush3.msra.mxu1 %v2364_v34 }
  0x2a   : > { %2007 = vmatprep.subr.mxu0 %v2168_v1  ;;  %1995 = vmatprep.subr.mxu1 %v2168_v1 }
  0x2b   : > { %1996 = vmatpush3.msra.mxu1 %v2373_v35 }
  0x2c   : > { %1980 = vmatmul.mubr.msk.bf16.vlgmr.msra.gmra.mxu0 %vm452_vm2, %v579_v28  ;;  %1997 = vmatprep.subr.mxu1 %v2168_v1 }
  0x2d   : > { %2023 = vmatprep.mubr.msk.f32.mxu0 %vm2169_vm0, %v2168_v1  ;;  %2008 = vmatpush3.msra.mxu0 %v2320_v29 }
  0x2e   : > { %2009 = vmatprep.subr.mxu0 %v2168_v1  ;;  %1998 = vmatpush3.msra.mxu1 %v2382_v36 }
  0x2f   : > { %2010 = vmatpush3.msra.mxu0 %v2328_v30  ;;  %2002 = vmatprep.subr.mxu1 %v2168_v1 }
  0x30   : > { %2011 = vmatprep.subr.mxu0 %v2168_v1 }
  0x31   : > { %2012 = vmatpush3.msra.mxu0 %v2337_v31 }
  0x32   : > { %2013 = vmatprep.subr.mxu0 %v2168_v1 }
  0x33   : > { %2014 = vmatpush3.msra.mxu0 %v2346_v32 }
  0x34   : > { %2015 = vmatprep.subr.mxu0 %v2168_v1 }
  0x35   : > { %2016 = vmatpush3.msra.mxu0 %v2355_v33 }
  0x36   : > { %2017 = vmatprep.subr.mxu0 %v2168_v1 }
  0x37   : > { %2018 = vmatpush3.msra.mxu0 %v2364_v34 }
  0x38   : > { %2019 = vmatprep.subr.mxu0 %v2168_v1 }
  0x39   : > { %2020 = vmatpush3.msra.mxu0 %v2373_v35 }
  0x3a   : > { %2021 = vmatprep.subr.mxu0 %v2168_v1 }
  0x3b   : > { %2022 = vmatpush3.msra.mxu0 %v2382_v36 }
  0x3c   : > { %2043 = vmatprep.subr.bf16.mxu0 %v2168_v1 }
  0xdc   : > { %v490_v38 = vpop.f32.mrf.mxu0 }
  0xdd   : > { %v557_v37 = vpop.f32.mrf.mxu1 }
  0xde   : > { %v1957_v40 = vpop.f32.mrf.mxu0  ;;  %v558_v45 = vadd.f32 %v557_v37, %v490_v38  ;;  %v1019_v37 = vld [vmem:[#allocation2] sm:$0x1]  ;;  %v1024_v38 = vld [vmem:[#allocation2 + $0x8] sm:$0x1] }
  0xdf   : > { %v1969_v39 = vpop.f32.mrf.mxu1 }
  0xe0   : > { %v493_v42 = vpop.f32.mrf.mxu0  ;;  %v1020_v39 = vsel %vm2429_vm8, 0, %v1019_v37 }
  0xe1   : > { %v560_v41 = vpop.f32.mrf.mxu1  ;;  %1021 = vst [vmem:[#allocation2] sm:$0x1] %v1020_v39 }
  0xe2   : > { %v1958_v44 = vpop.f32.mrf.mxu0  ;;  %v561_v50 = vadd.f32 %v560_v41, %v493_v42  ;;  %v1025_v41 = vsel %vm2436_vm9, 0, %v1024_v38  ;;  %v2141_v42 = vld [vmem:[%s2624_s5 + $0x18] sm:$0xff]  }
  0xe3   : > { %v1970_v43 = vpop.f32.mrf.mxu1  ;;  %1026 = vst [vmem:[#allocation2 + $0x8] sm:$0x1] %v1025_v41  ;;  %v2143_v44 = vld [vmem:[%s2624_s5 + $0x38] sm:$0xff]  }
  0xe4   : > { %v2142_v43 = vld [vmem:[%s2624_s5 + $0x10] sm:$0xff]  }
  0xec   : > { %v641_v46 = vpop.f32.mrf.mxu0 }
  0xed   : > { %v648_v47 = vadd.f32 %v641_v46, %v558_v45  ;;  %v1708_v45 = vld [vmem:[%s2451_s24] sm:$0x1]  ;;  %v1711_v46 = vld [vmem:[%s2451_s24 + $0x8] sm:$0x1] }
  0xee   : > { %v1981_v49 = vpop.f32.mrf.mxu0 }
  0xef   : > { %v657_v52 = vadd.f32 %v1827_v48, %v648_v47  ;;  %v2144_v47 = vld [vmem:[%s2624_s5 + $0x8] sm:$0xff]   ;;  %v1712_v49 = vsel %vm2436_vm9, 0, %v1711_v46  ;;  %v2151_v46 = vld [vmem:[%s2624_s5 + $0x58] sm:$0xff]  }
  0xf0   : > { %v644_v51 = vpop.f32.mrf.mxu0  ;;  %1713 = vst [vmem:[%s2451_s24 + $0x8] sm:$0x1] %v1712_v49 }
  0xf1   : > { %v649_v53 = vadd.f32 %v644_v51, %v561_v50  ;;  %v670_v56 = vsel %vm452_vm2, %v657_v52, 0.0  ;;  %v2145_v50 = vld [vmem:[%s2624_s5 + $0x30] sm:$0xff]   ;;  %v2146_v51 = vld [vmem:[%s2624_s5] sm:$0xff]  }
  0xf2   : > { %v1982_v54 = vpop.f32.mrf.mxu0 }
  0xf3   : > { %v658_v55 = vadd.f32 %v1827_v48, %v649_v53  ;;  %v1709_v48 = vsel %vm2429_vm8, 0, %v1708_v45  ;;  %v2149_v53 = vld [vmem:[%s2624_s5 + $0x20] sm:$0xff]  }
  0xf4   : > { %1710 = vst [vmem:[%s2451_s24] sm:$0x1] %v1709_v48  ;;  %v2152_v48 = vld [vmem:[%s2624_s5 + $0x50] sm:$0xff]  }
  0xf5   : > { %v671_v57 = vsel %vm452_vm2, %v658_v55, 0.0 }
  0xf6   : > { %v672_v58 = vadd.f32 %v671_v57, %v670_v56 }
  0xf8   : > { %v673_v59 = vrot.slane %v672_v58, 4 }
  0xfa   : > { %v674_v60 = vadd.f32 %v673_v59, %v672_v58  ;;  %v1832_v59 = vld [vmem:[%s2622_s3] ss:$0 sm:$0xff] }
  0xfc   : > { %v675_v61 = vrot.slane %v674_v60, 2 }
  0xfe   : > { %v676_v62 = vadd.f32 %v675_v61, %v674_v60 }
 0x100   : > { %v677_v63 = vrot.slane %v676_v62, 1 }
 0x102   : > { %v678_v0 = vadd.f32 %v677_v63, %v676_v62  ;;  %v1833_v62 = vld [vmem:[%s2623_s4] ss:$0 sm:$0xff] }
 0x104   : > { %2000 = vmatmul.mubr.msk.f32.vlgmr.msra.gmra.mxu1 %vm452_vm2, %v678_v0 }
 0x105   : > { %2003 = vmatpush3.msra.mxu1 %v2397_v2  ;;  %2004 = vmatprep.mubr.msk.f32.mxu1 %vm2169_vm0, %v2168_v1 }
 0x106   : > { %2026 = vmatprep.subr.mxu1 %v2168_v1 }
 0x1c4   : > { %v748_v3 = vpop.f32.mrf.mxu1 }
 0x1c5   : > { %v752_v4 = vmul.f32 0.0078125, %v748_v3 }
 0x1c6   : > { %v2001_v5 = vpop.f32.mrf.mxu1 }
 0x1c7   : > { %2005 = vmatmul.mubr.msk.f32.vlgmr.msra.gmra.mxu1 %vm753_vm4, %v752_v4 }
 0x1c8   : > { %2027 = vmatpush3.msra.mxu1 %v2397_v2  ;;  %2028 = vmatprep.mubr.msk.f32.mxu1 %vm2169_vm0, %v2168_v1 }
 0x1c9   : > { %2031 = vmatprep.subr.bf16.mxu1 %v2168_v1 }
 0x287   : > { %v823_v9 = vpop.f32.mrf.mxu1 }
 0x288   : > { %v830_v10 = vrot.slane %v823_v9, %v2409_v8 }
 0x289   : > { %v2006_v11 = vpop.f32.mrf.mxu1 }
 0x28a   : > { %v2412_v12 = vsub.f32 %v657_v52, %v830_v10  ;;  %v2414_v13 = vsub.f32 %v658_v55, %v830_v10  ;;  %v2147_v52 = vld [vmem:[%s2624_s5 + $0x28] sm:$0xff]  }
 0x28c   : > { %v833_v14 = vmul.f32 %v2412_v12, %v2412_v12  ;;  %v834_v15 = vmul.f32 %v2414_v13, %v2414_v13 }
 0x28e   : > { %v835_v16 = vsel %vm452_vm2, %v833_v14, 0.0  ;;  %v836_v17 = vsel %vm452_vm2, %v834_v15, 0.0 }
 0x28f   : > { %v837_v18 = vadd.f32 %v836_v17, %v835_v16 }
 0x291   : > { %v838_v19 = vrot.slane %v837_v18, 4 }
 0x293   : > { %v839_v20 = vadd.f32 %v838_v19, %v837_v18  ;;  %v1057_v18 = vld [vmem:[#allocation2] sm:$0xf]  ;;  %v1062_v19 = vld [vmem:[#allocation2 + $0x8] sm:$0x1] }
 0x295   : > { %v840_v21 = vrot.slane %v839_v20, 2 }
 0x297   : > { %v841_v22 = vadd.f32 %v840_v21, %v839_v20 }
 0x299   : > { %v842_v23 = vrot.slane %v841_v22, 1 }
 0x29b   : > { %v843_v24 = vadd.f32 %v842_v23, %v841_v22 }
 0x29d   : > { %2024 = vmatmul.mubr.msk.f32.vlgmr.msra.gmra.mxu0 %vm452_vm2, %v843_v24 }
 0x29e   : > { %2051 = vmatprep.mubr.msk.bf16.mxu0 %vm2169_vm0, %v2168_v1  ;;  %2044 = vmatpush3.bf16.msra.mxu0 %v2141_v42 }
 0x29f   : > { %2045 = vmatprep.subr.bf16.mxu0 %v2168_v1 }
 0x2a2   : > { %2046 = vmatpush3.bf16.msra.mxu0 %v2142_v43 }
 0x2a3   : > { %2047 = vmatprep.subr.bf16.mxu0 %v2168_v1 }
 0x2a6   : > { %2048 = vmatpush3.bf16.msra.mxu0 %v2144_v47 }
 0x2a7   : > { %2049 = vmatprep.subr.bf16.mxu0 %v2168_v1 }
 0x2aa   : > { %2050 = vmatpush3.bf16.msra.mxu0 %v2146_v51 }
 0x2ab   : > { %2067 = vmatprep.subr.mxu0 %v2168_v1 }
 0x35d   : > { %v913_v25 = vpop.f32.mrf.mxu0 }
 0x35e   : > { %v917_v26 = vmul.f32 0.0078125, %v913_v25 }
 0x35f   : > { %v2025_v27 = vpop.f32.mrf.mxu0 }
 0x360   : > { %2029 = vmatmul.mubr.msk.f32.vlgmr.msra.gmra.mxu1 %vm753_vm4, %v917_v26 }
 0x361   : > { %2039 = vmatprep.mubr.msk.bf16.mxu1 %vm2169_vm0, %v2168_v1  ;;  %2032 = vmatpush3.bf16.msra.mxu1 %v2143_v44 }
 0x362   : > { %2033 = vmatprep.subr.bf16.mxu1 %v2168_v1 }
 0x365   : > { %2034 = vmatpush3.bf16.msra.mxu1 %v2145_v50  ;;  %v2153_v50 = vld [vmem:[%s2624_s5 + $0x48] sm:$0xff]  }
 0x366   : > { %2035 = vmatprep.subr.bf16.mxu1 %v2168_v1 }
 0x369   : > { %2036 = vmatpush3.bf16.msra.mxu1 %v2147_v52  ;;  %v2154_v52 = vld [vmem:[%s2624_s5 + $0x40] sm:$0xff]  }
 0x36a   : > { %2037 = vmatprep.subr.bf16.mxu1 %v2168_v1 }
 0x36d   : > { %2038 = vmatpush3.bf16.msra.mxu1 %v2149_v53 }
 0x36e   : > { %2055 = vmatprep.subr.bf16.mxu1 %v2168_v1 }
 0x420   : > { %v987_v54 = vpop.f32.mrf.mxu1 }
 0x421   : > { %v988_v55 = vadd.f32 1e-05, %v987_v54 }
 0x422   : > { %v2030_v56 = vpop.f32.mrf.mxu1 }
 0x423   : > { %2156 = vrsqrt.f32 %v988_v55 }
 0x430   : > { %v2157_v57 = vpop.eup %2156 }
 0x431   : > { %v995_v58 = vrot.slane %v2157_v57, %v2409_v8 }
 0x433   : > { %v996_v60 = vmul.f32 %v995_v58, %v2412_v12  ;;  %v997_v61 = vmul.f32 %v995_v58, %v2414_v13 }
 0x435   : > { %v1004_v63 = vmul.f32 %v1832_v59, %v996_v60  ;;  %v1005_v0 = vmul.f32 %v1832_v59, %v997_v61 }
 0x437   : > { %v1012_v3 = vadd.f32 %v1833_v62, %v1004_v63  ;;  %v1013_v4 = vadd.f32 %v1833_v62, %v1005_v0 }
 0x439   : > { %v1014_v5 = vmax.f32 %v1012_v3, 0.0  ;;  %v1015_v6 = vmax.f32 %v1013_v4, 0.0 }
 0x43b   : > { %v1865_v7 = vpack.c.bf16 %v1014_v5, %v1014_v5  ;;  %v1866_v9 = vpack.c.bf16 %v1015_v6, %v1015_v6  ;;  %v1854_v5 = vld [vmem:[%s2625_s6] ss:$0 sm:$0xff] }
 0x43d   : > { %v1036_v10 = vshrl.u32 %v1865_v7, 16  ;;  %v1044_v11 = vshrl.u32 %v1866_v9, 16  ;;  %v1039_v14 = vshll.u32 %v1865_v7, 16  ;;  %v1047_v16 = vshll.u32 %v1866_v9, 16 }
 0x43f   : > { %v1038_v13 = vrot.slane %v1036_v10, 7  ;;  %v1046_v15 = vrot.slane %v1044_v11, 7 }
 0x441   : > { %v1041_v20 = vor.u32 %v1039_v14, %v1038_v13  ;;  %v1042_v21 = vrot.slane %v1038_v13, 4  ;;  %v1049_v22 = vor.u32 %v1047_v16, %v1046_v15  ;;  %v1051_v23 = vrot.slane %v1046_v15, 4 }
 0x443   : > { %v1050_v24 = vsel %vm2499_vm12, %v1042_v21, %v1049_v22  ;;  %v1058_v25 = vsel %vm2505_vm13, %v1041_v20, %v1057_v18  ;;  %v1063_v26 = vsel %vm2429_vm8, %v1051_v23, %v1062_v19 }
 0x444   : > { %1059 = vst [vmem:[#allocation2] sm:$0xf] %v1058_v25  ;;  %1061 = vst.msk [vmem:[#allocation2 + $0x4] sm:$0xf] %vm1055_vm11, %v1050_v24 }
 0x445   : > { %1064 = vst [vmem:[#allocation2 + $0x8] sm:$0x1] %v1063_v26 }
 0x44b   : > { %v1065_v27 = vld [vmem:[#allocation2] sm:$0xf]  ;;  %v1066_v37 = vld [vmem:[#allocation2 + $0x4] sm:$0xf] }
 0x44c   : > { %v1836_v38 = vcombine.low %v1065_v27, %v1066_v37  ;;  %v2150_v39 = vld [vmem:[#allocation2 + $0x8] ss:$0 sps:$4 sm:$0x11]   ;;  %v1239_v49 = vld [vmem:[#allocation2] sm:$0xe] }
 0x44d   : > { %v1100_v41 = vshll.u32 %v2150_v39, 16  ;;  %v1848_v51 = vcombine.low %v1239_v49, %v1066_v37  ;;  %v1252_v54 = vrot.slane %v2150_v39, 1  ;;  %v1870_v49 = vld [vmem:[%s2274_s15] sm:$0xff]  }
 0x44e   : > { %2052 = vmatmul.mubr.msk.bf16.vlgmr.msra.gmra.mxu0 %vm452_vm2, %v1836_v38  ;;  %v1095_v40 = vshll.u32 %v1836_v38, 16  ;;  %v1093_v42 = vshrl.u32 %v1836_v38, 16 }
 0x44f   : > { %2068 = vmatpush3.msra.mxu0 %v2320_v29  ;;  %2083 = vmatprep.mubr.msk.f32.mxu0 %vm2169_vm0, %v2168_v1  ;;  %v1102_v45 = vrot.slane %v1100_v41, 1  ;;  %v1251_v53 = vrot.slane %v1848_v51, 1  ;;  %v1871_v51 = vunpack.c.l.bf16 %v1870_v49 }
 0x450   : > { %v1097_v43 = vrot.slane %v1095_v40, 1  ;;  %2069 = vmatprep.subr.mxu0 %v2168_v1 }
 0x451   : > { %2070 = vmatpush3.msra.mxu0 %v2328_v30  ;;  %v1253_v55 = vsel %vm576_vm3, %v1251_v53, %v1252_v54 }
 0x452   : > { %v1098_v44 = vor.u32 %v1097_v43, %v1093_v42  ;;  %2071 = vmatprep.subr.mxu0 %v2168_v1 }
 0x453   : > { %2072 = vmatpush3.msra.mxu0 %v2337_v31 }
 0x454   : > { %v1103_v47 = vsel %vm415_vm1, %v1098_v44, %v1102_v45  ;;  %2073 = vmatprep.subr.mxu0 %v2168_v1 }
 0x455   : > { %2040 = vmatmul.mubr.msk.bf16.vlgmr.msra.gmra.mxu1 %vm452_vm2, %v1103_v47  ;;  %2074 = vmatpush3.msra.mxu0 %v2346_v32 }
 0x456   : > { %2056 = vmatpush3.bf16.msra.mxu1 %v2151_v46  ;;  %2063 = vmatprep.mubr.msk.bf16.mxu1 %vm2169_vm0, %v2168_v1 }
 0x457   : > { %2057 = vmatprep.subr.bf16.mxu1 %v2168_v1  ;;  %2075 = vmatprep.subr.mxu0 %v2168_v1 }
 0x458   : > { %2076 = vmatpush3.msra.mxu0 %v2355_v33 }
 0x459   : > { %2077 = vmatprep.subr.mxu0 %v2168_v1 }
 0x45a   : > { %2058 = vmatpush3.bf16.msra.mxu1 %v2152_v48  ;;  %2078 = vmatpush3.msra.mxu0 %v2364_v34 }
 0x45b   : > { %2059 = vmatprep.subr.bf16.mxu1 %v2168_v1  ;;  %2079 = vmatprep.subr.mxu0 %v2168_v1 }
 0x45c   : > { %2080 = vmatpush3.msra.mxu0 %v2373_v35 }
 0x45d   : > { %2081 = vmatprep.subr.mxu0 %v2168_v1 }
 0x45e   : > { %2060 = vmatpush3.bf16.msra.mxu1 %v2153_v50  ;;  %2082 = vmatpush3.msra.mxu0 %v2382_v36  ;;  %v1689_v50 = vld [vmem:[%s2274_s15 + $0x8] sm:$0x1] }
 0x45f   : > { %2061 = vmatprep.subr.bf16.mxu1 %v2168_v1  ;;  %2091 = vmatprep.subr.mxu0 %v2168_v1  ;;  %v1692_v53 = vunpack.c.l.bf16 %v1689_v50 }
 0x462   : > { %2062 = vmatpush3.bf16.msra.mxu1 %v2154_v52  ;;  %v1872_v52 = vunpack.c.h.bf16 %v1870_v49 }
 0x463   : > { %2086 = vmatprep.subr.mxu1 %v2168_v1 }
 0x465   : > { %2064 = vmatmul.mubr.msk.bf16.vlgmr.msra.gmra.mxu1 %vm452_vm2, %v1253_v55 }
 0x466   : > { %2087 = vmatpush3.msra.mxu1 %v2397_v2  ;;  %2088 = vmatprep.mubr.msk.f32.mxu1 %vm2169_vm0, %v2168_v1 }
 0x467   : > { %2110 = vmatprep.subr.mxu1 %v2168_v1 }
 0x50e   : > { %v1232_v56 = vpop.f32.mrf.mxu0 }
 0x510   : > { %v2053_v57 = vpop.f32.mrf.mxu0 }
 0x511   : > { %v1698_v57 = vrot.slane %v1872_v52, 1 }
 0x512   : > { %v1235_v58 = vpop.f32.mrf.mxu0 }
 0x514   : > { %v2054_v59 = vpop.f32.mrf.mxu0 }
 0x515   : > { %v1165_v60 = vpop.f32.mrf.mxu1  ;;  %v1859_v59 = vld [vmem:[%s2626_s7] ss:$0 sm:$0xff] }
 0x516   : > { %v1233_v0 = vadd.f32 %v1232_v56, %v1165_v60  ;;  %v1697_v56 = vrot.slane %v1871_v51, 1 }
 0x517   : > { %v2041_v61 = vpop.f32.mrf.mxu1 }
 0x519   : > { %v1168_v62 = vpop.f32.mrf.mxu1 }
 0x51a   : > { %v1236_v7 = vadd.f32 %v1235_v58, %v1168_v62  ;;  %v1700_v58 = vrot.slane %v1692_v53, 1  ;;  %v1860_v62 = vld [vmem:[%s2627_s8] ss:$0 sm:$0xff] }
 0x51b   : > { %v2042_v63 = vpop.f32.mrf.mxu1 }
 0x525   : > { %v1315_v3 = vpop.f32.mrf.mxu1 }
 0x526   : > { %v1322_v4 = vadd.f32 %v1315_v3, %v1233_v0  ;;  %v1699_v3 = vsel %vm576_vm3, %v1697_v56, %v1698_v57 }
 0x527   : > { %v2065_v6 = vpop.f32.mrf.mxu1 }
 0x528   : > { %v1331_v10 = vadd.f32 %v1854_v5, %v1322_v4 }
 0x529   : > { %v1318_v9 = vpop.f32.mrf.mxu1 }
 0x52a   : > { %v1323_v11 = vadd.f32 %v1318_v9, %v1236_v7  ;;  %v1344_v15 = vsel %vm452_vm2, %v1331_v10, 0.0 }
 0x52b   : > { %v2066_v13 = vpop.f32.mrf.mxu1 }
 0x52c   : > { %v1332_v14 = vadd.f32 %v1854_v5, %v1323_v11 }
 0x52e   : > { %v1345_v16 = vsel %vm452_vm2, %v1332_v14, 0.0 }
 0x52f   : > { %v1346_v18 = vadd.f32 %v1345_v16, %v1344_v15 }
 0x531   : > { %v1347_v19 = vrot.slane %v1346_v18, 4 }
 0x533   : > { %v1348_v20 = vadd.f32 %v1347_v19, %v1346_v18 }
 0x535   : > { %v1349_v21 = vrot.slane %v1348_v20, 2 }
 0x537   : > { %v1350_v22 = vadd.f32 %v1349_v21, %v1348_v20  ;;  %v1740_v21 = vld [vmem:[%s2451_s24] sm:$0xf] }
 0x539   : > { %v1351_v23 = vrot.slane %v1350_v22, 1 }
 0x53b   : > { %v1352_v24 = vadd.f32 %v1351_v23, %v1350_v22  ;;  %v1744_v22 = vld [vmem:[%s2451_s24 + $0x8] sm:$0x1] }
 0x53d   : > { %2084 = vmatmul.mubr.msk.f32.vlgmr.msra.gmra.mxu0 %vm452_vm2, %v1352_v24 }
 0x53e   : > { %2092 = vmatpush3.msra.mxu0 %v2320_v29  ;;  %2107 = vmatprep.mubr.msk.f32.mxu0 %vm2169_vm0, %v2168_v1 }
 0x53f   : > { %2093 = vmatprep.subr.mxu0 %v2168_v1 }
 0x540   : > { %2094 = vmatpush3.msra.mxu0 %v2328_v30 }
 0x541   : > { %2095 = vmatprep.subr.mxu0 %v2168_v1 }
 0x542   : > { %2096 = vmatpush3.msra.mxu0 %v2337_v31 }
 0x543   : > { %2097 = vmatprep.subr.mxu0 %v2168_v1 }
 0x544   : > { %2098 = vmatpush3.msra.mxu0 %v2346_v32 }
 0x545   : > { %2099 = vmatprep.subr.mxu0 %v2168_v1 }
 0x546   : > { %2100 = vmatpush3.msra.mxu0 %v2355_v33 }
 0x547   : > { %2101 = vmatprep.subr.mxu0 %v2168_v1 }
 0x548   : > { %2102 = vmatpush3.msra.mxu0 %v2364_v34 }
 0x549   : > { %2103 = vmatprep.subr.mxu0 %v2168_v1 }
 0x54a   : > { %2104 = vmatpush3.msra.mxu0 %v2373_v35 }
 0x54b   : > { %2105 = vmatprep.subr.mxu0 %v2168_v1 }
 0x54c   : > { %2106 = vmatpush3.msra.mxu0 %v2382_v36 }
 0x5fd   : > { %v1422_v29 = vpop.f32.mrf.mxu0 }
 0x5fe   : > { %v1426_v30 = vmul.f32 0.0078125, %v1422_v29 }
 0x5ff   : > { %v2085_v31 = vpop.f32.mrf.mxu0 }
 0x600   : > { %2089 = vmatmul.mubr.msk.f32.vlgmr.msra.gmra.mxu1 %vm753_vm4, %v1426_v30 }
 0x601   : > { %2111 = vmatpush3.msra.mxu1 %v2397_v2  ;;  %2112 = vmatprep.mubr.msk.f32.mxu1 %vm2169_vm0, %v2168_v1 }
 0x6c0   : > { %v1496_v32 = vpop.f32.mrf.mxu1 }
 0x6c1   : > { %v1503_v33 = vrot.slane %v1496_v32, %v2409_v8 }
 0x6c2   : > { %v2090_v34 = vpop.f32.mrf.mxu1 }
 0x6c3   : > { %v1504_v25 = vsub.f32 %v1331_v10, %v1503_v33  ;;  %v1505_v35 = vsub.f32 %v1332_v14, %v1503_v33 }
 0x6c5   : > { %v1506_v26 = vmul.f32 %v1504_v25, %v1504_v25  ;;  %v1507_v27 = vmul.f32 %v1505_v35, %v1505_v35 }
 0x6c7   : > { %v1508_v36 = vsel %vm452_vm2, %v1506_v26, 0.0  ;;  %v1509_v37 = vsel %vm452_vm2, %v1507_v27, 0.0 }
 0x6c8   : > { %v1510_v38 = vadd.f32 %v1509_v37, %v1508_v36 }
 0x6ca   : > { %v1511_v39 = vrot.slane %v1510_v38, 4 }
 0x6cc   : > { %v1512_v2 = vadd.f32 %v1511_v39, %v1510_v38 }
 0x6ce   : > { %v1513_v40 = vrot.slane %v1512_v2, 2 }
 0x6d0   : > { %v1514_v41 = vadd.f32 %v1513_v40, %v1512_v2 }
 0x6d2   : > { %v1515_v1 = vrot.slane %v1514_v41, 1 }
 0x6d4   : > { %v1516_v42 = vadd.f32 %v1515_v1, %v1514_v41 }
 0x6d6   : > { %2108 = vmatmul.mubr.msk.f32.vlgmr.msra.gmra.mxu0 %vm452_vm2, %v1516_v42 }
 0x796   : > { %v1586_v43 = vpop.f32.mrf.mxu0 }
 0x797   : > { %v1590_v44 = vmul.f32 0.0078125, %v1586_v43 }
 0x798   : > { %v2109_v45 = vpop.f32.mrf.mxu0 }
 0x799   : > { %2113 = vmatmul.mubr.msk.f32.vlgmr.msra.gmra.mxu1 %vm753_vm4, %v1590_v44 }
 0x859   : > { %v1660_v46 = vpop.f32.mrf.mxu1 }
 0x85a   : > { %v1661_v47 = vadd.f32 1e-05, %v1660_v46 }
 0x85b   : > { %v2114_v48 = vpop.f32.mrf.mxu1 }
 0x85c   : > { %2158 = vrsqrt.f32 %v1661_v47 }
 0x869   : > { %v2159_v54 = vpop.eup %2158 }
 0x86a   : > { %v1668_v55 = vrot.slane %v2159_v54, %v2409_v8  ;;  %v1701_v8 = vsel %vm576_vm3, %v1698_v57, %v1700_v58 }
 0x86c   : > { %v1669_v60 = vmul.f32 %v1668_v55, %v1504_v25  ;;  %v1670_v61 = vmul.f32 %v1668_v55, %v1505_v35 }
 0x86e   : > { %v1677_v63 = vmul.f32 %v1859_v59, %v1669_v60  ;;  %v1678_v0 = vmul.f32 %v1859_v59, %v1670_v61 }
 0x870   : > { %v1685_v4 = vadd.f32 %v1860_v62, %v1677_v63  ;;  %v1686_v5 = vadd.f32 %v1860_v62, %v1678_v0 }
 0x872   : > { %v1704_v6 = vadd.f32 %v1699_v3, %v1685_v4  ;;  %v1705_v7 = vadd.f32 %v1701_v8, %v1686_v5 }
 0x874   : > { %v1706_v9 = vmax.f32 %v1704_v6, 0.0  ;;  %v1707_v10 = vmax.f32 %v1705_v7, 0.0 }
 0x876   : > { %v1867_v11 = vpack.c.bf16 %v1706_v9, %v1706_v9  ;;  %v1868_v13 = vpack.c.bf16 %v1707_v10, %v1707_v10 }
 0x878   : > { %v1721_v14 = vshrl.u32 %v1867_v11, 16  ;;  %v1729_v15 = vshrl.u32 %v1868_v13, 16  ;;  %v1724_v18 = vshll.u32 %v1867_v11, 16  ;;  %v1732_v20 = vshll.u32 %v1868_v13, 16 }
 0x87a   : > { %v1723_v16 = vrot.slane %v1721_v14, 7  ;;  %v1731_v19 = vrot.slane %v1729_v15, 7 }
 0x87c   : > { %v1726_v23 = vor.u32 %v1724_v18, %v1723_v16  ;;  %v1727_v24 = vrot.slane %v1723_v16, 4  ;;  %v1734_v29 = vor.u32 %v1732_v20, %v1731_v19  ;;  %v1736_v30 = vrot.slane %v1731_v19, 4 }
 0x87e   : > { %v1735_v31 = vsel %vm2499_vm12, %v1727_v24, %v1734_v29  ;;  %v1741_v32 = vsel %vm2505_vm13, %v1726_v23, %v1740_v21  ;;  %v1745_v33 = vsel %vm2429_vm8, %v1736_v30, %v1744_v22 }
 0x87f   : > { %1742 = vst [vmem:[%s2451_s24] sm:$0xf] %v1741_v32  ;;  %1743 = vst.msk [vmem:[%s2451_s24 + $0x4] sm:$0xf] %vm1055_vm11, %v1735_v31 }
 0x880   : > { %1746 = vst [vmem:[%s2451_s24 + $0x8] sm:$0x1] %v1745_v33 }
 0x881 PF: > { %s21_s17 = sadd.s32 1, %s2166_s17  }
 0x882   : > { %p18_p4 = scmp.ge.s32.totalorder %s21_s17, 4  }
 0x884   :  { %20 = sbr.rel (!%p18_p4) target bundleno = 1 (0x1), region = 94 }

// kernel: mel_encoder_forward.15
= control target key start
LH: loop header
LB: loop body
LE: loop exit
PB: predicated region body
PF: predicated region fallthrough
CT: control target
= control target key end

     0   :  { %s1473_s24 = smov 0   ;;  %s1957_s0 = inlined_call_operand.vmem [shape: bf16[2,5,256], index: 0, kind: input, shape index: {}]   ;;  %s1958_s1 = inlined_call_operand.vmem [shape: bf16[384,256], index: 1, kind: input, shape index: {}]   ;;  %s1959_s2 = inlined_call_operand.vmem [shape: f32[1,256], index: 2, kind: input, shape index: {}]   ;;  %s1960_s3 = inlined_call_operand.vmem [shape: f32[1,256], index: 3, kind: input, shape index: {}]   ;;  %s1961_s4 = inlined_call_operand.vmem [shape: f32[1,256], index: 4, kind: input, shape index: {}]   ;;  %s1962_s5 = inlined_call_operand.vmem [shape: f32[256,32], index: 5, kind: input, shape index: {}]   ;;  %s1963_s6 = inlined_call_operand.vmem [shape: f32[32,256], index: 6, kind: input, shape index: {}]   ;;  %s1964_s7 = inlined_call_operand.vmem [shape: bf16[2,6,256], index: 7, kind: output, shape index: {}]  }
   0x1 LB: > { %s1196_s25 = sadd.s32 4294967295, %s1429_s24   ;;  %p1200_p0 = scmp.ge.s32.totalorder %s1429_s24, 1  ;;  %s1429_s24 = sphi %s1473_s24, %s17_s24  }
   0x2   : > { %p237_p1 = scmp.lt.s32.totalorder %s1429_s24, 3 }
   0x4   : > { %p238_p2 = pnand %p1200_p0, %p237_p1 }
   0x5   : > { %p269_p3 = scmp.lt.s32.totalorder (!%p238_p2), %s1196_s25, 1 }
   0x6   : > { %241 = sbr.rel (%p238_p2) target bundleno = 1133 (0x46d), region = 48 }
   0xb   : > { %v1344_v0 = vld [vmem:[%s1958_s1 + $0x74] ss:$8 sps:$4 sm:$0xff]   ;;  %v1346_v1 = vld [vmem:[%s1958_s1 + $0x70] ss:$8 sps:$4 sm:$0xff]   ;;  %v1431_v2 = vmov 0   ;;  %s1968_s25 = smov (!%p269_p3, %s1196_s25), 1 }
   0xc   : > { %673 = vmatprep.mubr.bf16.mxu1 %v1431_v2  ;;  %600 = vmatprep.subr.bf16.mxu0 %v1344_v0  ;;  %v1347_v3 = vld [vmem:[%s1958_s1 + $0x64] ss:$8 sps:$4 sm:$0xff]   ;;  %v1349_v4 = vld [vmem:[%s1958_s1 + $0x60] ss:$8 sps:$4 sm:$0xff]   ;;  %v1350_v5 = vld [vmem:[%s1958_s1 + $0x54] ss:$8 sps:$4 sm:$0xff]  }
   0xd   : > { %601 = vmatpush1.bf16.msra.mxu0 %v1346_v1  ;;  %v1352_v6 = vld [vmem:[%s1958_s1 + $0x50] ss:$8 sps:$4 sm:$0xff]   ;;  %v1353_v7 = vld [vmem:[%s1958_s1 + $0x44] ss:$8 sps:$4 sm:$0xff]   ;;  %v1355_v8 = vld [vmem:[%s1958_s1 + $0x40] ss:$8 sps:$4 sm:$0xff]  }
   0xe   : > { %602 = vmatprep.subr.bf16.mxu0 %v1347_v3  ;;  %v1367_v9 = vld [vmem:[%s1958_s1 + $0x174] ss:$8 sps:$4 sm:$0xff]   ;;  %v1370_v10 = vld [vmem:[%s1958_s1 + $0x170] ss:$8 sps:$4 sm:$0xff]   ;;  %v1373_v12 = vld [vmem:[%s1958_s1 + $0x164] ss:$8 sps:$4 sm:$0xff]  }
   0xf   : > { %v1356_v11 = vld [vmem:[%s1958_s1 + $0x34] ss:$8 sps:$4 sm:$0xff]   ;;  %641 = vmatprep.subr.bf16.mxu1 %v1367_v9  ;;  %v1376_v13 = vld [vmem:[%s1958_s1 + $0x160] ss:$8 sps:$4 sm:$0xff]   ;;  %v1358_v14 = vld [vmem:[%s1958_s1 + $0x30] ss:$8 sps:$4 sm:$0xff]  }
  0x10   : > { %642 = vmatpush1.bf16.msra.mxu1 %v1370_v10  ;;  %v1359_v15 = vld [vmem:[%s1958_s1 + $0x24] ss:$8 sps:$4 sm:$0xff]   ;;  %v1379_v16 = vld [vmem:[%s1958_s1 + $0x154] ss:$8 sps:$4 sm:$0xff]   ;;  %v1382_v17 = vld [vmem:[%s1958_s1 + $0x150] ss:$8 sps:$4 sm:$0xff]  }
  0x11   : > { %603 = vmatpush1.bf16.msra.mxu0 %v1349_v4  ;;  %643 = vmatprep.subr.bf16.mxu1 %v1373_v12  ;;  %v1361_v18 = vld [vmem:[%s1958_s1 + $0x20] ss:$8 sps:$4 sm:$0xff]   ;;  %v1385_v19 = vld [vmem:[%s1958_s1 + $0x144] ss:$8 sps:$4 sm:$0xff]   ;;  %v1362_v20 = vld [vmem:[%s1958_s1 + $0x14] ss:$8 sps:$4 sm:$0xff]  }
  0x12   : > { %604 = vmatprep.subr.bf16.mxu0 %v1350_v5  ;;  %v1364_v21 = vld [vmem:[%s1958_s1 + $0x10] ss:$8 sps:$4 sm:$0xff]   ;;  %v1388_v22 = vld [vmem:[%s1958_s1 + $0x140] ss:$8 sps:$4 sm:$0xff]   ;;  %v1391_v23 = vld [vmem:[%s1958_s1 + $0x134] ss:$8 sps:$4 sm:$0xff]  }
  0x13   : > { %v1365_v24 = vld [vmem:[%s1958_s1 + $0x4] ss:$8 sps:$4 sm:$0xff]   ;;  %v1394_v25 = vld [vmem:[%s1958_s1 + $0x130] ss:$8 sps:$4 sm:$0xff]   ;;  %s1261_s11 = sshll.u32 %s1968_s25, 3  ;;  %vm1096_vm0 = vcmask 1040384  }
  0x14   : > { %644 = vmatpush1.bf16.msra.mxu1 %v1376_v13  ;;  %v1369_v26 = vld [vmem:[%s1958_s1] ss:$8 sps:$4 sm:$0xff]   ;;  %v1397_v27 = vld [vmem:[%s1958_s1 + $0x124] ss:$8 sps:$4 sm:$0xff]   ;;  %vm1097_vm1 = vsmask.f32 256  ;;  %s273_s21 = scalar_lea.vmem %s1957_s0, %s1261_s11  ;;  %s1578_s26 = scalar_lea.vmem %s1964_s7, %s1261_s11 }
  0x15   : > { %605 = vmatpush1.bf16.msra.mxu0 %v1352_v6  ;;  %645 = vmatprep.subr.bf16.mxu1 %v1379_v16  ;;  %v1371_v28 = vld [vmem:[%s1958_s1 + $0xf4] ss:$8 sps:$4 sm:$0xff]   ;;  %vm1100_vm2 = vsmask.f32 4352  ;;  %v1375_v29 = vld [vmem:[%s1958_s1 + $0xf0] ss:$8 sps:$4 sm:$0xff]   ;;  %vm1591_vm5 = vmand %vm1096_vm0, %vm1097_vm1 }
  0x16   : > { %606 = vmatprep.subr.bf16.mxu0 %v1353_v7  ;;  %vm1107_vm3 = vsmask.f32 7946  ;;  %v1377_v30 = vld [vmem:[%s1958_s1 + $0xe4] ss:$8 sps:$4 sm:$0xff]   ;;  %v1400_v31 = vld [vmem:[%s1958_s1 + $0x120] ss:$8 sps:$4 sm:$0xff]  }
  0x17   : > { %vm1099_vm4 = vcmask 1044484   ;;  %v1403_v32 = vld [vmem:[%s1958_s1 + $0x114] ss:$8 sps:$4 sm:$0xff]   ;;  %v1415_v33 = vld [vmem:[%s273_s21] ss:$0 sps:$4 sm:$0x77]  }
  0x18   : > { %646 = vmatpush1.bf16.msra.mxu1 %v1382_v17  ;;  %v1103_v35 = vld [vmem:[%s1578_s26] sm:$0x11]  ;;  %vm1106_vm6 = vcmask 1042434   ;;  %vm1101_vm7 = vmand %vm1099_vm4, %vm1100_vm2  ;;  %vm1109_vm8 = vcmask 1046534   ;;  %vm1110_vm9 = vsmask.f32 7962 }
  0x19   : > { %607 = vmatpush1.bf16.msra.mxu0 %v1355_v8  ;;  %647 = vmatprep.subr.bf16.mxu1 %v1385_v19  ;;  %v1381_v36 = vld [vmem:[%s1958_s1 + $0xe0] ss:$8 sps:$4 sm:$0xff]   ;;  %v1406_v37 = vld [vmem:[%s1958_s1 + $0x110] ss:$8 sps:$4 sm:$0xff]   ;;  %v295_v38 = vshll.u32 %v1415_v33, 16  ;;  %vm1102_vm10 = vmor %vm1101_vm7, %vm1591_vm5  ;;  %v293_v45 = vshrl.u32 %v1415_v33, 16 }
  0x1a   : > { %608 = vmatprep.subr.bf16.mxu0 %v1356_v11  ;;  %v1605_v39 = vld [vmem:[%s273_s21] sm:$0x33]  ;;  %v1104_v41 = vsel %vm1102_vm10, 0, %v1103_v35  ;;  %vm1108_vm11 = vmand %vm1106_vm6, %vm1107_vm3  ;;  %v1113_v42 = vld [vmem:[%s1578_s26] sm:$0x44]  ;;  %v350_v35 = vlaneseq  ;;  %vm724_vm14 = vcmask 1043456  }
  0x1b   : > { %v1409_v40 = vld [vmem:[%s1958_s1 + $0x104] ss:$8 sps:$4 sm:$0xff]   ;;  %v1206_v43 = vcombine.high %v1605_v39, %v1605_v39  ;;  %v1383_v44 = vld [vmem:[%s1958_s1 + $0xd4] ss:$8 sps:$4 sm:$0xff]   ;;  %1105 = vst [vmem:[%s1578_s26] sm:$0x11] %v1104_v41  ;;  %vm1111_vm12 = vmand %vm1109_vm8, %vm1110_vm9  ;;  %v297_v46 = vrot.slane %v295_v38, 1  ;;  %v1205_v4 = vcombine.low %v1605_v39, %v1605_v39 }
  0x1c   : > { %648 = vmatpush1.bf16.msra.mxu1 %v1388_v22  ;;  %vm1112_vm13 = vmor %vm1111_vm12, %vm1108_vm11  ;;  %v1412_v47 = vld [vmem:[%s1958_s1 + $0x100] ss:$8 sps:$4 sm:$0xff]   ;;  %v1387_v49 = vld [vmem:[%s1958_s1 + $0xd0] ss:$8 sps:$4 sm:$0xff]   ;;  %vm810_vm15 = vcmask 261120   ;;  %vm1131_vm0 = vcmask 1042432  }
  0x1d   : > { %609 = vmatpush1.bf16.msra.mxu0 %v1358_v14  ;;  %649 = vmatprep.subr.bf16.mxu1 %v1391_v23  ;;  %v1114_v48 = vsel %vm1112_vm13, 0, %v1113_v42  ;;  %v1389_v50 = vld [vmem:[%s1958_s1 + $0xc4] ss:$8 sps:$4 sm:$0xff]   ;;  %v1633_v51 = vld [vmem:[%s1962_s5 + $0xf8] sm:$0xff]  ;;  %v298_v52 = vor.u32 %v297_v46, %v293_v45  ;;  %v1393_v53 = vld [vmem:[%s1958_s1 + $0xc0] ss:$8 sps:$4 sm:$0xff]  }
  0x1e   : > { %610 = vmatprep.subr.bf16.mxu0 %v1359_v15  ;;  %632 = vmatprep.mubr.bf16.mxu0 %v1206_v43  ;;  %1115 = vst [vmem:[%s1578_s26] sm:$0x44] %v1114_v48  ;;  %v1642_v54 = vld [vmem:[%s1962_s5 + $0x78] sm:$0xff]  ;;  %v1650_v56 = vld [vmem:[%s1962_s5 + $0xf0] sm:$0xff]  ;;  %v1661_v58 = vld [vmem:[%s1962_s5 + $0xe8] sm:$0xff]  ;;  %vm1132_vm1 = vsmask.f32 2306 }
  0x1f   : > { %v1395_v55 = vld [vmem:[%s1958_s1 + $0xb4] ss:$8 sps:$4 sm:$0xff]   ;;  %v1399_v59 = vld [vmem:[%s1958_s1 + $0xb0] ss:$8 sps:$4 sm:$0xff]   ;;  %v1670_v60 = vld [vmem:[%s1962_s5 + $0x68] sm:$0xff]  ;;  %vm1134_vm2 = vcmask 1046532  }
  0x20   : > { %650 = vmatpush1.bf16.msra.mxu1 %v1394_v25  ;;  %v1655_v57 = vld [vmem:[%s1962_s5 + $0x70] sm:$0xff]  ;;  %v1401_v61 = vld [vmem:[%s1958_s1 + $0xa4] ss:$8 sps:$4 sm:$0xff]   ;;  %v1405_v63 = vld [vmem:[%s1958_s1 + $0xa0] ss:$8 sps:$4 sm:$0xff]  }
  0x21   : > { %611 = vmatpush1.bf16.msra.mxu0 %v1361_v18  ;;  %651 = vmatprep.subr.bf16.mxu1 %v1397_v27  ;;  %v1679_v62 = vld [vmem:[%s1962_s5 + $0xe0] sm:$0xff]  ;;  %v1407_v0 = vld [vmem:[%s1958_s1 + $0x94] ss:$8 sps:$4 sm:$0xff]   ;;  %v1411_v1 = vld [vmem:[%s1958_s1 + $0x90] ss:$8 sps:$4 sm:$0xff]  }
  0x22   : > { %612 = vmatprep.subr.bf16.mxu0 %v1362_v20  ;;  %v1413_v2 = vld [vmem:[%s1958_s1 + $0x84] ss:$8 sps:$4 sm:$0xff]   ;;  %v1416_v3 = vld [vmem:[%s1958_s1 + $0x80] ss:$8 sps:$4 sm:$0xff]   ;;  %v1709_v6 = vld [vmem:[%s1962_s5 + $0xd8] sm:$0xff] }
  0x23   : > { %v1704_v5 = vld [vmem:[%s1962_s5 + $0x60] sm:$0xff]  ;;  %v1716_v7 = vld [vmem:[%s1962_s5 + $0x58] sm:$0xff]  ;;  %v1721_v8 = vld [vmem:[%s1962_s5 + $0xd0] sm:$0xff]  ;;  %vm1135_vm3 = vsmask.f32 6418 }
  0x24   : > { %652 = vmatpush1.bf16.msra.mxu1 %v1400_v31  ;;  %v1728_v9 = vld [vmem:[%s1962_s5 + $0x50] sm:$0xff]  ;;  %v1734_v10 = vld [vmem:[%s1962_s5 + $0xc8] sm:$0xff]  ;;  %v1746_v12 = vld [vmem:[%s1962_s5 + $0xc0] sm:$0xff] }
  0x25   : > { %613 = vmatpush1.bf16.msra.mxu0 %v1364_v21  ;;  %653 = vmatprep.subr.bf16.mxu1 %v1403_v32  ;;  %v1740_v11 = vld [vmem:[%s1962_s5 + $0x48] sm:$0xff]  ;;  %v1752_v13 = vld [vmem:[%s1962_s5 + $0x40] sm:$0xff]  ;;  %v1758_v14 = vld [vmem:[%s1962_s5 + $0xb8] sm:$0xff] }
  0x26   : > { %614 = vmatprep.subr.bf16.mxu0 %v1365_v24  ;;  %v1764_v15 = vld [vmem:[%s1962_s5 + $0x38] sm:$0xff]  ;;  %v1770_v16 = vld [vmem:[%s1962_s5 + $0xb0] sm:$0xff]  ;;  %v1782_v18 = vld [vmem:[%s1962_s5 + $0xa8] sm:$0xff] }
  0x27   : > { %v1776_v17 = vld [vmem:[%s1962_s5 + $0x30] sm:$0xff]  ;;  %v1788_v19 = vld [vmem:[%s1962_s5 + $0x28] sm:$0xff]  ;;  %v1794_v20 = vld [vmem:[%s1962_s5 + $0xa0] sm:$0xff] }
  0x28   : > { %654 = vmatpush1.bf16.msra.mxu1 %v1406_v37  ;;  %v1800_v21 = vld [vmem:[%s1962_s5 + $0x20] sm:$0xff]  ;;  %v1806_v22 = vld [vmem:[%s1962_s5 + $0x98] sm:$0xff]  ;;  %v1817_v24 = vld [vmem:[%s1962_s5 + $0x90] sm:$0xff]  ;;  %v351_v37 = vshrl.u32 %v350_v35, 7 }
  0x29   : > { %615 = vmatpush1.bf16.msra.mxu0 %v1369_v26  ;;  %655 = vmatprep.subr.bf16.mxu1 %v1409_v40  ;;  %v1812_v23 = vld [vmem:[%s1962_s5 + $0x18] sm:$0xff]  ;;  %v1822_v25 = vld [vmem:[%s1962_s5 + $0x10] sm:$0xff]  ;;  %v1828_v26 = vld [vmem:[%s1962_s5 + $0x88] sm:$0xff] }
  0x2a   : > { %616 = vmatprep.subr.bf16.mxu0 %v1371_v28  ;;  %v1834_v27 = vld [vmem:[%s1962_s5 + $0x8] sm:$0xff]  ;;  %v1840_v28 = vld [vmem:[%s1962_s5 + $0x80] sm:$0xff]  ;;  %v1859_v31 = vld [vmem:[%s1963_s6 + $0x30] sm:$0xff]  ;;  %v1864_v38 = vsub.s32 0, %v351_v37  ;;  %v1869_v40 = vsub.s32 1, %v351_v37 }
  0x2b   : > { %v348_v39 = vld [vmem:[%s1959_s2] sm:$0x3]  ;;  %vm1133_vm4 = vmand %vm1131_vm0, %vm1132_vm1 }
  0x2c   : > { %656 = vmatpush1.bf16.msra.mxu1 %v1412_v47  ;;  %v353_v41 = vrot.slane %v348_v39, %v1864_v38  ;;  %v357_v42 = vrot.slane %v348_v39, %v1869_v40  ;;  %vm1136_vm5 = vmand %vm1134_vm2, %vm1135_vm3 }
  0x2d   : > { %617 = vmatpush2.bf16.msra.mxu0 %v1375_v29  ;;  %1264 = vmatprep.subr.mxu1 %v1633_v51  ;;  %v1846_v29 = vld [vmem:[%s1962_s5] sm:$0xff]  ;;  %vm1137_vm6 = vmor %vm1136_vm5, %vm1133_vm4 }
  0x2e   : > { %618 = vmatprep.subr.bf16.mxu0 %v1377_v30  ;;  %v1854_v30 = vld [vmem:[%s1963_s6 + $0x38] sm:$0xff] }
  0x2f   : > { %674 = vmatmul.mubr.bf16.vlgmr.msra.gmra.mxu1 %v298_v52 }
  0x30   : > { %1265 = vmatpush3.msra.mxu1 %v1642_v54 }
  0x31   : > { %619 = vmatpush2.bf16.msra.mxu0 %v1381_v36  ;;  %1266 = vmatprep.subr.mxu1 %v1650_v56 }
  0x32   : > { %620 = vmatprep.subr.bf16.mxu0 %v1383_v44  ;;  %1267 = vmatpush3.msra.mxu1 %v1655_v57 }
  0x33   : > { %1268 = vmatprep.subr.mxu1 %v1661_v58 }
  0x34   : > { %1269 = vmatpush3.msra.mxu1 %v1670_v60 }
  0x35   : > { %621 = vmatpush2.bf16.msra.mxu0 %v1387_v49  ;;  %1270 = vmatprep.subr.mxu1 %v1679_v62 }
  0x36   : > { %622 = vmatprep.subr.bf16.mxu0 %v1389_v50  ;;  %1271 = vmatpush3.msra.mxu1 %v1704_v5 }
  0x37   : > { %1272 = vmatprep.subr.mxu1 %v1709_v6 }
  0x38   : > { %1273 = vmatpush3.msra.mxu1 %v1716_v7 }
  0x39   : > { %623 = vmatpush2.bf16.msra.mxu0 %v1393_v53  ;;  %1274 = vmatprep.subr.mxu1 %v1721_v8 }
  0x3a   : > { %624 = vmatprep.subr.bf16.mxu0 %v1395_v55  ;;  %1275 = vmatpush3.msra.mxu1 %v1728_v9 }
  0x3b   : > { %1276 = vmatprep.subr.mxu1 %v1734_v10 }
  0x3c   : > { %1277 = vmatpush3.msra.mxu1 %v1740_v11 }
  0x3d   : > { %625 = vmatpush2.bf16.msra.mxu0 %v1399_v59  ;;  %1278 = vmatprep.subr.mxu1 %v1746_v12 }
  0x3e   : > { %626 = vmatprep.subr.bf16.mxu0 %v1401_v61  ;;  %1279 = vmatpush3.msra.mxu1 %v1752_v13 }
  0x3f   : > { %1280 = vmatprep.subr.mxu1 %v1758_v14 }
  0x40   : > { %1281 = vmatpush3.msra.mxu1 %v1764_v15 }
  0x41   : > { %627 = vmatpush2.bf16.msra.mxu0 %v1405_v63  ;;  %1282 = vmatprep.subr.mxu1 %v1770_v16 }
  0x42   : > { %628 = vmatprep.subr.bf16.mxu0 %v1407_v0  ;;  %1283 = vmatpush3.msra.mxu1 %v1776_v17 }
  0x43   : > { %1284 = vmatprep.subr.mxu1 %v1782_v18 }
  0x44   : > { %1285 = vmatpush3.msra.mxu1 %v1788_v19 }
  0x45   : > { %629 = vmatpush2.bf16.msra.mxu0 %v1411_v1  ;;  %1286 = vmatprep.subr.mxu1 %v1794_v20 }
  0x46   : > { %630 = vmatprep.subr.bf16.mxu0 %v1413_v2  ;;  %1287 = vmatpush3.msra.mxu1 %v1800_v21 }
  0x47   : > { %1288 = vmatprep.subr.mxu1 %v1806_v22 }
  0x48   : > { %1289 = vmatpush3.msra.mxu1 %v1812_v23 }
  0x49   : > { %631 = vmatpush2.bf16.msra.mxu0 %v1416_v3  ;;  %1290 = vmatprep.subr.mxu1 %v1817_v24 }
  0x4a   : > { %1291 = vmatpush3.msra.mxu1 %v1822_v25  ;;  %838 = vmatprep.subr.mxu0 %v1854_v30 }
  0x4b   : > { %1292 = vmatprep.subr.mxu1 %v1828_v26 }
  0x4c   : > { %633 = vmatmul.mubr.bf16.vlgmr.msra.gmra.mxu0 %v1205_v4  ;;  %1293 = vmatpush3.msra.mxu1 %v1834_v27 }
  0x4d   : > { %1294 = vmatprep.subr.mxu1 %v1840_v28  ;;  %839 = vmatpush1.msra.mxu0 %v1859_v31 }
  0x4e   : > { %1295 = vmatpush3.msra.mxu1 %v1846_v29 }
  0x4f   : > { %1299 = vmatprep.subr.mxu1 %v1633_v51 }
  0xef   : > { %v675_v32 = vpop.f32.mrf.mxu1 }
  0xf1   : > { %v677_v33 = vpop.f32.mrf.mxu1 }
  0xf3   : > { %v679_v34 = vpop.f32.mrf.mxu1 }
  0xf5   : > { %v680_v36 = vpop.f32.mrf.mxu1 }
 0x10c   : > { %v634_v43 = vpop.f32.mrf.mxu0 }
 0x10d   : > { %v635_v44 = vadd.f32 %v634_v43, %v353_v41 }
 0x10e   : > { %v636_v45 = vpop.f32.mrf.mxu0 }
 0x10f   : > { %v1873_v46 = vadd.f32 %v675_v32, %v635_v44  ;;  %v637_v47 = vadd.f32 %v636_v45, %v357_v42  ;;  %v682_v44 = vld [vmem:[%s1960_s3] sm:$0x3] }
 0x110   : > { %v638_v48 = vpop.f32.mrf.mxu0 }
 0x111   : > { %v725_v49 = vsel %vm724_vm14, %v1873_v46, 0.0  ;;  %v1877_v50 = vadd.f32 %v677_v33, %v637_v47  ;;  %v1072_v47 = vrot.slane %v682_v44, %v1864_v38 }
 0x112   : > { %v726_v51 = vrot.slane %v725_v49, 4  ;;  %v639_v52 = vpop.f32.mrf.mxu0 }
 0x113   : > { %v732_v53 = vsel %vm724_vm14, %v1877_v50, 0.0 }
 0x114   : > { %v727_v55 = vadd.f32 %v726_v51, %v725_v49  ;;  %v733_v59 = vrot.slane %v732_v53, 4 }
 0x116   : > { %v728_v61 = vrot.slane %v727_v55, 2  ;;  %v734_v63 = vadd.f32 %v733_v59, %v732_v53 }
 0x118   : > { %v729_v0 = vadd.f32 %v728_v61, %v727_v55  ;;  %v735_v1 = vrot.slane %v734_v63, 2 }
 0x11a   : > { %v736_v2 = vadd.f32 %v735_v1, %v734_v63  ;;  %v730_v3 = vrot.slane %v729_v0, 1 }
 0x11c   : > { %v737_v4 = vrot.slane %v736_v2, 1  ;;  %v731_v34 = vadd.f32 %v730_v3, %v729_v0 }
 0x11e   : > { %v738_v32 = vadd.f32 %v737_v4, %v736_v2 }
 0x120   : > { %803 = vmatprep.mubr.f32.mxu1 %v738_v32 }
 0x121   : > { %804 = vmatmul.mubr.f32.vlgmr.msra.gmra.mxu1 %v731_v34 }
 0x122   : > { %1300 = vmatpush3.msra.mxu1 %v1642_v54  ;;  %v721_v54 = vld [vmem:[%s1963_s6 + $0x28] sm:$0xff] }
 0x123   : > { %1301 = vmatprep.subr.mxu1 %v1650_v56  ;;  %v720_v56 = vld [vmem:[%s1963_s6 + $0x20] sm:$0xff]  ;;  %840 = vmatprep.subr.mxu0 %v721_v54 }
 0x124   : > { %1302 = vmatpush3.msra.mxu1 %v1655_v57  ;;  %841 = vmatpush1.msra.mxu0 %v720_v56  ;;  %v719_v57 = vld [vmem:[%s1963_s6 + $0x18] sm:$0xff] }
 0x125   : > { %1303 = vmatprep.subr.mxu1 %v1661_v58  ;;  %842 = vmatprep.subr.mxu0 %v719_v57  ;;  %v718_v58 = vld [vmem:[%s1963_s6 + $0x10] sm:$0xff] }
 0x126   : > { %1304 = vmatpush3.msra.mxu1 %v1670_v60  ;;  %843 = vmatpush1.msra.mxu0 %v718_v58  ;;  %v717_v60 = vld [vmem:[%s1963_s6 + $0x8] sm:$0xff] }
 0x127   : > { %1305 = vmatprep.subr.mxu1 %v1679_v62  ;;  %844 = vmatprep.subr.mxu0 %v717_v60  ;;  %v716_v62 = vld [vmem:[%s1963_s6] sm:$0xff] }
 0x128   : > { %1306 = vmatpush3.msra.mxu1 %v1704_v5  ;;  %845 = vmatpush1.msra.mxu0 %v716_v62  ;;  %v1432_v5 = vmov 0.0  }
 0x129   : > { %1307 = vmatprep.subr.mxu1 %v1709_v6  ;;  %878 = vmatprep.mubr.f32.mxu0 %v1432_v5 }
 0x12a   : > { %1308 = vmatpush3.msra.mxu1 %v1716_v7  ;;  %1009 = vmatprep.subr.mxu0 %v1854_v30 }
 0x12b   : > { %1309 = vmatprep.subr.mxu1 %v1721_v8 }
 0x12c   : > { %1310 = vmatpush3.msra.mxu1 %v1728_v9 }
 0x12d   : > { %1311 = vmatprep.subr.mxu1 %v1734_v10 }
 0x12e   : > { %1312 = vmatpush3.msra.mxu1 %v1740_v11 }
 0x12f   : > { %1313 = vmatprep.subr.mxu1 %v1746_v12 }
 0x130   : > { %1314 = vmatpush3.msra.mxu1 %v1752_v13 }
 0x131   : > { %1315 = vmatprep.subr.mxu1 %v1758_v14 }
 0x132   : > { %1316 = vmatpush3.msra.mxu1 %v1764_v15 }
 0x133   : > { %1317 = vmatprep.subr.mxu1 %v1770_v16 }
 0x134   : > { %1318 = vmatpush3.msra.mxu1 %v1776_v17 }
 0x135   : > { %1319 = vmatprep.subr.mxu1 %v1782_v18 }
 0x136   : > { %1320 = vmatpush3.msra.mxu1 %v1788_v19 }
 0x137   : > { %1321 = vmatprep.subr.mxu1 %v1794_v20 }
 0x138   : > { %1322 = vmatpush3.msra.mxu1 %v1800_v21 }
 0x139   : > { %1323 = vmatprep.subr.mxu1 %v1806_v22 }
 0x13a   : > { %1324 = vmatpush3.msra.mxu1 %v1812_v23 }
 0x13b   : > { %1325 = vmatprep.subr.mxu1 %v1817_v24 }
 0x13c   : > { %1326 = vmatpush3.msra.mxu1 %v1822_v25 }
 0x13d   : > { %1327 = vmatprep.subr.mxu1 %v1828_v26 }
 0x13e   : > { %1328 = vmatpush3.msra.mxu1 %v1834_v27 }
 0x13f   : > { %1329 = vmatprep.subr.mxu1 %v1840_v28 }
 0x140   : > { %1330 = vmatpush3.msra.mxu1 %v1846_v29 }
 0x1e1   : > { %v1296_v6 = vpop.f32.mrf.mxu1 }
 0x1e3   : > { %v1297_v7 = vpop.f32.mrf.mxu1 }
 0x1e4   : > { %v1298_v8 = vadd.f32 %v1297_v7, %v1296_v6 }
 0x1e6   : > { %v809_v9 = vmul.f32 0.03125, %v1298_v8 }
 0x1e8   : > { %1256 = vmatmul.mubr.msk.f32.vlgmr.msra.gmra.mxu0 %vm810_vm15, %v809_v9 }
 0x1e9   : > { %1010 = vmatpush1.msra.mxu0 %v1859_v31  ;;  %1049 = vmatprep.mubr.f32.mxu0 %v1432_v5 }
 0x1ea   : > { %1011 = vmatprep.subr.mxu0 %v721_v54 }
 0x1eb   : > { %1012 = vmatpush1.msra.mxu0 %v720_v56 }
 0x1ec   : > { %1013 = vmatprep.subr.mxu0 %v719_v57 }
 0x1ed   : > { %1014 = vmatpush1.msra.mxu0 %v718_v58 }
 0x1ee   : > { %1015 = vmatprep.subr.mxu0 %v717_v60 }
 0x1ef   : > { %1016 = vmatpush1.msra.mxu0 %v716_v62 }
 0x2a8   : > { %v880_v10 = vpop.f32.mrf.mxu0 }
 0x2a9   : > { %v888_v11 = vrot.slane %v880_v10, %v1864_v38 }
 0x2aa   : > { %v882_v12 = vpop.f32.mrf.mxu0 }
 0x2ab   : > { %v893_v13 = vsub.f32 %v1873_v46, %v888_v11  ;;  %v892_v14 = vrot.slane %v882_v12, %v1864_v38  ;;  %v683_v46 = vld [vmem:[%s1961_s4] sm:$0x3] }
 0x2ac   : > { %v1085_v51 = vrot.slane %v683_v46, %v1864_v38  ;;  %v1089_v55 = vrot.slane %v683_v46, %v1869_v40 }
 0x2ad   : > { %v895_v15 = vmul.f32 %v893_v13, %v893_v13  ;;  %v894_v16 = vsub.f32 %v1877_v50, %v892_v14  ;;  %v1076_v50 = vrot.slane %v682_v44, %v1869_v40  ;;  %v1138_v40 = vld [vmem:[%s1578_s26] sm:$0x77] }
 0x2af   : > { %v897_v17 = vsel %vm724_vm14, %v895_v15, 0.0  ;;  %v896_v18 = vmul.f32 %v894_v16, %v894_v16 }
 0x2b0   : > { %v898_v19 = vrot.slane %v897_v17, 4 }
 0x2b1   : > { %v904_v20 = vsel %vm724_vm14, %v896_v18, 0.0 }
 0x2b2   : > { %v899_v21 = vadd.f32 %v898_v19, %v897_v17  ;;  %v905_v22 = vrot.slane %v904_v20, 4 }
 0x2b4   : > { %v900_v23 = vrot.slane %v899_v21, 2  ;;  %v906_v24 = vadd.f32 %v905_v22, %v904_v20 }
 0x2b6   : > { %v907_v25 = vrot.slane %v906_v24, 2  ;;  %v901_v26 = vadd.f32 %v900_v23, %v899_v21 }
 0x2b8   : > { %v908_v27 = vadd.f32 %v907_v25, %v906_v24  ;;  %v902_v28 = vrot.slane %v901_v26, 1 }
 0x2ba   : > { %v909_v29 = vrot.slane %v908_v27, 1  ;;  %v903_v31 = vadd.f32 %v902_v28, %v901_v26 }
 0x2bc   : > { %v910_v30 = vadd.f32 %v909_v29, %v908_v27 }
 0x2be   : > { %975 = vmatprep.mubr.f32.mxu1 %v910_v30 }
 0x2bf   : > { %976 = vmatmul.mubr.f32.vlgmr.msra.gmra.mxu1 %v903_v31 }
 0x37f   : > { %v1331_v33 = vpop.f32.mrf.mxu1 }
 0x381   : > { %v1332_v35 = vpop.f32.mrf.mxu1 }
 0x382   : > { %v1333_v36 = vadd.f32 %v1332_v35, %v1331_v33 }
 0x384   : > { %v981_v37 = vmul.f32 0.03125, %v1333_v36 }
 0x386   : > { %1257 = vmatmul.mubr.msk.f32.vlgmr.msra.gmra.mxu0 %vm810_vm15, %v981_v37 }
 0x446   : > { %v1051_v39 = vpop.f32.mrf.mxu0 }
 0x447   : > { %v1052_v41 = vadd.f32 1e-05, %v1051_v39 }
 0x448   : > { %v1053_v42 = vpop.f32.mrf.mxu0 }
 0x449   : > { %1419 = vrsqrt.f32 %v1052_v41  ;;  %v1054_v43 = vadd.f32 1e-05, %v1053_v42 }
 0x44b   : > { %1421 = vrsqrt.f32 %v1054_v43 }
 0x456   : > { %v1420_v45 = vpop.eup %1419 }
 0x457   : > { %v1061_v48 = vrot.slane %v1420_v45, %v1864_v38 }
 0x458   : > { %v1422_v49 = vpop.eup %1421 }
 0x459   : > { %v1066_v52 = vmul.f32 %v1061_v48, %v893_v13  ;;  %v1065_v53 = vrot.slane %v1422_v49, %v1864_v38 }
 0x45b   : > { %v1079_v59 = vmul.f32 %v1072_v47, %v1066_v52  ;;  %v1067_v61 = vmul.f32 %v1065_v53, %v894_v16 }
 0x45d   : > { %v1092_v63 = vadd.f32 %v1085_v51, %v1079_v59  ;;  %v1080_v0 = vmul.f32 %v1076_v50, %v1067_v61 }
 0x45f   : > { %v1093_v1 = vadd.f32 %v1089_v55, %v1080_v0  ;;  %v1094_v2 = vmax.f32 %v1092_v63, 0.0 }
 0x461   : > { %v1095_v3 = vmax.f32 %v1093_v1, 0.0 }
 0x463   : > { %v1263_v4 = vpack.c.bf16 %v1095_v3, %v1094_v2 }
 0x465   : > { %v1124_v32 = vshrl.u32 %v1263_v4, 16  ;;  %v1127_v34 = vshll.u32 %v1263_v4, 16 }
 0x467   : > { %v1126_v38 = vrot.slane %v1124_v32, 7 }
 0x469   : > { %v1129_v54 = vor.u32 %v1127_v34, %v1126_v38 }
 0x46b   : > { %v1139_v56 = vsel %vm1137_vm6, %v1129_v54, %v1138_v40 }
 0x46c   : > { %1140 = vst [vmem:[%s1578_s26] sm:$0x77] %v1139_v56 }
 0x46d PF: > { %s17_s24 = sadd.s32 1, %s1429_s24  }
 0x46e   : > { %p14_p4 = scmp.ge.s32.totalorder %s17_s24, 4  }
 0x470   :  { %16 = sbr.rel (!%p14_p4) target bundleno = 1 (0x1), region = 78 }

// kernel: mel_encoder_forward.16
= control target key start
LH: loop header
LB: loop body
LE: loop exit
PB: predicated region body
PF: predicated region fallthrough
CT: control target
= control target key end

     0   :  { %s3602_s17 = smov 0   ;;  %s4840_s0 = inlined_call_operand.vmem [shape: bf16[2,6,256], index: 0, kind: input, shape index: {}]   ;;  %s4841_s1 = inlined_call_operand.vmem [shape: bf16[768,256], index: 1, kind: input, shape index: {}]   ;;  %s4842_s2 = inlined_call_operand.vmem [shape: f32[1,256], index: 2, kind: input, shape index: {}]   ;;  %s4843_s3 = inlined_call_operand.vmem [shape: f32[1,256], index: 3, kind: input, shape index: {}]   ;;  %s4844_s4 = inlined_call_operand.vmem [shape: f32[1,256], index: 4, kind: input, shape index: {}]   ;;  %s4845_s5 = inlined_call_operand.vmem [shape: bf16[768,256], index: 5, kind: input, shape index: {}]   ;;  %s4846_s6 = inlined_call_operand.vmem [shape: f32[1,256], index: 6, kind: input, shape index: {}]   ;;  %s4847_s7 = inlined_call_operand.vmem [shape: f32[1,256], index: 7, kind: input, shape index: {}]   ;;  %s4848_s8 = inlined_call_operand.vmem [shape: f32[1,256], index: 8, kind: input, shape index: {}]   ;;  %s4849_s9 = inlined_call_operand.vmem [shape: f32[256,32], index: 9, kind: input, shape index: {}]   ;;  %s4850_s10 = inlined_call_operand.vmem [shape: f32[32,256], index: 10, kind: input, shape index: {}]   ;;  %s4851_s11 = inlined_call_operand.vmem [shape: bf16[2,6,256], index: 11, kind: output, shape index: {}]  }
   0x1 LB: > { %s2851_s18 = sadd.s32 4294967295, %s3539_s17   ;;  %p2855_p0 = scmp.ge.s32.totalorder %s3539_s17, 1  ;;  %s3539_s17 = sphi %s3602_s17, %s21_s17  }
   0x2   : > { %p337_p1 = scmp.lt.s32.totalorder %s3539_s17, 3 }
   0x4   : > { %p338_p2 = pnand %p2855_p0, %p337_p1 }
   0x5   : > { %p377_p3 = scmp.lt.s32.totalorder (!%p338_p2), %s2851_s18, 1 }
   0x6   : > { %341 = sbr.rel (%p338_p2) target bundleno = 2326 (0x916), region = 64 }
   0xb   : > { %v3225_v0 = vld [vmem:[%s4841_s1 + $0x74] ss:$8 sps:$4 sm:$0xff]   ;;  %v3227_v1 = vld [vmem:[%s4841_s1 + $0x70] ss:$8 sps:$4 sm:$0xff]   ;;  %v3231_v4 = vld [vmem:[%s4841_s1 + $0x64] ss:$8 sps:$4 sm:$0xff]  }
   0xc   : > { %1016 = vmatprep.subr.bf16.mxu0 %v3225_v0  ;;  %v3228_v2 = vld [vmem:[%s4841_s1 + $0x174] ss:$8 sps:$4 sm:$0xff]   ;;  %v3230_v3 = vld [vmem:[%s4841_s1 + $0x170] ss:$8 sps:$4 sm:$0xff]   ;;  %v3233_v5 = vld [vmem:[%s4841_s1 + $0x60] ss:$8 sps:$4 sm:$0xff]  }
   0xd   : > { %1017 = vmatpush1.bf16.msra.mxu0 %v3227_v1  ;;  %1057 = vmatprep.subr.bf16.mxu1 %v3228_v2  ;;  %v3234_v6 = vld [vmem:[%s4841_s1 + $0x164] ss:$8 sps:$4 sm:$0xff]   ;;  %v3236_v7 = vld [vmem:[%s4841_s1 + $0x160] ss:$8 sps:$4 sm:$0xff]   ;;  %v3237_v8 = vld [vmem:[%s4841_s1 + $0x54] ss:$8 sps:$4 sm:$0xff]  }
   0xe   : > { %1058 = vmatpush1.bf16.msra.mxu1 %v3230_v3  ;;  %1018 = vmatprep.subr.bf16.mxu0 %v3231_v4  ;;  %v3239_v9 = vld [vmem:[%s4841_s1 + $0x50] ss:$8 sps:$4 sm:$0xff]   ;;  %v3240_v10 = vld [vmem:[%s4841_s1 + $0x154] ss:$8 sps:$4 sm:$0xff]   ;;  %v3243_v11 = vld [vmem:[%s4841_s1 + $0x44] ss:$8 sps:$4 sm:$0xff]  }
   0xf   : > { %1059 = vmatprep.subr.bf16.mxu1 %v3234_v6  ;;  %v3242_v12 = vld [vmem:[%s4841_s1 + $0x150] ss:$8 sps:$4 sm:$0xff]   ;;  %v3246_v13 = vld [vmem:[%s4841_s1 + $0x144] ss:$8 sps:$4 sm:$0xff]   ;;  %v3245_v14 = vld [vmem:[%s4841_s1 + $0x40] ss:$8 sps:$4 sm:$0xff]  }
  0x10   : > { %v3249_v15 = vld [vmem:[%s4841_s1 + $0x34] ss:$8 sps:$4 sm:$0xff]   ;;  %v3248_v16 = vld [vmem:[%s4841_s1 + $0x140] ss:$8 sps:$4 sm:$0xff]   ;;  %v3251_v18 = vld [vmem:[%s4841_s1 + $0x30] ss:$8 sps:$4 sm:$0xff]  }
  0x11   : > { %1019 = vmatpush1.bf16.msra.mxu0 %v3233_v5  ;;  %v3252_v17 = vld [vmem:[%s4841_s1 + $0x134] ss:$8 sps:$4 sm:$0xff]   ;;  %v3255_v19 = vld [vmem:[%s4841_s1 + $0x24] ss:$8 sps:$4 sm:$0xff]   ;;  %v3254_v20 = vld [vmem:[%s4841_s1 + $0x130] ss:$8 sps:$4 sm:$0xff]  }
  0x12   : > { %1020 = vmatprep.subr.bf16.mxu0 %v3237_v8  ;;  %1060 = vmatpush1.bf16.msra.mxu1 %v3236_v7  ;;  %v3258_v21 = vld [vmem:[%s4841_s1 + $0x124] ss:$8 sps:$4 sm:$0xff]   ;;  %v3257_v22 = vld [vmem:[%s4841_s1 + $0x20] ss:$8 sps:$4 sm:$0xff]   ;;  %v3261_v23 = vld [vmem:[%s4841_s1 + $0x14] ss:$8 sps:$4 sm:$0xff]  }
  0x13   : > { %1061 = vmatprep.subr.bf16.mxu1 %v3240_v10  ;;  %v3260_v24 = vld [vmem:[%s4841_s1 + $0x120] ss:$8 sps:$4 sm:$0xff]   ;;  %v3264_v25 = vld [vmem:[%s4841_s1 + $0x114] ss:$8 sps:$4 sm:$0xff]   ;;  %v3263_v26 = vld [vmem:[%s4841_s1 + $0x10] ss:$8 sps:$4 sm:$0xff]  }
  0x14   : > { %v3267_v27 = vld [vmem:[%s4841_s1 + $0x4] ss:$8 sps:$4 sm:$0xff]   ;;  %v3266_v28 = vld [vmem:[%s4841_s1 + $0x110] ss:$8 sps:$4 sm:$0xff]   ;;  %v3269_v30 = vld [vmem:[%s4841_s1] ss:$8 sps:$4 sm:$0xff]  }
  0x15   : > { %1021 = vmatpush1.bf16.msra.mxu0 %v3239_v9  ;;  %v3270_v29 = vld [vmem:[%s4841_s1 + $0x104] ss:$8 sps:$4 sm:$0xff]   ;;  %v3273_v31 = vld [vmem:[%s4841_s1 + $0xf4] ss:$8 sps:$4 sm:$0xff]   ;;  %v3272_v32 = vld [vmem:[%s4841_s1 + $0x100] ss:$8 sps:$4 sm:$0xff]  }
  0x16   : > { %1022 = vmatprep.subr.bf16.mxu0 %v3243_v11  ;;  %1062 = vmatpush1.bf16.msra.mxu1 %v3242_v12  ;;  %v3276_v33 = vld [vmem:[%s4841_s1 + $0x1f4] ss:$8 sps:$4 sm:$0xff]   ;;  %v3275_v34 = vld [vmem:[%s4841_s1 + $0xf0] ss:$8 sps:$4 sm:$0xff]   ;;  %v3279_v35 = vld [vmem:[%s4841_s1 + $0xe4] ss:$8 sps:$4 sm:$0xff]  }
  0x17   : > { %1063 = vmatprep.subr.bf16.mxu1 %v3246_v13  ;;  %v3278_v36 = vld [vmem:[%s4841_s1 + $0x1f0] ss:$8 sps:$4 sm:$0xff]   ;;  %v3282_v37 = vld [vmem:[%s4841_s1 + $0x1e4] ss:$8 sps:$4 sm:$0xff]   ;;  %s4859_s18 = smov (!%p377_p3, %s2851_s18), 1  ;;  %vm1553_vm0 = vcmask 1040384  }
  0x18   : > { %v3281_v38 = vld [vmem:[%s4841_s1 + $0xe0] ss:$8 sps:$4 sm:$0xff]   ;;  %v3285_v39 = vld [vmem:[%s4841_s1 + $0xd4] ss:$8 sps:$4 sm:$0xff]   ;;  %s3072_s16 = sshll.u32 %s4859_s18, 3  ;;  %vm1556_vm2 = vcmask 1044484  }
  0x19   : > { %1023 = vmatpush1.bf16.msra.mxu0 %v3245_v14  ;;  %v3284_v40 = vld [vmem:[%s4841_s1 + $0x1e0] ss:$8 sps:$4 sm:$0xff]   ;;  %v3288_v41 = vld [vmem:[%s4841_s1 + $0x1d4] ss:$8 sps:$4 sm:$0xff]   ;;  %vm1554_vm1 = vsmask.f32 256  ;;  %s3755_s28 = scalar_lea.vmem %s4840_s0, %s3072_s16  ;;  %s3760_s12 = scalar_lea.vmem %s4851_s11, %s3072_s16 }
  0x1a   : > { %1024 = vmatprep.subr.bf16.mxu0 %v3249_v15  ;;  %1064 = vmatpush1.bf16.msra.mxu1 %v3248_v16  ;;  %v3287_v42 = vld [vmem:[%s4841_s1 + $0xd0] ss:$8 sps:$4 sm:$0xff]   ;;  %v3291_v44 = vld [vmem:[%s4841_s1 + $0xc4] ss:$8 sps:$4 sm:$0xff]   ;;  %vm1557_vm3 = vsmask.f32 4352  ;;  %vm3770_vm6 = vmand %vm1553_vm0, %vm1554_vm1 }
  0x1b   : > { %1065 = vmatprep.subr.bf16.mxu1 %v3252_v17  ;;  %v3290_v43 = vld [vmem:[%s4841_s1 + $0x1d0] ss:$8 sps:$4 sm:$0xff]   ;;  %v3293_v45 = vld [vmem:[%s4841_s1 + $0xc0] ss:$8 sps:$4 sm:$0xff]   ;;  %vm1563_vm4 = vcmask 1042434   ;;  %vm1566_vm5 = vcmask 1046534   ;;  %vm1558_vm8 = vmand %vm1556_vm2, %vm1557_vm3 }
  0x1c   : > { %v3294_v46 = vld [vmem:[%s4841_s1 + $0x1c4] ss:$8 sps:$4 sm:$0xff]   ;;  %vm1564_vm7 = vsmask.f32 7946  ;;  %v3296_v49 = vld [vmem:[%s4841_s1 + $0x1c0] ss:$8 sps:$4 sm:$0xff]   ;;  %vm1559_vm10 = vmor %vm1558_vm8, %vm3770_vm6 }
  0x1d   : > { %1025 = vmatpush1.bf16.msra.mxu0 %v3251_v18  ;;  %v3766_v47 = vld [vmem:[%s3755_s28] sm:$0x33]  ;;  %v3297_v50 = vld [vmem:[%s4841_s1 + $0xb4] ss:$8 sps:$4 sm:$0xff]   ;;  %vm1567_vm9 = vsmask.f32 7962  ;;  %vm1565_vm11 = vmand %vm1563_vm4, %vm1564_vm7 }
  0x1e   : > { %1026 = vmatprep.subr.bf16.mxu0 %v3255_v19  ;;  %1066 = vmatpush1.bf16.msra.mxu1 %v3254_v20  ;;  %v2861_v51 = vcombine.high %v3766_v47, %v3766_v47  ;;  %v1560_v52 = vld [vmem:[#allocation2] sm:$0x11]  ;;  %v3300_v53 = vld [vmem:[%s4841_s1 + $0x1b4] ss:$8 sps:$4 sm:$0xff]   ;;  %v1570_v56 = vld [vmem:[#allocation2] sm:$0x44] }
  0x1f   : > { %1067 = vmatprep.subr.bf16.mxu1 %v3258_v21  ;;  %v2772_v54 = vld [vmem:[%s3760_s12] sm:$0x11]  ;;  %v1561_v55 = vsel %vm1559_vm10, 0, %v1560_v52  ;;  %v2775_v58 = vld [vmem:[%s3760_s12] sm:$0x44]  ;;  %vm1568_vm12 = vmand %vm1566_vm5, %vm1567_vm9  ;;  %vm1181_vm14 = vcmask 1043456  }
  0x20   : > { %1048 = vmatprep.mubr.bf16.mxu0 %v2861_v51  ;;  %v2773_v57 = vsel %vm1559_vm10, 0, %v2772_v54  ;;  %1562 = vst [vmem:[#allocation2] sm:$0x11] %v1561_v55  ;;  %v3299_v59 = vld [vmem:[%s4841_s1 + $0xb0] ss:$8 sps:$4 sm:$0xff]   ;;  %vm1569_vm13 = vmor %vm1568_vm12, %vm1565_vm11  ;;  %vm1267_vm15 = vcmask 261120  }
  0x21   : > { %1027 = vmatpush1.bf16.msra.mxu0 %v3257_v22  ;;  %2774 = vst [vmem:[%s3760_s12] sm:$0x11] %v2773_v57  ;;  %v3303_v60 = vld [vmem:[%s4841_s1 + $0xa4] ss:$8 sps:$4 sm:$0xff]   ;;  %v1571_v61 = vsel %vm1569_vm13, 0, %v1570_v56  ;;  %v2776_v62 = vsel %vm1569_vm13, 0, %v2775_v58  ;;  %v2860_v22 = vcombine.low %v3766_v47, %v3766_v47  ;;  %vm1588_vm0 = vcmask 1042432  }
  0x22   : > { %1028 = vmatprep.subr.bf16.mxu0 %v3261_v23  ;;  %1068 = vmatpush1.bf16.msra.mxu1 %v3260_v24  ;;  %v389_v63 = vld [vmem:[%s3755_s28] sm:$0x77]  ;;  %v3302_v0 = vld [vmem:[%s4841_s1 + $0x1b0] ss:$8 sps:$4 sm:$0xff]   ;;  %1572 = vst [vmem:[#allocation2] sm:$0x44] %v1571_v61 }
  0x23   : > { %1069 = vmatprep.subr.bf16.mxu1 %v3264_v25  ;;  %2777 = vst [vmem:[%s3760_s12] sm:$0x44] %v2776_v62  ;;  %v2863_v1 = vcombine.high %v389_v63, %v389_v63  ;;  %v3306_v2 = vld [vmem:[%s4841_s1 + $0x1a4] ss:$8 sps:$4 sm:$0xff]   ;;  %v3305_v3 = vld [vmem:[%s4841_s1 + $0xa0] ss:$8 sps:$4 sm:$0xff]   ;;  %v2862_v7 = vcombine.low %v389_v63, %v389_v63  ;;  %v3946_v61 = vld [vmem:[%s4849_s9 + $0x78] sm:$0xff] }
  0x24   : > { %v3309_v6 = vld [vmem:[%s4841_s1 + $0x94] ss:$8 sps:$4 sm:$0xff]   ;;  %v3308_v8 = vld [vmem:[%s4841_s1 + $0x1a0] ss:$8 sps:$4 sm:$0xff]   ;;  %v3311_v11 = vld [vmem:[%s4841_s1 + $0x90] ss:$8 sps:$4 sm:$0xff]  }
  0x25   : > { %1029 = vmatpush1.bf16.msra.mxu0 %v3263_v26  ;;  %v411_v4 = vshrl.u32 %v2863_v1, 16  ;;  %v413_v5 = vshll.u32 %v2863_v1, 16  ;;  %v3312_v10 = vld [vmem:[%s4841_s1 + $0x194] ss:$8 sps:$4 sm:$0xff]   ;;  %v3315_v13 = vld [vmem:[%s4841_s1 + $0x84] ss:$8 sps:$4 sm:$0xff]  }
  0x26   : > { %1030 = vmatprep.subr.bf16.mxu0 %v3267_v27  ;;  %1070 = vmatpush1.bf16.msra.mxu1 %v3266_v28  ;;  %v406_v14 = vshll.u32 %v2862_v7, 16  ;;  %v3314_v15 = vld [vmem:[%s4841_s1 + $0x190] ss:$8 sps:$4 sm:$0xff]   ;;  %v3318_v16 = vld [vmem:[%s4841_s1 + $0x184] ss:$8 sps:$4 sm:$0xff]   ;;  %v404_v19 = vshrl.u32 %v2862_v7, 16 }
  0x27   : > { %1071 = vmatprep.subr.bf16.mxu1 %v3270_v29  ;;  %v415_v9 = vrot.slane %v413_v5, 1  ;;  %v3317_v17 = vld [vmem:[%s4841_s1 + $0x80] ss:$8 sps:$4 sm:$0xff]   ;;  %v3325_v18 = vld [vmem:[%s4841_s1 + $0x274] ss:$8 sps:$4 sm:$0xff]   ;;  %vm1591_vm2 = vcmask 1046532  }
  0x28   : > { %v408_v20 = vrot.slane %v406_v14, 1  ;;  %v3322_v21 = vld [vmem:[%s4841_s1 + $0x180] ss:$8 sps:$4 sm:$0xff]   ;;  %v3323_v23 = vld [vmem:[%s4841_s1 + $0x270] ss:$8 sps:$4 sm:$0xff]  }
  0x29   : > { %1031 = vmatpush1.bf16.msra.mxu0 %v3269_v30  ;;  %v416_v12 = vor.u32 %v415_v9, %v411_v4  ;;  %v3330_v25 = vld [vmem:[%s4841_s1 + $0x264] ss:$8 sps:$4 sm:$0xff]   ;;  %v3328_v26 = vld [vmem:[%s4841_s1 + $0x260] ss:$8 sps:$4 sm:$0xff]   ;;  %v3333_v27 = vld [vmem:[%s4841_s1 + $0x254] ss:$8 sps:$4 sm:$0xff]  }
  0x2a   : > { %1032 = vmatprep.subr.bf16.mxu0 %v3273_v31  ;;  %1072 = vmatpush1.bf16.msra.mxu1 %v3272_v32  ;;  %v409_v24 = vor.u32 %v408_v20, %v404_v19  ;;  %v3331_v28 = vld [vmem:[%s4841_s1 + $0x250] ss:$8 sps:$4 sm:$0xff]   ;;  %v390_v29 = vld [vmem:[%s3755_s28] sm:$0x66]  ;;  %v3369_v54 = vld [vmem:[%s4841_s1 + $0x294] ss:$8 sps:$4 sm:$0xff]  }
  0x2b   : > { %1073 = vmatprep.subr.bf16.mxu1 %v3276_v33  ;;  %1089 = vmatprep.mubr.bf16.mxu1 %v416_v12  ;;  %v3336_v30 = vld [vmem:[%s4841_s1 + $0x244] ss:$8 sps:$4 sm:$0xff]   ;;  %v2865_v31 = vcombine.high %v390_v29, %v390_v29  ;;  %v3334_v33 = vld [vmem:[%s4841_s1 + $0x240] ss:$8 sps:$4 sm:$0xff]   ;;  %v3355_v47 = vld [vmem:[%s4841_s1 + $0x2d0] ss:$8 sps:$4 sm:$0xff]   ;;  %v2864_v57 = vcombine.low %v390_v29, %v390_v29 }
  0x2c   : > { %v3360_v48 = vld [vmem:[%s4841_s1 + $0x2c4] ss:$8 sps:$4 sm:$0xff]   ;;  %v3361_v51 = vld [vmem:[%s4841_s1 + $0x2b0] ss:$8 sps:$4 sm:$0xff]   ;;  %v3370_v58 = vld [vmem:[%s4841_s1 + $0x280] ss:$8 sps:$4 sm:$0xff]  }
  0x2d   : > { %1033 = vmatpush2.bf16.msra.mxu0 %v3275_v34  ;;  %v425_v32 = vrot.slane %v2865_v31, 1  ;;  %v3339_v34 = vld [vmem:[%s4841_s1 + $0x234] ss:$8 sps:$4 sm:$0xff]   ;;  %v3366_v52 = vld [vmem:[%s4841_s1 + $0x2a4] ss:$8 sps:$4 sm:$0xff]  }
  0x2e   : > { %1034 = vmatprep.subr.bf16.mxu0 %v3279_v35  ;;  %1074 = vmatpush2.bf16.msra.mxu1 %v3278_v36  ;;  %v3337_v35 = vld [vmem:[%s4841_s1 + $0x230] ss:$8 sps:$4 sm:$0xff]   ;;  %v3342_v36 = vld [vmem:[%s4841_s1 + $0x224] ss:$8 sps:$4 sm:$0xff]   ;;  %vm1589_vm1 = vsmask.f32 2306 }
  0x2f   : > { %1075 = vmatprep.subr.bf16.mxu1 %v3282_v37  ;;  %v3340_v37 = vld [vmem:[%s4841_s1 + $0x220] ss:$8 sps:$4 sm:$0xff]   ;;  %v3367_v55 = vld [vmem:[%s4841_s1 + $0x290] ss:$8 sps:$4 sm:$0xff]   ;;  %v3372_v56 = vld [vmem:[%s4841_s1 + $0x284] ss:$8 sps:$4 sm:$0xff]  }
  0x30   : > { %v3951_v62 = vld [vmem:[%s4849_s9 + $0xf0] sm:$0xff]  ;;  %v3969_v1 = vld [vmem:[%s4849_s9 + $0x68] sm:$0xff]  ;;  %v3987_v4 = vld [vmem:[%s4849_s9 + $0xd8] sm:$0xff]  ;;  %vm1592_vm3 = vsmask.f32 6418 }
  0x31   : > { %1035 = vmatpush2.bf16.msra.mxu0 %v3281_v38  ;;  %v3345_v38 = vld [vmem:[%s4841_s1 + $0x214] ss:$8 sps:$4 sm:$0xff]   ;;  %v4019_v9 = vld [vmem:[%s4849_s9 + $0x48] sm:$0xff]  ;;  %v4079_v19 = vld [vmem:[%s4849_s9 + $0x20] sm:$0xff] }
  0x32   : > { %1036 = vmatprep.subr.bf16.mxu0 %v3285_v39  ;;  %1076 = vmatpush2.bf16.msra.mxu1 %v3284_v40  ;;  %v3343_v39 = vld [vmem:[%s4841_s1 + $0x210] ss:$8 sps:$4 sm:$0xff]   ;;  %v3348_v40 = vld [vmem:[%s4841_s1 + $0x204] ss:$8 sps:$4 sm:$0xff]   ;;  %vm4430_vm4 = vmand %vm1588_vm0, %vm1589_vm1 }
  0x33   : > { %1077 = vmatprep.subr.bf16.mxu1 %v3288_v41  ;;  %v3346_v41 = vld [vmem:[%s4841_s1 + $0x200] ss:$8 sps:$4 sm:$0xff]   ;;  %v3957_v63 = vld [vmem:[%s4849_s9 + $0x70] sm:$0xff]  ;;  %v3993_v5 = vld [vmem:[%s4849_s9 + $0x58] sm:$0xff] }
  0x34   : > { %v4005_v7 = vld [vmem:[%s4849_s9 + $0x50] sm:$0xff]  ;;  %v4037_v12 = vld [vmem:[%s4849_s9 + $0xb8] sm:$0xff]  ;;  %vm4434_vm5 = vmand %vm1591_vm2, %vm1592_vm3 }
  0x35   : > { %1037 = vmatpush2.bf16.msra.mxu0 %v3287_v42  ;;  %v3351_v42 = vld [vmem:[%s4841_s1 + $0x2f4] ss:$8 sps:$4 sm:$0xff]   ;;  %vm1594_vm6 = vmor %vm4434_vm5, %vm4430_vm4 }
  0x36   : > { %1038 = vmatprep.subr.bf16.mxu0 %v3291_v44  ;;  %1078 = vmatpush2.bf16.msra.mxu1 %v3290_v43  ;;  %v3349_v43 = vld [vmem:[%s4841_s1 + $0x2f0] ss:$8 sps:$4 sm:$0xff]   ;;  %v3354_v44 = vld [vmem:[%s4841_s1 + $0x2e4] ss:$8 sps:$4 sm:$0xff]  }
  0x37   : > { %1079 = vmatprep.subr.bf16.mxu1 %v3294_v46  ;;  %v3357_v46 = vld [vmem:[%s4841_s1 + $0x2d4] ss:$8 sps:$4 sm:$0xff]  }
  0x38   : > { %v4049_v14 = vld [vmem:[%s4849_s9 + $0xb0] sm:$0xff]  ;;  %v4085_v20 = vld [vmem:[%s4849_s9 + $0x98] sm:$0xff] }
  0x39   : > { %1039 = vmatpush2.bf16.msra.mxu0 %v3293_v45  ;;  %v3352_v45 = vld [vmem:[%s4841_s1 + $0x2e0] ss:$8 sps:$4 sm:$0xff]  }
  0x3a   : > { %1040 = vmatprep.subr.bf16.mxu0 %v3297_v50  ;;  %1080 = vmatpush2.bf16.msra.mxu1 %v3296_v49  ;;  %v3358_v49 = vld [vmem:[%s4841_s1 + $0x2c0] ss:$8 sps:$4 sm:$0xff]   ;;  %v3363_v50 = vld [vmem:[%s4841_s1 + $0x2b4] ss:$8 sps:$4 sm:$0xff]  }
  0x3b   : > { %1081 = vmatprep.subr.bf16.mxu1 %v3300_v53  ;;  %v3364_v53 = vld [vmem:[%s4841_s1 + $0x2a0] ss:$8 sps:$4 sm:$0xff]  }
  0x3d   : > { %1041 = vmatpush2.bf16.msra.mxu0 %v3299_v59  ;;  %v424_v59 = vrot.slane %v2864_v57, 1 }
  0x3e   : > { %1042 = vmatprep.subr.bf16.mxu0 %v3303_v60  ;;  %1082 = vmatpush2.bf16.msra.mxu1 %v3302_v0  ;;  %v3941_v60 = vld [vmem:[%s4849_s9 + $0xf8] sm:$0xff]  ;;  %v3963_v0 = vld [vmem:[%s4849_s9 + $0xe8] sm:$0xff] }
  0x3f   : > { %1083 = vmatprep.subr.bf16.mxu1 %v3306_v2  ;;  %v3975_v2 = vld [vmem:[%s4849_s9 + $0xe0] sm:$0xff] }
  0x41   : > { %1043 = vmatpush2.bf16.msra.mxu0 %v3305_v3  ;;  %v3981_v3 = vld [vmem:[%s4849_s9 + $0x60] sm:$0xff] }
  0x42   : > { %1044 = vmatprep.subr.bf16.mxu0 %v3309_v6  ;;  %1084 = vmatpush2.bf16.msra.mxu1 %v3308_v8  ;;  %v3999_v6 = vld [vmem:[%s4849_s9 + $0xd0] sm:$0xff]  ;;  %v4011_v8 = vld [vmem:[%s4849_s9 + $0xc8] sm:$0xff] }
  0x43   : > { %1085 = vmatprep.subr.bf16.mxu1 %v3312_v10  ;;  %v4025_v10 = vld [vmem:[%s4849_s9 + $0xc0] sm:$0xff] }
  0x45   : > { %1045 = vmatpush2.bf16.msra.mxu0 %v3311_v11  ;;  %v4031_v11 = vld [vmem:[%s4849_s9 + $0x40] sm:$0xff] }
  0x46   : > { %1046 = vmatprep.subr.bf16.mxu0 %v3315_v13  ;;  %1086 = vmatpush2.bf16.msra.mxu1 %v3314_v15  ;;  %v4043_v13 = vld [vmem:[%s4849_s9 + $0x38] sm:$0xff]  ;;  %v4055_v15 = vld [vmem:[%s4849_s9 + $0x30] sm:$0xff] }
  0x47   : > { %1087 = vmatprep.subr.bf16.mxu1 %v3318_v16  ;;  %v4061_v16 = vld [vmem:[%s4849_s9 + $0xa8] sm:$0xff] }
  0x49   : > { %1047 = vmatpush2.bf16.msra.mxu0 %v3317_v17  ;;  %v4067_v17 = vld [vmem:[%s4849_s9 + $0x28] sm:$0xff] }
  0x4a   : > { %1098 = vmatprep.subr.bf16.mxu0 %v3325_v18  ;;  %1088 = vmatpush2.bf16.msra.mxu1 %v3322_v21  ;;  %v4073_v18 = vld [vmem:[%s4849_s9 + $0xa0] sm:$0xff]  ;;  %v4091_v21 = vld [vmem:[%s4849_s9 + $0x18] sm:$0xff] }
  0x4b   : > { %3076 = vmatprep.subr.mxu1 %v3941_v60 }
  0x4c   : > { %1049 = vmatmul.mubr.bf16.vlgmr.msra.gmra.mxu0 %v2860_v22  ;;  %v4097_v22 = vld [vmem:[%s4849_s9 + $0x90] sm:$0xff] }
  0x4d   : > { %1099 = vmatpush1.bf16.msra.mxu0 %v3323_v23  ;;  %1090 = vmatmul.mubr.bf16.vlgmr.msra.gmra.mxu1 %v409_v24  ;;  %v4102_v23 = vld [vmem:[%s4849_s9 + $0x10] sm:$0xff]  ;;  %v4107_v24 = vld [vmem:[%s4849_s9 + $0x88] sm:$0xff] }
  0x4e   : > { %1100 = vmatprep.subr.bf16.mxu0 %v3330_v25  ;;  %1130 = vmatprep.mubr.bf16.mxu0 %v425_v32  ;;  %v4113_v25 = vld [vmem:[%s4849_s9 + $0x8] sm:$0xff] }
  0x4f   : > { %3077 = vmatpush3.msra.mxu1 %v3946_v61 }
  0x50   : > { %3078 = vmatprep.subr.mxu1 %v3951_v62 }
  0x51   : > { %1101 = vmatpush1.bf16.msra.mxu0 %v3328_v26  ;;  %3079 = vmatpush3.msra.mxu1 %v3957_v63  ;;  %v4119_v26 = vld [vmem:[%s4849_s9 + $0x80] sm:$0xff] }
  0x52   : > { %1102 = vmatprep.subr.bf16.mxu0 %v3333_v27  ;;  %3080 = vmatprep.subr.mxu1 %v3963_v0  ;;  %v4125_v27 = vld [vmem:[%s4849_s9] sm:$0xff] }
  0x53   : > { %3081 = vmatpush3.msra.mxu1 %v3969_v1 }
  0x54   : > { %3082 = vmatprep.subr.mxu1 %v3975_v2 }
  0x55   : > { %1103 = vmatpush1.bf16.msra.mxu0 %v3331_v28  ;;  %3083 = vmatpush3.msra.mxu1 %v3981_v3  ;;  %v1180_v28 = vld [vmem:[%s4850_s10 + $0x38] sm:$0xff] }
  0x56   : > { %1104 = vmatprep.subr.bf16.mxu0 %v3336_v30  ;;  %3084 = vmatprep.subr.mxu1 %v3987_v4 }
  0x57   : > { %3085 = vmatpush3.msra.mxu1 %v3993_v5 }
  0x58   : > { %3086 = vmatprep.subr.mxu1 %v3999_v6 }
  0x59   : > { %1105 = vmatpush1.bf16.msra.mxu0 %v3334_v33  ;;  %3087 = vmatpush3.msra.mxu1 %v4005_v7 }
  0x5a   : > { %1106 = vmatprep.subr.bf16.mxu0 %v3339_v34  ;;  %3088 = vmatprep.subr.mxu1 %v4011_v8 }
  0x5b   : > { %3089 = vmatpush3.msra.mxu1 %v4019_v9 }
  0x5c   : > { %3090 = vmatprep.subr.mxu1 %v4025_v10 }
  0x5d   : > { %1107 = vmatpush1.bf16.msra.mxu0 %v3337_v35  ;;  %3091 = vmatpush3.msra.mxu1 %v4031_v11 }
  0x5e   : > { %1108 = vmatprep.subr.bf16.mxu0 %v3342_v36  ;;  %3092 = vmatprep.subr.mxu1 %v4037_v12 }
  0x5f   : > { %3093 = vmatpush3.msra.mxu1 %v4043_v13 }
  0x60   : > { %3094 = vmatprep.subr.mxu1 %v4049_v14 }
  0x61   : > { %1109 = vmatpush1.bf16.msra.mxu0 %v3340_v37  ;;  %3095 = vmatpush3.msra.mxu1 %v4055_v15  ;;  %v526_v37 = vlaneseq }
  0x62   : > { %1110 = vmatprep.subr.bf16.mxu0 %v3345_v38  ;;  %3096 = vmatprep.subr.mxu1 %v4061_v16 }
  0x63   : > { %3097 = vmatpush3.msra.mxu1 %v4067_v17  ;;  %v527_v38 = vshrl.u32 %v526_v37, 7  ;;  %v1178_v37 = vld [vmem:[%s4850_s10 + $0x28] sm:$0xff] }
  0x64   : > { %3098 = vmatprep.subr.mxu1 %v4073_v18 }
  0x65   : > { %1111 = vmatpush1.bf16.msra.mxu0 %v3343_v39  ;;  %3099 = vmatpush3.msra.mxu1 %v4079_v19  ;;  %v4133_v39 = vsub.s32 0, %v527_v38 }
  0x66   : > { %1112 = vmatprep.subr.bf16.mxu0 %v3348_v40  ;;  %3100 = vmatprep.subr.mxu1 %v4085_v20  ;;  %v524_v40 = vld [vmem:[%s4842_s2] sm:$0x3] }
  0x67   : > { %3101 = vmatpush3.msra.mxu1 %v4091_v21 }
  0x68   : > { %3102 = vmatprep.subr.mxu1 %v4097_v22 }
  0x69   : > { %1113 = vmatpush1.bf16.msra.mxu0 %v3346_v41  ;;  %3103 = vmatpush3.msra.mxu1 %v4102_v23  ;;  %v4138_v41 = vsub.s32 1, %v527_v38  ;;  %v1177_v38 = vld [vmem:[%s4850_s10 + $0x20] sm:$0xff] }
  0x6a   : > { %1114 = vmatprep.subr.bf16.mxu0 %v3351_v42  ;;  %3104 = vmatprep.subr.mxu1 %v4107_v24  ;;  %v529_v42 = vrot.slane %v524_v40, %v4133_v39 }
  0x6b   : > { %3105 = vmatpush3.msra.mxu1 %v4113_v25 }
  0x6c   : > { %3106 = vmatprep.subr.mxu1 %v4119_v26 }
  0x6d   : > { %1115 = vmatpush2.bf16.msra.mxu0 %v3349_v43  ;;  %3107 = vmatpush3.msra.mxu1 %v4125_v27  ;;  %v533_v43 = vrot.slane %v524_v40, %v4138_v41  ;;  %v1176_v40 = vld [vmem:[%s4850_s10 + $0x18] sm:$0xff] }
  0x6e   : > { %1116 = vmatprep.subr.bf16.mxu0 %v3354_v44  ;;  %1295 = vmatprep.subr.mxu1 %v1180_v28 }
  0x71   : > { %1117 = vmatpush2.bf16.msra.mxu0 %v3352_v45 }
  0x72   : > { %1118 = vmatprep.subr.bf16.mxu0 %v3357_v46 }
  0x75   : > { %1119 = vmatpush2.bf16.msra.mxu0 %v3355_v47 }
  0x76   : > { %1120 = vmatprep.subr.bf16.mxu0 %v3360_v48 }
  0x79   : > { %1121 = vmatpush2.bf16.msra.mxu0 %v3358_v49 }
  0x7a   : > { %1122 = vmatprep.subr.bf16.mxu0 %v3363_v50 }
  0x7d   : > { %1123 = vmatpush2.bf16.msra.mxu0 %v3361_v51 }
  0x7e   : > { %1124 = vmatprep.subr.bf16.mxu0 %v3366_v52 }
  0x81   : > { %1125 = vmatpush2.bf16.msra.mxu0 %v3364_v53 }
  0x82   : > { %1126 = vmatprep.subr.bf16.mxu0 %v3369_v54 }
  0x85   : > { %1127 = vmatpush2.bf16.msra.mxu0 %v3367_v55 }
  0x86   : > { %1128 = vmatprep.subr.bf16.mxu0 %v3372_v56 }
  0x89   : > { %1129 = vmatpush2.bf16.msra.mxu0 %v3370_v58 }
  0x8a   : > { %1466 = vmatprep.subr.mxu0 %v1180_v28 }
  0x8c   : > { %1131 = vmatmul.mubr.bf16.vlgmr.msra.gmra.mxu0 %v424_v59 }
 0x10c   : > { %v1050_v29 = vpop.f32.mrf.mxu0 }
 0x10d   : > { %v1091_v31 = vpop.f32.mrf.mxu1  ;;  %v1051_v44 = vadd.f32 %v1050_v29, %v529_v42  ;;  %v1175_v42 = vld [vmem:[%s4850_s10 + $0x10] sm:$0xff] }
 0x10e   : > { %v1052_v30 = vpop.f32.mrf.mxu0 }
 0x10f   : > { %v1093_v33 = vpop.f32.mrf.mxu1  ;;  %v1053_v45 = vadd.f32 %v1052_v30, %v533_v43  ;;  %v1092_v46 = vadd.f32 %v1091_v31, %v1051_v44  ;;  %v1174_v43 = vld [vmem:[%s4850_s10 + $0x8] sm:$0xff]  ;;  %v1173_v44 = vld [vmem:[%s4850_s10] sm:$0xff] }
 0x110   : > { %v1054_v32 = vpop.f32.mrf.mxu0 }
 0x111   : > { %v1095_v35 = vpop.f32.mrf.mxu1  ;;  %v1094_v48 = vadd.f32 %v1093_v33, %v1053_v45  ;;  %v3541_v45 = vmov 0.0  }
 0x112   : > { %v1055_v34 = vpop.f32.mrf.mxu0  ;;  %1506 = vmatprep.mubr.f32.mxu0 %v3541_v45 }
 0x113   : > { %v1096_v36 = vpop.f32.mrf.mxu1 }
 0x114   : > { %v1179_v36 = vld [vmem:[%s4850_s10 + $0x30] sm:$0xff] }
 0x115   : > { %1467 = vmatpush1.msra.mxu0 %v1179_v36 }
 0x116   : > { %1468 = vmatprep.subr.mxu0 %v1178_v37 }
 0x117   : > { %1469 = vmatpush1.msra.mxu0 %v1177_v38 }
 0x118   : > { %1470 = vmatprep.subr.mxu0 %v1176_v40 }
 0x119   : > { %1471 = vmatpush1.msra.mxu0 %v1175_v42 }
 0x11a   : > { %1472 = vmatprep.subr.mxu0 %v1174_v43 }
 0x11b   : > { %1473 = vmatpush1.msra.mxu0 %v1173_v44 }
 0x14c   : > { %v1132_v47 = vpop.f32.mrf.mxu0 }
 0x14d   : > { %v4142_v49 = vadd.f32 %v1132_v47, %v1092_v46 }
 0x14e   : > { %v1134_v50 = vpop.f32.mrf.mxu0 }
 0x14f   : > { %v1182_v51 = vsel %vm1181_vm14, %v4142_v49, 0.0  ;;  %v4146_v52 = vadd.f32 %v1134_v50, %v1094_v48 }
 0x150   : > { %v1183_v53 = vrot.slane %v1182_v51, 4  ;;  %v1136_v54 = vpop.f32.mrf.mxu0 }
 0x151   : > { %v1189_v55 = vsel %vm1181_vm14, %v4146_v52, 0.0  ;;  %v3386_v54 = vld [vmem:[%s4845_s5 + $0x54] ss:$8 sps:$4 sm:$0xff]  }
 0x152   : > { %v1184_v56 = vadd.f32 %v1183_v53, %v1182_v51  ;;  %v1190_v57 = vrot.slane %v1189_v55, 4  ;;  %v1137_v58 = vpop.f32.mrf.mxu0  ;;  %v3378_v53 = vld [vmem:[%s4845_s5 + $0x60] ss:$8 sps:$4 sm:$0xff]  }
 0x153   : > { %v3398_v58 = vld [vmem:[%s4845_s5 + $0x34] ss:$8 sps:$4 sm:$0xff]  }
 0x154   : > { %v1185_v59 = vrot.slane %v1184_v56, 2  ;;  %v1191_v28 = vadd.f32 %v1190_v57, %v1189_v55  ;;  %v3384_v55 = vld [vmem:[%s4845_s5 + $0x50] ss:$8 sps:$4 sm:$0xff]   ;;  %v3390_v57 = vld [vmem:[%s4845_s5 + $0x40] ss:$8 sps:$4 sm:$0xff]  }
 0x156   : > { %v1186_v29 = vadd.f32 %v1185_v59, %v1184_v56  ;;  %v1192_v30 = vrot.slane %v1191_v28, 2  ;;  %v3392_v56 = vld [vmem:[%s4845_s5 + $0x44] ss:$8 sps:$4 sm:$0xff]   ;;  %v3396_v59 = vld [vmem:[%s4845_s5 + $0x30] ss:$8 sps:$4 sm:$0xff]  }
 0x158   : > { %v1193_v31 = vadd.f32 %v1192_v30, %v1191_v28  ;;  %v1187_v32 = vrot.slane %v1186_v29, 1  ;;  %v3401_v28 = vld [vmem:[%s4845_s5 + $0x144] ss:$8 sps:$4 sm:$0xff]  }
 0x159   : > { %v3404_v30 = vld [vmem:[%s4845_s5 + $0x24] ss:$8 sps:$4 sm:$0xff]  }
 0x15a   : > { %v1194_v33 = vrot.slane %v1193_v31, 1  ;;  %v1188_v35 = vadd.f32 %v1187_v32, %v1186_v29  ;;  %v3399_v29 = vld [vmem:[%s4845_s5 + $0x140] ss:$8 sps:$4 sm:$0xff]   ;;  %v3407_v32 = vld [vmem:[%s4845_s5 + $0x134] ss:$8 sps:$4 sm:$0xff]  }
 0x15c   : > { %v1195_v34 = vadd.f32 %v1194_v33, %v1193_v31  ;;  %v3402_v31 = vld [vmem:[%s4845_s5 + $0x20] ss:$8 sps:$4 sm:$0xff]   ;;  %v3405_v33 = vld [vmem:[%s4845_s5 + $0x130] ss:$8 sps:$4 sm:$0xff]  }
 0x15e   : > { %1260 = vmatprep.mubr.f32.mxu1 %v1195_v34  ;;  %v3410_v34 = vld [vmem:[%s4845_s5 + $0x14] ss:$8 sps:$4 sm:$0xff]  }
 0x15f   : > { %1261 = vmatmul.mubr.f32.vlgmr.msra.gmra.mxu1 %v1188_v35  ;;  %v3408_v35 = vld [vmem:[%s4845_s5 + $0x10] ss:$8 sps:$4 sm:$0xff]  }
 0x160   : > { %1296 = vmatpush1.msra.mxu1 %v1179_v36  ;;  %1335 = vmatprep.mubr.f32.mxu1 %v3541_v45  ;;  %v3413_v36 = vld [vmem:[%s4845_s5 + $0x124] ss:$8 sps:$4 sm:$0xff]  }
 0x161   : > { %1297 = vmatprep.subr.mxu1 %v1178_v37  ;;  %v3411_v37 = vld [vmem:[%s4845_s5 + $0x120] ss:$8 sps:$4 sm:$0xff]  }
 0x162   : > { %1298 = vmatpush1.msra.mxu1 %v1177_v38  ;;  %v3416_v38 = vld [vmem:[%s4845_s5 + $0x4] ss:$8 sps:$4 sm:$0xff]  }
 0x163   : > { %1299 = vmatprep.subr.mxu1 %v1176_v40  ;;  %v3414_v40 = vld [vmem:[%s4845_s5] ss:$8 sps:$4 sm:$0xff]  }
 0x164   : > { %1300 = vmatpush1.msra.mxu1 %v1175_v42  ;;  %v3419_v42 = vld [vmem:[%s4845_s5 + $0x114] ss:$8 sps:$4 sm:$0xff]  }
 0x165   : > { %1301 = vmatprep.subr.mxu1 %v1174_v43  ;;  %v3417_v43 = vld [vmem:[%s4845_s5 + $0x110] ss:$8 sps:$4 sm:$0xff]  }
 0x166   : > { %1302 = vmatpush1.msra.mxu1 %v1173_v44  ;;  %v3422_v44 = vld [vmem:[%s4845_s5 + $0xf4] ss:$8 sps:$4 sm:$0xff]  }
 0x167   : > { %3111 = vmatprep.subr.mxu1 %v3941_v60 }
 0x21f   : > { %v3108_v46 = vpop.f32.mrf.mxu1 }
 0x221   : > { %v3109_v47 = vpop.f32.mrf.mxu1 }
 0x222   : > { %v3110_v48 = vadd.f32 %v3109_v47, %v3108_v46  ;;  %v3420_v46 = vld [vmem:[%s4845_s5 + $0xf0] ss:$8 sps:$4 sm:$0xff]   ;;  %v3425_v47 = vld [vmem:[%s4845_s5 + $0x104] ss:$8 sps:$4 sm:$0xff]  }
 0x224   : > { %v1266_v50 = vmul.f32 0.03125, %v3110_v48  ;;  %v3423_v48 = vld [vmem:[%s4845_s5 + $0x100] ss:$8 sps:$4 sm:$0xff]  }
 0x226   : > { %2962 = vmatmul.mubr.msk.f32.vlgmr.msra.gmra.mxu1 %vm1267_vm15, %v1266_v50  ;;  %v3428_v50 = vld [vmem:[%s4845_s5 + $0xe4] ss:$8 sps:$4 sm:$0xff]  }
 0x227   : > { %3112 = vmatpush3.msra.mxu1 %v3946_v61 }
 0x228   : > { %3113 = vmatprep.subr.mxu1 %v3951_v62 }
 0x229   : > { %3114 = vmatpush3.msra.mxu1 %v3957_v63 }
 0x22a   : > { %3115 = vmatprep.subr.mxu1 %v3963_v0 }
 0x22b   : > { %3116 = vmatpush3.msra.mxu1 %v3969_v1 }
 0x22c   : > { %3117 = vmatprep.subr.mxu1 %v3975_v2 }
 0x22d   : > { %3118 = vmatpush3.msra.mxu1 %v3981_v3 }
 0x22e   : > { %3119 = vmatprep.subr.mxu1 %v3987_v4 }
 0x22f   : > { %3120 = vmatpush3.msra.mxu1 %v3993_v5 }
 0x230   : > { %3121 = vmatprep.subr.mxu1 %v3999_v6 }
 0x231   : > { %3122 = vmatpush3.msra.mxu1 %v4005_v7 }
 0x232   : > { %3123 = vmatprep.subr.mxu1 %v4011_v8 }
 0x233   : > { %3124 = vmatpush3.msra.mxu1 %v4019_v9 }
 0x234   : > { %3125 = vmatprep.subr.mxu1 %v4025_v10 }
 0x235   : > { %3126 = vmatpush3.msra.mxu1 %v4031_v11 }
 0x236   : > { %3127 = vmatprep.subr.mxu1 %v4037_v12 }
 0x237   : > { %3128 = vmatpush3.msra.mxu1 %v4043_v13 }
 0x238   : > { %3129 = vmatprep.subr.mxu1 %v4049_v14 }
 0x239   : > { %3130 = vmatpush3.msra.mxu1 %v4055_v15 }
 0x23a   : > { %3131 = vmatprep.subr.mxu1 %v4061_v16 }
 0x23b   : > { %3132 = vmatpush3.msra.mxu1 %v4067_v17 }
 0x23c   : > { %3133 = vmatprep.subr.mxu1 %v4073_v18  ;;  %v3377_v18 = vld [vmem:[%s4845_s5 + $0x74] ss:$8 sps:$4 sm:$0xff]  }
 0x23d   : > { %3134 = vmatpush3.msra.mxu1 %v4079_v19  ;;  %2226 = vmatprep.subr.bf16.mxu0 %v3377_v18  ;;  %v3381_v19 = vld [vmem:[%s4845_s5 + $0x170] ss:$8 sps:$4 sm:$0xff]  }
 0x23e   : > { %3135 = vmatprep.subr.mxu1 %v4085_v20  ;;  %v3383_v20 = vld [vmem:[%s4845_s5 + $0x174] ss:$8 sps:$4 sm:$0xff]   ;;  %v3456_v18 = vld [vmem:[%s4845_s5 + $0x90] ss:$8 sps:$4 sm:$0xff]  }
 0x23f   : > { %3136 = vmatpush3.msra.mxu1 %v4091_v21  ;;  %v3387_v21 = vld [vmem:[%s4845_s5 + $0x160] ss:$8 sps:$4 sm:$0xff]  }
 0x240   : > { %3137 = vmatprep.subr.mxu1 %v4097_v22  ;;  %v3389_v22 = vld [vmem:[%s4845_s5 + $0x164] ss:$8 sps:$4 sm:$0xff]  }
 0x241   : > { %3138 = vmatpush3.msra.mxu1 %v4102_v23  ;;  %v3393_v23 = vld [vmem:[%s4845_s5 + $0x150] ss:$8 sps:$4 sm:$0xff]  }
 0x242   : > { %3139 = vmatprep.subr.mxu1 %v4107_v24  ;;  %v3395_v24 = vld [vmem:[%s4845_s5 + $0x154] ss:$8 sps:$4 sm:$0xff]  }
 0x243   : > { %3140 = vmatpush3.msra.mxu1 %v4113_v25 }
 0x244   : > { %3141 = vmatprep.subr.mxu1 %v4119_v26 }
 0x245   : > { %3142 = vmatpush3.msra.mxu1 %v4125_v27 }
 0x246   : > { %2267 = vmatprep.subr.bf16.mxu1 %v3383_v20  ;;  %v3464_v20 = vld [vmem:[%s4845_s5 + $0x84] ss:$8 sps:$4 sm:$0xff]  }
 0x2e6   : > { %v1337_v60 = vpop.f32.mrf.mxu1 }
 0x2e7   : > { %v1345_v61 = vrot.slane %v1337_v60, %v4133_v39  ;;  %v3426_v60 = vld [vmem:[%s4845_s5 + $0xe0] ss:$8 sps:$4 sm:$0xff]  }
 0x2e8   : > { %v1339_v62 = vpop.f32.mrf.mxu1 }
 0x2e9   : > { %v4208_v63 = vsub.f32 %v4142_v49, %v1345_v61  ;;  %v1349_v0 = vrot.slane %v1339_v62, %v4133_v39  ;;  %v3375_v49 = vld [vmem:[%s4845_s5 + $0x70] ss:$8 sps:$4 sm:$0xff]   ;;  %v3431_v61 = vld [vmem:[%s4845_s5 + $0x1f4] ss:$8 sps:$4 sm:$0xff]  }
 0x2ea   : > { %v3429_v62 = vld [vmem:[%s4845_s5 + $0x1f0] ss:$8 sps:$4 sm:$0xff]  }
 0x2eb   : > { %v1352_v1 = vmul.f32 %v4208_v63, %v4208_v63  ;;  %v4214_v2 = vsub.f32 %v4146_v52, %v1349_v0  ;;  %v3380_v52 = vld [vmem:[%s4845_s5 + $0x64] ss:$8 sps:$4 sm:$0xff]   ;;  %v3434_v0 = vld [vmem:[%s4845_s5 + $0xd4] ss:$8 sps:$4 sm:$0xff]  }
 0x2ed   : > { %v1354_v3 = vsel %vm1181_vm14, %v1352_v1, 0.0  ;;  %v1353_v4 = vmul.f32 %v4214_v2, %v4214_v2  ;;  %v3432_v1 = vld [vmem:[%s4845_s5 + $0xd0] ss:$8 sps:$4 sm:$0xff]  }
 0x2ee   : > { %v1355_v5 = vrot.slane %v1354_v3, 4 }
 0x2ef   : > { %v1361_v6 = vsel %vm1181_vm14, %v1353_v4, 0.0  ;;  %v3435_v4 = vld [vmem:[%s4845_s5 + $0x1e0] ss:$8 sps:$4 sm:$0xff]  }
 0x2f0   : > { %v1356_v7 = vadd.f32 %v1355_v5, %v1354_v3  ;;  %v1362_v8 = vrot.slane %v1361_v6, 4  ;;  %v3437_v3 = vld [vmem:[%s4845_s5 + $0x1e4] ss:$8 sps:$4 sm:$0xff]  }
 0x2f1   : > { %v3440_v5 = vld [vmem:[%s4845_s5 + $0xc4] ss:$8 sps:$4 sm:$0xff]  }
 0x2f2   : > { %v1357_v9 = vrot.slane %v1356_v7, 2  ;;  %v1363_v10 = vadd.f32 %v1362_v8, %v1361_v6  ;;  %v3438_v6 = vld [vmem:[%s4845_s5 + $0xc0] ss:$8 sps:$4 sm:$0xff]   ;;  %v3441_v8 = vld [vmem:[%s4845_s5 + $0x1d0] ss:$8 sps:$4 sm:$0xff]  }
 0x2f4   : > { %v1364_v11 = vrot.slane %v1363_v10, 2  ;;  %v1358_v12 = vadd.f32 %v1357_v9, %v1356_v7  ;;  %v3443_v7 = vld [vmem:[%s4845_s5 + $0x1d4] ss:$8 sps:$4 sm:$0xff]  }
 0x2f5   : > { %v3446_v9 = vld [vmem:[%s4845_s5 + $0xb4] ss:$8 sps:$4 sm:$0xff]  }
 0x2f6   : > { %v1365_v13 = vadd.f32 %v1364_v11, %v1363_v10  ;;  %v1359_v14 = vrot.slane %v1358_v12, 1  ;;  %v3444_v10 = vld [vmem:[%s4845_s5 + $0xb0] ss:$8 sps:$4 sm:$0xff]   ;;  %v3449_v11 = vld [vmem:[%s4845_s5 + $0x1c4] ss:$8 sps:$4 sm:$0xff]  }
 0x2f8   : > { %v1366_v15 = vrot.slane %v1365_v13, 1  ;;  %v1360_v17 = vadd.f32 %v1359_v14, %v1358_v12  ;;  %v3447_v12 = vld [vmem:[%s4845_s5 + $0x1c0] ss:$8 sps:$4 sm:$0xff]   ;;  %v3452_v14 = vld [vmem:[%s4845_s5 + $0xa4] ss:$8 sps:$4 sm:$0xff]  }
 0x2fa   : > { %v1367_v16 = vadd.f32 %v1366_v15, %v1365_v13  ;;  %v3450_v13 = vld [vmem:[%s4845_s5 + $0xa0] ss:$8 sps:$4 sm:$0xff]   ;;  %v3455_v15 = vld [vmem:[%s4845_s5 + $0x1b4] ss:$8 sps:$4 sm:$0xff]  }
 0x2fc   : > { %1432 = vmatprep.mubr.f32.mxu1 %v1367_v16  ;;  %v3453_v16 = vld [vmem:[%s4845_s5 + $0x1b0] ss:$8 sps:$4 sm:$0xff]  }
 0x2fd   : > { %1433 = vmatmul.mubr.f32.vlgmr.msra.gmra.mxu1 %v1360_v17  ;;  %v3458_v17 = vld [vmem:[%s4845_s5 + $0x94] ss:$8 sps:$4 sm:$0xff]  }
 0x2fe   : > { %2268 = vmatpush1.bf16.msra.mxu1 %v3381_v19  ;;  %v3461_v19 = vld [vmem:[%s4845_s5 + $0x1a4] ss:$8 sps:$4 sm:$0xff]  }
 0x2ff   : > { %2269 = vmatprep.subr.bf16.mxu1 %v3389_v22  ;;  %v3467_v22 = vld [vmem:[%s4845_s5 + $0x194] ss:$8 sps:$4 sm:$0xff]  }
 0x302   : > { %2270 = vmatpush1.bf16.msra.mxu1 %v3387_v21  ;;  %v3459_v21 = vld [vmem:[%s4845_s5 + $0x1a0] ss:$8 sps:$4 sm:$0xff]  }
 0x303   : > { %2271 = vmatprep.subr.bf16.mxu1 %v3395_v24  ;;  %v3465_v24 = vld [vmem:[%s4845_s5 + $0x190] ss:$8 sps:$4 sm:$0xff]  }
 0x306   : > { %2272 = vmatpush1.bf16.msra.mxu1 %v3393_v23  ;;  %v3462_v23 = vld [vmem:[%s4845_s5 + $0x80] ss:$8 sps:$4 sm:$0xff]  }
 0x307   : > { %2273 = vmatprep.subr.bf16.mxu1 %v3401_v28 }
 0x30a   : > { %2274 = vmatpush1.bf16.msra.mxu1 %v3399_v29 }
 0x30b   : > { %2275 = vmatprep.subr.bf16.mxu1 %v3407_v32 }
 0x30e   : > { %2276 = vmatpush1.bf16.msra.mxu1 %v3405_v33 }
 0x30f   : > { %2277 = vmatprep.subr.bf16.mxu1 %v3413_v36 }
 0x312   : > { %2278 = vmatpush1.bf16.msra.mxu1 %v3411_v37 }
 0x313   : > { %2279 = vmatprep.subr.bf16.mxu1 %v3419_v42 }
 0x316   : > { %2280 = vmatpush1.bf16.msra.mxu1 %v3417_v43 }
 0x317   : > { %2281 = vmatprep.subr.bf16.mxu1 %v3425_v47  ;;  %v1595_v47 = vld [vmem:[#allocation2] sm:$0x77] }
 0x31a   : > { %2282 = vmatpush1.bf16.msra.mxu1 %v3423_v48 }
 0x31b   : > { %2283 = vmatprep.subr.bf16.mxu1 %v3431_v61 }
 0x31e   : > { %2284 = vmatpush2.bf16.msra.mxu1 %v3429_v62 }
 0x31f   : > { %2285 = vmatprep.subr.bf16.mxu1 %v3437_v3  ;;  %v3470_v3 = vld [vmem:[%s4845_s5 + $0x270] ss:$8 sps:$4 sm:$0xff]  }
 0x322   : > { %2286 = vmatpush2.bf16.msra.mxu1 %v3435_v4 }
 0x323   : > { %2287 = vmatprep.subr.bf16.mxu1 %v3443_v7 }
 0x326   : > { %2288 = vmatpush2.bf16.msra.mxu1 %v3441_v8 }
 0x327   : > { %2289 = vmatprep.subr.bf16.mxu1 %v3449_v11  ;;  %v3478_v11 = vld [vmem:[%s4845_s5 + $0x260] ss:$8 sps:$4 sm:$0xff]  }
 0x32a   : > { %2290 = vmatpush2.bf16.msra.mxu1 %v3447_v12 }
 0x32b   : > { %2291 = vmatprep.subr.bf16.mxu1 %v3455_v15 }
 0x32e   : > { %2292 = vmatpush2.bf16.msra.mxu1 %v3453_v16  ;;  %v3485_v16 = vld [vmem:[%s4845_s5 + $0x254] ss:$8 sps:$4 sm:$0xff]  }
 0x32f   : > { %2293 = vmatprep.subr.bf16.mxu1 %v3461_v19  ;;  %v3483_v19 = vld [vmem:[%s4845_s5 + $0x250] ss:$8 sps:$4 sm:$0xff]  }
 0x332   : > { %2294 = vmatpush2.bf16.msra.mxu1 %v3459_v21  ;;  %v3486_v21 = vld [vmem:[%s4845_s5 + $0x240] ss:$8 sps:$4 sm:$0xff]  }
 0x333   : > { %2295 = vmatprep.subr.bf16.mxu1 %v3467_v22  ;;  %v3491_v22 = vld [vmem:[%s4845_s5 + $0x234] ss:$8 sps:$4 sm:$0xff]  }
 0x336   : > { %2296 = vmatpush2.bf16.msra.mxu1 %v3465_v24  ;;  %v3494_v24 = vld [vmem:[%s4845_s5 + $0x224] ss:$8 sps:$4 sm:$0xff]  }
 0x3bd   : > { %v3143_v25 = vpop.f32.mrf.mxu1 }
 0x3bf   : > { %v3144_v26 = vpop.f32.mrf.mxu1 }
 0x3c0   : > { %v3145_v27 = vadd.f32 %v3144_v26, %v3143_v25  ;;  %v3472_v25 = vld [vmem:[%s4845_s5 + $0x274] ss:$8 sps:$4 sm:$0xff]   ;;  %v3475_v26 = vld [vmem:[%s4845_s5 + $0x180] ss:$8 sps:$4 sm:$0xff]  }
 0x3c2   : > { %v1438_v51 = vmul.f32 0.03125, %v3145_v27  ;;  %v3477_v27 = vld [vmem:[%s4845_s5 + $0x184] ss:$8 sps:$4 sm:$0xff]  }
 0x3c3   : > { %2297 = vmatprep.subr.bf16.mxu1 %v3477_v27  ;;  %v3495_v27 = vld [vmem:[%s4845_s5 + $0x210] ss:$8 sps:$4 sm:$0xff]  }
 0x3c4   : > { %2963 = vmatmul.mubr.msk.f32.vlgmr.msra.gmra.mxu0 %vm1267_vm15, %v1438_v51  ;;  %2298 = vmatpush2.bf16.msra.mxu1 %v3475_v26  ;;  %v3497_v26 = vld [vmem:[%s4845_s5 + $0x214] ss:$8 sps:$4 sm:$0xff]  }
 0x3c5   : > { %2227 = vmatpush1.bf16.msra.mxu0 %v3375_v49 }
 0x3c6   : > { %2228 = vmatprep.subr.bf16.mxu0 %v3380_v52 }
 0x3c9   : > { %2229 = vmatpush1.bf16.msra.mxu0 %v3378_v53 }
 0x3ca   : > { %2230 = vmatprep.subr.bf16.mxu0 %v3386_v54  ;;  %v1139_v54 = vld [vmem:[%s4843_s3] sm:$0x3] }
 0x3cd   : > { %2231 = vmatpush1.bf16.msra.mxu0 %v3384_v55 }
 0x3ce   : > { %2232 = vmatprep.subr.bf16.mxu0 %v3392_v56  ;;  %v1140_v56 = vld [vmem:[%s4844_s4] sm:$0x3] }
 0x3cf   : > { %v1542_v29 = vrot.slane %v1140_v56, %v4133_v39 }
 0x3d1   : > { %2233 = vmatpush1.bf16.msra.mxu0 %v3390_v57 }
 0x3d2   : > { %2234 = vmatprep.subr.bf16.mxu0 %v3398_v58  ;;  %v1529_v58 = vrot.slane %v1139_v54, %v4133_v39 }
 0x3d5   : > { %2235 = vmatpush1.bf16.msra.mxu0 %v3396_v59 }
 0x3d6   : > { %2236 = vmatprep.subr.bf16.mxu0 %v3404_v30 }
 0x3d9   : > { %2237 = vmatpush1.bf16.msra.mxu0 %v3402_v31  ;;  %v1533_v31 = vrot.slane %v1139_v54, %v4138_v41  ;;  %v3506_v54 = vld [vmem:[%s4845_s5 + $0x2e4] ss:$8 sps:$4 sm:$0xff]  }
 0x3da   : > { %2238 = vmatprep.subr.bf16.mxu0 %v3410_v34  ;;  %v1546_v34 = vrot.slane %v1140_v56, %v4138_v41  ;;  %v3509_v56 = vld [vmem:[%s4845_s5 + $0x2d4] ss:$8 sps:$4 sm:$0xff]  }
 0x3dd   : > { %2239 = vmatpush1.bf16.msra.mxu0 %v3408_v35 }
 0x3de   : > { %2240 = vmatprep.subr.bf16.mxu0 %v3416_v38 }
 0x3e1   : > { %2241 = vmatpush1.bf16.msra.mxu0 %v3414_v40 }
 0x3e2   : > { %2242 = vmatprep.subr.bf16.mxu0 %v3422_v44 }
 0x3e5   : > { %2243 = vmatpush2.bf16.msra.mxu0 %v3420_v46 }
 0x3e6   : > { %2244 = vmatprep.subr.bf16.mxu0 %v3428_v50 }
 0x3e9   : > { %2245 = vmatpush2.bf16.msra.mxu0 %v3426_v60 }
 0x3ea   : > { %2246 = vmatprep.subr.bf16.mxu0 %v3434_v0 }
 0x3ed   : > { %2247 = vmatpush2.bf16.msra.mxu0 %v3432_v1 }
 0x3ee   : > { %2248 = vmatprep.subr.bf16.mxu0 %v3440_v5  ;;  %v3480_v5 = vld [vmem:[%s4845_s5 + $0x264] ss:$8 sps:$4 sm:$0xff]  }
 0x3f1   : > { %2249 = vmatpush2.bf16.msra.mxu0 %v3438_v6 }
 0x3f2   : > { %2250 = vmatprep.subr.bf16.mxu0 %v3446_v9 }
 0x3f5   : > { %2251 = vmatpush2.bf16.msra.mxu0 %v3444_v10 }
 0x3f6   : > { %2252 = vmatprep.subr.bf16.mxu0 %v3452_v14 }
 0x3f9   : > { %2253 = vmatpush2.bf16.msra.mxu0 %v3450_v13 }
 0x3fa   : > { %2254 = vmatprep.subr.bf16.mxu0 %v3458_v17 }
 0x3fd   : > { %2255 = vmatpush2.bf16.msra.mxu0 %v3456_v18 }
 0x3fe   : > { %2256 = vmatprep.subr.bf16.mxu0 %v3464_v20  ;;  %v3488_v20 = vld [vmem:[%s4845_s5 + $0x244] ss:$8 sps:$4 sm:$0xff]  }
 0x401   : > { %2257 = vmatpush2.bf16.msra.mxu0 %v3462_v23  ;;  %v3489_v23 = vld [vmem:[%s4845_s5 + $0x230] ss:$8 sps:$4 sm:$0xff]  }
 0x402   : > { %2308 = vmatprep.subr.bf16.mxu0 %v3472_v25  ;;  %v3492_v25 = vld [vmem:[%s4845_s5 + $0x220] ss:$8 sps:$4 sm:$0xff]  }
 0x484   : > { %v1508_v49 = vpop.f32.mrf.mxu0 }
 0x485   : > { %v1509_v51 = vadd.f32 1e-05, %v1508_v49  ;;  %v3500_v49 = vld [vmem:[%s4845_s5 + $0x204] ss:$8 sps:$4 sm:$0xff]  }
 0x486   : > { %v1510_v52 = vpop.f32.mrf.mxu0 }
 0x487   : > { %3525 = vrsqrt.f32 %v1509_v51  ;;  %v1511_v53 = vadd.f32 1e-05, %v1510_v52  ;;  %v3498_v51 = vld [vmem:[%s4845_s5 + $0x200] ss:$8 sps:$4 sm:$0xff]   ;;  %v3503_v52 = vld [vmem:[%s4845_s5 + $0x2f4] ss:$8 sps:$4 sm:$0xff]  }
 0x489   : > { %3527 = vrsqrt.f32 %v1511_v53  ;;  %v3501_v53 = vld [vmem:[%s4845_s5 + $0x2f0] ss:$8 sps:$4 sm:$0xff]  }
 0x494   : > { %v3526_v55 = vpop.eup %3525 }
 0x495   : > { %v1518_v57 = vrot.slane %v3526_v55, %v4133_v39  ;;  %v3504_v55 = vld [vmem:[%s4845_s5 + $0x2e0] ss:$8 sps:$4 sm:$0xff]  }
 0x496   : > { %v3528_v59 = vpop.eup %3527 }
 0x497   : > { %v1523_v28 = vmul.f32 %v1518_v57, %v4208_v63  ;;  %v1522_v30 = vrot.slane %v3528_v59, %v4133_v39  ;;  %v3507_v57 = vld [vmem:[%s4845_s5 + $0x2d0] ss:$8 sps:$4 sm:$0xff]   ;;  %v3510_v59 = vld [vmem:[%s4845_s5 + $0x2c0] ss:$8 sps:$4 sm:$0xff]  }
 0x499   : > { %v1536_v32 = vmul.f32 %v1529_v58, %v1523_v28  ;;  %v1524_v33 = vmul.f32 %v1522_v30, %v4214_v2  ;;  %v3512_v58 = vld [vmem:[%s4845_s5 + $0x2c4] ss:$8 sps:$4 sm:$0xff]   ;;  %v3515_v28 = vld [vmem:[%s4845_s5 + $0x2b4] ss:$8 sps:$4 sm:$0xff]  }
 0x49a   : > { %v3518_v30 = vld [vmem:[%s4845_s5 + $0x2a4] ss:$8 sps:$4 sm:$0xff]  }
 0x49b   : > { %v1549_v35 = vadd.f32 %v1542_v29, %v1536_v32  ;;  %v1537_v36 = vmul.f32 %v1533_v31, %v1524_v33  ;;  %v3513_v29 = vld [vmem:[%s4845_s5 + $0x2b0] ss:$8 sps:$4 sm:$0xff]   ;;  %v3516_v31 = vld [vmem:[%s4845_s5 + $0x2a0] ss:$8 sps:$4 sm:$0xff]   ;;  %v3521_v32 = vld [vmem:[%s4845_s5 + $0x294] ss:$8 sps:$4 sm:$0xff]  }
 0x49c   : > { %v3519_v33 = vld [vmem:[%s4845_s5 + $0x290] ss:$8 sps:$4 sm:$0xff]  }
 0x49d   : > { %v1550_v37 = vadd.f32 %v1546_v34, %v1537_v36  ;;  %v1551_v38 = vmax.f32 %v1549_v35, 0.0  ;;  %v3524_v34 = vld [vmem:[%s4845_s5 + $0x284] ss:$8 sps:$4 sm:$0xff]   ;;  %v3522_v35 = vld [vmem:[%s4845_s5 + $0x280] ss:$8 sps:$4 sm:$0xff]  }
 0x49f   : > { %v1552_v40 = vmax.f32 %v1550_v37, 0.0 }
 0x4a1   : > { %v3074_v63 = vpack.c.bf16 %v1552_v40, %v1551_v38  ;;  %v4550_v38 = vld [vmem:[%s4849_s9 + $0xf8] sm:$0xff] }
 0x4a2   : > { %v4555_v40 = vld [vmem:[%s4849_s9 + $0x78] sm:$0xff]  ;;  %3146 = vmatprep.subr.mxu1 %v4550_v38 }
 0x4a3   : > { %v1581_v43 = vshrl.u32 %v3074_v63, 16  ;;  %v1584_v46 = vshll.u32 %v3074_v63, 16  ;;  %v4560_v63 = vld [vmem:[%s4849_s9 + $0xf0] sm:$0xff] }
 0x4a5   : > { %v1583_v2 = vrot.slane %v1581_v43, 7  ;;  %v4566_v43 = vld [vmem:[%s4849_s9 + $0x70] sm:$0xff] }
 0x4a7   : > { %v1586_v48 = vor.u32 %v1584_v46, %v1583_v2  ;;  %v4572_v2 = vld [vmem:[%s4849_s9 + $0xe8] sm:$0xff] }
 0x4a8   : > { %v4578_v46 = vld [vmem:[%s4849_s9 + $0x68] sm:$0xff] }
 0x4a9   : > { %v1596_v50 = vsel %vm1594_vm6, %v1586_v48, %v1595_v47  ;;  %v4584_v47 = vld [vmem:[%s4849_s9 + $0xe0] sm:$0xff] }
 0x4aa   : > { %1597 = vst [vmem:[#allocation2] sm:$0x77] %v1596_v50  ;;  %v4590_v48 = vld [vmem:[%s4849_s9 + $0x60] sm:$0xff]  ;;  %v4596_v50 = vld [vmem:[%s4849_s9 + $0xd8] sm:$0xff] }
 0x4b1   : > { %v1598_v60 = vld [vmem:[#allocation2] sm:$0x33] }
 0x4b2   : > { %v4447_v61 = vld [vmem:[#allocation2] sm:$0x66]  ;;  %v2965_v0 = vcombine.low %v1598_v60, %v1598_v60  ;;  %v2966_v1 = vcombine.high %v1598_v60, %v1598_v60  ;;  %v4602_v60 = vld [vmem:[%s4849_s9 + $0x58] sm:$0xff] }
 0x4b3   : > { %v1599_v62 = vld [vmem:[#allocation2] sm:$0x77]  ;;  %v2970_v4 = vcombine.high %v4447_v61, %v4447_v61  ;;  %v2969_v36 = vcombine.low %v4447_v61, %v4447_v61  ;;  %v4608_v61 = vld [vmem:[%s4849_s9 + $0xd0] sm:$0xff] }
 0x4b4   : > { %v2967_v6 = vcombine.low %v1599_v62, %v1599_v62  ;;  %v2968_v7 = vcombine.high %v1599_v62, %v1599_v62  ;;  %2258 = vmatprep.mubr.bf16.mxu0 %v2966_v1  ;;  %v4614_v62 = vld [vmem:[%s4849_s9 + $0x50] sm:$0xff]  ;;  %v4628_v1 = vld [vmem:[%s4849_s9 + $0x48] sm:$0xff] }
 0x4b5   : > { %v1635_v8 = vrot.slane %v2970_v4, 1  ;;  %2259 = vmatmul.mubr.bf16.vlgmr.msra.gmra.mxu0 %v2965_v0  ;;  %v1634_v37 = vrot.slane %v2969_v36, 1  ;;  %v4620_v0 = vld [vmem:[%s4849_s9 + $0xc8] sm:$0xff]  ;;  %v4640_v4 = vld [vmem:[%s4849_s9 + $0x40] sm:$0xff] }
 0x4b6   : > { %v1623_v9 = vshll.u32 %v2968_v7, 16  ;;  %v1616_v10 = vshll.u32 %v2967_v6, 16  ;;  %2309 = vmatpush1.bf16.msra.mxu0 %v3470_v3  ;;  %v1621_v12 = vshrl.u32 %v2968_v7, 16  ;;  %v1614_v14 = vshrl.u32 %v2967_v6, 16  ;;  %v4634_v3 = vld [vmem:[%s4849_s9 + $0xc0] sm:$0xff]  ;;  %v4652_v6 = vld [vmem:[%s4849_s9 + $0x38] sm:$0xff] }
 0x4b7   : > { %2340 = vmatprep.mubr.bf16.mxu0 %v1635_v8  ;;  %2310 = vmatprep.subr.bf16.mxu0 %v3480_v5  ;;  %v4646_v5 = vld [vmem:[%s4849_s9 + $0xb8] sm:$0xff]  ;;  %v4658_v7 = vld [vmem:[%s4849_s9 + $0xb0] sm:$0xff] }
 0x4b8   : > { %v1625_v13 = vrot.slane %v1623_v9, 1  ;;  %v1618_v15 = vrot.slane %v1616_v10, 1  ;;  %v4664_v8 = vld [vmem:[%s4849_s9 + $0x30] sm:$0xff]  ;;  %v4670_v9 = vld [vmem:[%s4849_s9 + $0xa8] sm:$0xff] }
 0x4b9   : > { %v4676_v10 = vld [vmem:[%s4849_s9 + $0x28] sm:$0xff] }
 0x4ba   : > { %v1626_v17 = vor.u32 %v1625_v13, %v1621_v12  ;;  %v1619_v18 = vor.u32 %v1618_v15, %v1614_v14  ;;  %2311 = vmatpush1.bf16.msra.mxu0 %v3478_v11  ;;  %v4682_v11 = vld [vmem:[%s4849_s9 + $0xa0] sm:$0xff]  ;;  %v4694_v13 = vld [vmem:[%s4849_s9 + $0x98] sm:$0xff]  ;;  %v4706_v15 = vld [vmem:[%s4849_s9 + $0x90] sm:$0xff] }
 0x4bb   : > { %2312 = vmatprep.subr.bf16.mxu0 %v3485_v16  ;;  %v4688_v12 = vld [vmem:[%s4849_s9 + $0x20] sm:$0xff]  ;;  %v4700_v14 = vld [vmem:[%s4849_s9 + $0x18] sm:$0xff]  ;;  %v4711_v16 = vld [vmem:[%s4849_s9 + $0x10] sm:$0xff] }
 0x4bc   : > { %2299 = vmatprep.mubr.bf16.mxu1 %v1626_v17  ;;  %v4716_v17 = vld [vmem:[%s4849_s9 + $0x88] sm:$0xff] }
 0x4bd   : > { %2300 = vmatmul.mubr.bf16.vlgmr.msra.gmra.mxu1 %v1619_v18  ;;  %v4722_v18 = vld [vmem:[%s4849_s9 + $0x8] sm:$0xff] }
 0x4be   : > { %2313 = vmatpush1.bf16.msra.mxu0 %v3483_v19  ;;  %3147 = vmatpush3.msra.mxu1 %v4555_v40  ;;  %v4728_v19 = vld [vmem:[%s4849_s9 + $0x80] sm:$0xff] }
 0x4bf   : > { %2314 = vmatprep.subr.bf16.mxu0 %v3488_v20  ;;  %3148 = vmatprep.subr.mxu1 %v4560_v63  ;;  %v4734_v20 = vld [vmem:[%s4849_s9] sm:$0xff] }
 0x4c0   : > { %3149 = vmatpush3.msra.mxu1 %v4566_v43 }
 0x4c1   : > { %3150 = vmatprep.subr.mxu1 %v4572_v2 }
 0x4c2   : > { %2315 = vmatpush1.bf16.msra.mxu0 %v3486_v21  ;;  %3151 = vmatpush3.msra.mxu1 %v4578_v46  ;;  %v2390_v21 = vld [vmem:[%s4850_s10 + $0x38] sm:$0xff] }
 0x4c3   : > { %2316 = vmatprep.subr.bf16.mxu0 %v3491_v22  ;;  %3152 = vmatprep.subr.mxu1 %v4584_v47 }
 0x4c4   : > { %3153 = vmatpush3.msra.mxu1 %v4590_v48 }
 0x4c5   : > { %3154 = vmatprep.subr.mxu1 %v4596_v50 }
 0x4c6   : > { %2317 = vmatpush1.bf16.msra.mxu0 %v3489_v23  ;;  %3155 = vmatpush3.msra.mxu1 %v4602_v60 }
 0x4c7   : > { %2318 = vmatprep.subr.bf16.mxu0 %v3494_v24  ;;  %3156 = vmatprep.subr.mxu1 %v4608_v61 }
 0x4c8   : > { %3157 = vmatpush3.msra.mxu1 %v4614_v62 }
 0x4c9   : > { %3158 = vmatprep.subr.mxu1 %v4620_v0 }
 0x4ca   : > { %2319 = vmatpush1.bf16.msra.mxu0 %v3492_v25  ;;  %3159 = vmatpush3.msra.mxu1 %v4628_v1 }
 0x4cb   : > { %2320 = vmatprep.subr.bf16.mxu0 %v3497_v26  ;;  %3160 = vmatprep.subr.mxu1 %v4634_v3 }
 0x4cc   : > { %3161 = vmatpush3.msra.mxu1 %v4640_v4 }
 0x4cd   : > { %3162 = vmatprep.subr.mxu1 %v4646_v5 }
 0x4ce   : > { %2321 = vmatpush1.bf16.msra.mxu0 %v3495_v27  ;;  %3163 = vmatpush3.msra.mxu1 %v4652_v6 }
 0x4cf   : > { %2322 = vmatprep.subr.bf16.mxu0 %v3500_v49  ;;  %3164 = vmatprep.subr.mxu1 %v4658_v7 }
 0x4d0   : > { %3165 = vmatpush3.msra.mxu1 %v4664_v8 }
 0x4d1   : > { %3166 = vmatprep.subr.mxu1 %v4670_v9 }
 0x4d2   : > { %2323 = vmatpush1.bf16.msra.mxu0 %v3498_v51  ;;  %3167 = vmatpush3.msra.mxu1 %v4676_v10 }
 0x4d3   : > { %2324 = vmatprep.subr.bf16.mxu0 %v3503_v52  ;;  %3168 = vmatprep.subr.mxu1 %v4682_v11  ;;  %v1734_v52 = vld [vmem:[%s4846_s6] sm:$0x3] }
 0x4d4   : > { %3169 = vmatpush3.msra.mxu1 %v4688_v12 }
 0x4d5   : > { %3170 = vmatprep.subr.mxu1 %v4694_v13 }
 0x4d6   : > { %2325 = vmatpush2.bf16.msra.mxu0 %v3501_v53  ;;  %3171 = vmatpush3.msra.mxu1 %v4700_v14  ;;  %v1739_v53 = vrot.slane %v1734_v52, %v4133_v39 }
 0x4d7   : > { %2326 = vmatprep.subr.bf16.mxu0 %v3506_v54  ;;  %3172 = vmatprep.subr.mxu1 %v4706_v15  ;;  %v1743_v54 = vrot.slane %v1734_v52, %v4138_v41  ;;  %v2389_v52 = vld [vmem:[%s4850_s10 + $0x30] sm:$0xff] }
 0x4d8   : > { %3173 = vmatpush3.msra.mxu1 %v4711_v16 }
 0x4d9   : > { %3174 = vmatprep.subr.mxu1 %v4716_v17 }
 0x4da   : > { %2327 = vmatpush2.bf16.msra.mxu0 %v3504_v55  ;;  %3175 = vmatpush3.msra.mxu1 %v4722_v18 }
 0x4db   : > { %2328 = vmatprep.subr.bf16.mxu0 %v3509_v56  ;;  %3176 = vmatprep.subr.mxu1 %v4728_v19 }
 0x4dc   : > { %3177 = vmatpush3.msra.mxu1 %v4734_v20 }
 0x4dd   : > { %2503 = vmatprep.subr.mxu1 %v2390_v21 }
 0x4de   : > { %2329 = vmatpush2.bf16.msra.mxu0 %v3507_v57 }
 0x4df   : > { %2330 = vmatprep.subr.bf16.mxu0 %v3512_v58 }
 0x4e2   : > { %2331 = vmatpush2.bf16.msra.mxu0 %v3510_v59 }
 0x4e3   : > { %2332 = vmatprep.subr.bf16.mxu0 %v3515_v28 }
 0x4e6   : > { %2333 = vmatpush2.bf16.msra.mxu0 %v3513_v29 }
 0x4e7   : > { %2334 = vmatprep.subr.bf16.mxu0 %v3518_v30 }
 0x4ea   : > { %2335 = vmatpush2.bf16.msra.mxu0 %v3516_v31 }
 0x4eb   : > { %2336 = vmatprep.subr.bf16.mxu0 %v3521_v32 }
 0x4ee   : > { %2337 = vmatpush2.bf16.msra.mxu0 %v3519_v33 }
 0x4ef   : > { %2338 = vmatprep.subr.bf16.mxu0 %v3524_v34 }
 0x4f2   : > { %2339 = vmatpush2.bf16.msra.mxu0 %v3522_v35 }
 0x4f3   : > { %2674 = vmatprep.subr.mxu0 %v2390_v21 }
 0x4f5   : > { %2341 = vmatmul.mubr.bf16.vlgmr.msra.gmra.mxu0 %v1634_v37 }
 0x4f6   : > { %2714 = vmatprep.mubr.f32.mxu0 %v3541_v45  ;;  %2675 = vmatpush1.msra.mxu0 %v2389_v52 }
 0x575   : > { %v2260_v22 = vpop.f32.mrf.mxu0 }
 0x576   : > { %v2261_v55 = vadd.f32 %v2260_v22, %v1739_v53  ;;  %v2388_v53 = vld [vmem:[%s4850_s10 + $0x28] sm:$0xff] }
 0x577   : > { %v2262_v23 = vpop.f32.mrf.mxu0  ;;  %2676 = vmatprep.subr.mxu0 %v2388_v53 }
 0x578   : > { %v2263_v56 = vadd.f32 %v2262_v23, %v1743_v54  ;;  %v2387_v54 = vld [vmem:[%s4850_s10 + $0x20] sm:$0xff] }
 0x579   : > { %v2264_v24 = vpop.f32.mrf.mxu0  ;;  %2677 = vmatpush1.msra.mxu0 %v2387_v54 }
 0x57b   : > { %v2265_v25 = vpop.f32.mrf.mxu0 }
 0x57d   : > { %v2301_v26 = vpop.f32.mrf.mxu1 }
 0x57e   : > { %v2302_v57 = vadd.f32 %v2301_v26, %v2261_v55  ;;  %v2385_v55 = vld [vmem:[%s4850_s10 + $0x10] sm:$0xff] }
 0x57f   : > { %v2303_v27 = vpop.f32.mrf.mxu1 }
 0x580   : > { %v2304_v59 = vadd.f32 %v2303_v27, %v2263_v56  ;;  %v2384_v56 = vld [vmem:[%s4850_s10 + $0x8] sm:$0xff] }
 0x581   : > { %v2305_v49 = vpop.f32.mrf.mxu1 }
 0x583   : > { %v2306_v51 = vpop.f32.mrf.mxu1 }
 0x5b5   : > { %v2342_v58 = vpop.f32.mrf.mxu0 }
 0x5b6   : > { %v4747_v28 = vadd.f32 %v2342_v58, %v2302_v57  ;;  %v2383_v57 = vld [vmem:[%s4850_s10] sm:$0xff] }
 0x5b7   : > { %v2344_v29 = vpop.f32.mrf.mxu0 }
 0x5b8   : > { %v2391_v30 = vsel %vm1181_vm14, %v4747_v28, 0.0  ;;  %v4751_v31 = vadd.f32 %v2344_v29, %v2304_v59 }
 0x5b9   : > { %v2392_v32 = vrot.slane %v2391_v30, 4  ;;  %v2346_v33 = vpop.f32.mrf.mxu0 }
 0x5ba   : > { %v2398_v34 = vsel %vm1181_vm14, %v4751_v31, 0.0 }
 0x5bb   : > { %v2393_v35 = vadd.f32 %v2392_v32, %v2391_v30  ;;  %v2399_v36 = vrot.slane %v2398_v34, 4  ;;  %v2347_v37 = vpop.f32.mrf.mxu0 }
 0x5bd   : > { %v2394_v21 = vrot.slane %v2393_v35, 2  ;;  %v2400_v22 = vadd.f32 %v2399_v36, %v2398_v34 }
 0x5bf   : > { %v2395_v23 = vadd.f32 %v2394_v21, %v2393_v35  ;;  %v2401_v24 = vrot.slane %v2400_v22, 2 }
 0x5c1   : > { %v2402_v25 = vadd.f32 %v2401_v24, %v2400_v22  ;;  %v2396_v26 = vrot.slane %v2395_v23, 1 }
 0x5c3   : > { %v2403_v27 = vrot.slane %v2402_v25, 1  ;;  %v2397_v51 = vadd.f32 %v2396_v26, %v2395_v23 }
 0x5c5   : > { %v2404_v49 = vadd.f32 %v2403_v27, %v2402_v25 }
 0x5c7   : > { %2469 = vmatprep.mubr.f32.mxu1 %v2404_v49 }
 0x5c8   : > { %2470 = vmatmul.mubr.f32.vlgmr.msra.gmra.mxu1 %v2397_v51 }
 0x5c9   : > { %2543 = vmatprep.mubr.f32.mxu1 %v3541_v45  ;;  %2504 = vmatpush1.msra.mxu1 %v2389_v52  ;;  %v2386_v45 = vld [vmem:[%s4850_s10 + $0x18] sm:$0xff] }
 0x5ca   : > { %2505 = vmatprep.subr.mxu1 %v2388_v53  ;;  %2678 = vmatprep.subr.mxu0 %v2386_v45 }
 0x5cb   : > { %2506 = vmatpush1.msra.mxu1 %v2387_v54  ;;  %2679 = vmatpush1.msra.mxu0 %v2385_v55 }
 0x5cc   : > { %2507 = vmatprep.subr.mxu1 %v2386_v45  ;;  %2680 = vmatprep.subr.mxu0 %v2384_v56 }
 0x5cd   : > { %2508 = vmatpush1.msra.mxu1 %v2385_v55  ;;  %2681 = vmatpush1.msra.mxu0 %v2383_v57 }
 0x5ce   : > { %2509 = vmatprep.subr.mxu1 %v2384_v56 }
 0x5cf   : > { %2510 = vmatpush1.msra.mxu1 %v2383_v57 }
 0x5d0   : > { %3181 = vmatprep.subr.mxu1 %v4550_v38 }
 0x688   : > { %v3178_v58 = vpop.f32.mrf.mxu1 }
 0x68a   : > { %v3179_v59 = vpop.f32.mrf.mxu1 }
 0x68b   : > { %v3180_v29 = vadd.f32 %v3179_v59, %v3178_v58 }
 0x68d   : > { %v2475_v30 = vmul.f32 0.03125, %v3180_v29  ;;  %v2793_v29 = vld [vmem:[%s3760_s12] sm:$0x77] }
 0x68f   : > { %3067 = vmatmul.mubr.msk.f32.vlgmr.msra.gmra.mxu1 %vm1267_vm15, %v2475_v30 }
 0x690   : > { %3182 = vmatpush3.msra.mxu1 %v4555_v40 }
 0x691   : > { %3183 = vmatprep.subr.mxu1 %v4560_v63 }
 0x692   : > { %3184 = vmatpush3.msra.mxu1 %v4566_v43 }
 0x693   : > { %3185 = vmatprep.subr.mxu1 %v4572_v2 }
 0x694   : > { %3186 = vmatpush3.msra.mxu1 %v4578_v46 }
 0x695   : > { %3187 = vmatprep.subr.mxu1 %v4584_v47 }
 0x696   : > { %3188 = vmatpush3.msra.mxu1 %v4590_v48 }
 0x697   : > { %3189 = vmatprep.subr.mxu1 %v4596_v50 }
 0x698   : > { %3190 = vmatpush3.msra.mxu1 %v4602_v60 }
 0x699   : > { %3191 = vmatprep.subr.mxu1 %v4608_v61 }
 0x69a   : > { %3192 = vmatpush3.msra.mxu1 %v4614_v62 }
 0x69b   : > { %3193 = vmatprep.subr.mxu1 %v4620_v0 }
 0x69c   : > { %3194 = vmatpush3.msra.mxu1 %v4628_v1 }
 0x69d   : > { %3195 = vmatprep.subr.mxu1 %v4634_v3 }
 0x69e   : > { %3196 = vmatpush3.msra.mxu1 %v4640_v4 }
 0x69f   : > { %3197 = vmatprep.subr.mxu1 %v4646_v5 }
 0x6a0   : > { %3198 = vmatpush3.msra.mxu1 %v4652_v6 }
 0x6a1   : > { %3199 = vmatprep.subr.mxu1 %v4658_v7 }
 0x6a2   : > { %3200 = vmatpush3.msra.mxu1 %v4664_v8 }
 0x6a3   : > { %3201 = vmatprep.subr.mxu1 %v4670_v9 }
 0x6a4   : > { %3202 = vmatpush3.msra.mxu1 %v4676_v10 }
 0x6a5   : > { %3203 = vmatprep.subr.mxu1 %v4682_v11 }
 0x6a6   : > { %3204 = vmatpush3.msra.mxu1 %v4688_v12 }
 0x6a7   : > { %3205 = vmatprep.subr.mxu1 %v4694_v13 }
 0x6a8   : > { %3206 = vmatpush3.msra.mxu1 %v4700_v14 }
 0x6a9   : > { %3207 = vmatprep.subr.mxu1 %v4706_v15 }
 0x6aa   : > { %3208 = vmatpush3.msra.mxu1 %v4711_v16 }
 0x6ab   : > { %3209 = vmatprep.subr.mxu1 %v4716_v17 }
 0x6ac   : > { %3210 = vmatpush3.msra.mxu1 %v4722_v18 }
 0x6ad   : > { %3211 = vmatprep.subr.mxu1 %v4728_v19  ;;  %v2759_v19 = vld [vmem:[%s3755_s28] sm:$0x77] }
 0x6ae   : > { %3212 = vmatpush3.msra.mxu1 %v4734_v20  ;;  %v2349_v20 = vld [vmem:[%s4847_s7] sm:$0x3]  ;;  %v2760_v32 = vunpack.c.l.bf16 %v2759_v19  ;;  %v2761_v36 = vunpack.c.h.bf16 %v2759_v19 }
 0x6af   : > { %v2737_v34 = vrot.slane %v2349_v20, %v4133_v39  ;;  %v2741_v23 = vrot.slane %v2349_v20, %v4138_v41 }
 0x6b0   : > { %v2764_v24 = vrot.slane %v2760_v32, 1  ;;  %v2765_v49 = vrot.slane %v2761_v36, 1 }
 0x74f   : > { %v2545_v38 = vpop.f32.mrf.mxu1 }
 0x750   : > { %v2553_v40 = vrot.slane %v2545_v38, %v4133_v39 }
 0x751   : > { %v2547_v63 = vpop.f32.mrf.mxu1 }
 0x752   : > { %v2558_v43 = vsub.f32 %v4747_v28, %v2553_v40  ;;  %v2557_v2 = vrot.slane %v2547_v63, %v4133_v39 }
 0x754   : > { %v2560_v46 = vmul.f32 %v2558_v43, %v2558_v43  ;;  %v2559_v47 = vsub.f32 %v4751_v31, %v2557_v2  ;;  %v2350_v31 = vld [vmem:[%s4848_s8] sm:$0x3] }
 0x755   : > { %v2750_v21 = vrot.slane %v2350_v31, %v4133_v39  ;;  %v2754_v27 = vrot.slane %v2350_v31, %v4138_v41 }
 0x756   : > { %v2562_v48 = vsel %vm1181_vm14, %v2560_v46, 0.0  ;;  %v2561_v50 = vmul.f32 %v2559_v47, %v2559_v47 }
 0x757   : > { %v2563_v60 = vrot.slane %v2562_v48, 4 }
 0x758   : > { %v2569_v61 = vsel %vm1181_vm14, %v2561_v50, 0.0 }
 0x759   : > { %v2564_v62 = vadd.f32 %v2563_v60, %v2562_v48  ;;  %v2570_v0 = vrot.slane %v2569_v61, 4 }
 0x75b   : > { %v2565_v1 = vrot.slane %v2564_v62, 2  ;;  %v2571_v3 = vadd.f32 %v2570_v0, %v2569_v61 }
 0x75d   : > { %v2572_v4 = vrot.slane %v2571_v3, 2  ;;  %v2566_v5 = vadd.f32 %v2565_v1, %v2564_v62 }
 0x75f   : > { %v2573_v6 = vadd.f32 %v2572_v4, %v2571_v3  ;;  %v2567_v7 = vrot.slane %v2566_v5, 1 }
 0x761   : > { %v2574_v8 = vrot.slane %v2573_v6, 1  ;;  %v2568_v10 = vadd.f32 %v2567_v7, %v2566_v5 }
 0x763   : > { %v2575_v9 = vadd.f32 %v2574_v8, %v2573_v6 }
 0x765   : > { %2640 = vmatprep.mubr.f32.mxu1 %v2575_v9 }
 0x766   : > { %2641 = vmatmul.mubr.f32.vlgmr.msra.gmra.mxu1 %v2568_v10 }
 0x826   : > { %v3213_v11 = vpop.f32.mrf.mxu1 }
 0x828   : > { %v3214_v12 = vpop.f32.mrf.mxu1 }
 0x829   : > { %v3215_v13 = vadd.f32 %v3214_v12, %v3213_v11 }
 0x82b   : > { %v2646_v14 = vmul.f32 0.03125, %v3215_v13 }
 0x82d   : > { %3068 = vmatmul.mubr.msk.f32.vlgmr.msra.gmra.mxu0 %vm1267_vm15, %v2646_v14 }
 0x8ed   : > { %v2716_v15 = vpop.f32.mrf.mxu0 }
 0x8ee   : > { %v2717_v16 = vadd.f32 1e-05, %v2716_v15 }
 0x8ef   : > { %v2718_v17 = vpop.f32.mrf.mxu0 }
 0x8f0   : > { %3529 = vrsqrt.f32 %v2717_v16  ;;  %v2719_v18 = vadd.f32 1e-05, %v2718_v17 }
 0x8f2   : > { %3531 = vrsqrt.f32 %v2719_v18 }
 0x8fd   : > { %v3530_v28 = vpop.eup %3529 }
 0x8fe   : > { %v2726_v33 = vrot.slane %v3530_v28, %v4133_v39 }
 0x8ff   : > { %v3532_v35 = vpop.eup %3531 }
 0x900   : > { %v2731_v37 = vmul.f32 %v2726_v33, %v2558_v43  ;;  %v2730_v22 = vrot.slane %v3532_v35, %v4133_v39 }
 0x902   : > { %v2744_v25 = vmul.f32 %v2737_v34, %v2731_v37  ;;  %v2732_v26 = vmul.f32 %v2730_v22, %v2559_v47 }
 0x904   : > { %v2757_v51 = vadd.f32 %v2750_v21, %v2744_v25  ;;  %v2745_v52 = vmul.f32 %v2741_v23, %v2732_v26 }
 0x906   : > { %v2768_v53 = vadd.f32 %v2764_v24, %v2757_v51  ;;  %v2758_v54 = vadd.f32 %v2754_v27, %v2745_v52 }
 0x908   : > { %v2769_v45 = vadd.f32 %v2765_v49, %v2758_v54  ;;  %v2770_v55 = vmax.f32 %v2768_v53, 0.0 }
 0x90a   : > { %v2771_v56 = vmax.f32 %v2769_v45, 0.0 }
 0x90c   : > { %v3075_v57 = vpack.c.bf16 %v2771_v56, %v2770_v55 }
 0x90e   : > { %v2786_v58 = vshrl.u32 %v3075_v57, 16  ;;  %v2789_v59 = vshll.u32 %v3075_v57, 16 }
 0x910   : > { %v2788_v39 = vrot.slane %v2786_v58, 7 }
 0x912   : > { %v2791_v30 = vor.u32 %v2789_v59, %v2788_v39 }
 0x914   : > { %v2794_v41 = vsel %vm1594_vm6, %v2791_v30, %v2793_v29 }
 0x915   : > { %2795 = vst [vmem:[%s3760_s12] sm:$0x77] %v2794_v41 }
 0x916 PF: > { %s21_s17 = sadd.s32 1, %s3539_s17  }
 0x917   : > { %p18_p4 = scmp.ge.s32.totalorder %s21_s17, 4  }
 0x919   :  { %20 = sbr.rel (!%p18_p4) target bundleno = 1 (0x1), region = 94 }

</bundles_post_ra>
